<compile_context>
chip_gen: v7x
topology: tpu7x:2x2x1
jax: 0.10.0
libtpu: 0.0.40
codegen_flags: <defaults>
</compile_context>

<pallas_src>
import numpy as np
import jax
import jax.numpy as jnp
from jax.experimental import pallas as pl
from jax.experimental.pallas import tpu as pltpu


KSIZE = 4   # conv1-3 kernel size
CPAD = 8    # channel padding (sublane multiple)


def build_forward(H, W, Cin=4, Cout=6):
    """Returns a jitted forward for input (1, Cin, H, W)."""
    H1, W1 = H - 1, W - 1          # conv1 output spatial (4x4, pad 1 -> shrink by 1)
    H2, W2 = H1 - 1, W1 - 1        # conv2 output
    H3, W3 = H2 - 1, W2 - 1        # conv3 / conv4 output
    # torch.matmul(v9, v7) contracts v8's channel dim against v7's height dim.
    assert Cout == H3, f"tail matmul needs Cout == H-3 (got Cout={Cout}, H={H})"

    WC = W + 2                     # flat row stride shared by every slab / activation
    HMAX = H + 3                   # slab rows (margin so shifted tap reads stay in bounds)
    NSLAB = HMAX * WC
    NSLABP = ((NSLAB + 127) // 128) * 128     # lane-pad slabs to a multiple of 128
    P0 = WC + 1                    # flat slab position of pixel (0, 0)

    M1 = H1 * WC                   # conv1 flat output length
    M2 = H2 * WC                   # conv2 flat output length
    M3 = H3 * WC                   # valid part of conv3/conv4 flat output
    M3P = 128                      # lane-padded tail width
    assert M3 <= M3P
    assert 3 * WC + 3 + max(M1, M2, M3P) <= NSLABP   # every tap read stays in bounds

    # packed-parameter slab column layout
    PW_CONV = KSIZE * KSIZE * CPAD           # 128 columns per 4x4 conv layer
    OFF_W4 = 3 * PW_CONV                     # (8, 8) 1x1-conv weight
    OFF_B = OFF_W4 + CPAD                    # 4 bias columns
    PW = 512

    taps = [(kh, kw) for kh in range(KSIZE) for kw in range(KSIZE)]

    def iota(shape, dim):
        return jax.lax.broadcasted_iota(jnp.int32, shape, dim)

    def col_mask(M, w_valid, m_limit=None):
        # (1, M) bool: (q % WC) < w_valid  (and q < m_limit), built without vector
        # integer div/mod — compare against static per-row boundaries instead.
        q = iota((1, M), 1)
        ok = None
        for r in range(0, M, WC):
            c = (q >= r) & (q < r + w_valid)
            ok = c if ok is None else ok | c
        if m_limit is not None:
            ok = ok & (q < m_limit)
        return ok

    def conv44(read, wl, b, M, w_valid, m_limit=None):
        # 4x4 / pad-1 conv in flat layout: 16 accumulated (8,8)@(8,M) MXU matmuls on
        # lane-shifted slab slices (no im2col concat), + bias + relu, junk cols zeroed.
        acc = None
        for t, (kh, kw) in enumerate(taps):
            wt = wl[:, t * CPAD:(t + 1) * CPAD]                       # (8, 8)
            part = jnp.dot(wt, read(kh * WC + kw, M),
                           preferred_element_type=jnp.float32)
            acc = part if acc is None else acc + part
        valid = col_mask(M, w_valid, m_limit)
        out = jnp.where(valid, jnp.maximum(acc + b, 0.0), 0.0)        # (8, M)
        return out, valid

    # ---------------------------- fused kernel ----------------------------
    def kernel(x_ref, p_ref, o_ref, slab2, slab3):
        w1 = p_ref[:, 0 * PW_CONV:1 * PW_CONV]
        w2 = p_ref[:, 1 * PW_CONV:2 * PW_CONV]
        w3 = p_ref[:, 2 * PW_CONV:3 * PW_CONV]
        w4 = p_ref[:, OFF_W4:OFF_W4 + CPAD]
        b1 = p_ref[:, OFF_B + 0:OFF_B + 1]
        b2 = p_ref[:, OFF_B + 1:OFF_B + 2]
        b3 = p_ref[:, OFF_B + 2:OFF_B + 3]
        b4 = p_ref[:, OFF_B + 3:OFF_B + 4]

        # ---- conv1 + relu (reads the pre-padded input slab) ----
        o1, _ = conv44(lambda off, M: x_ref[:, off:off + M], w1, b1, M1, W1)
        slab2[...] = jnp.zeros((CPAD, NSLABP), jnp.float32)
        slab2[:, P0:P0 + M1] = o1          # interior; ring of zeros = conv padding

        # ---- conv2 + relu ----
        o2, _ = conv44(lambda off, M: slab2[:, off:off + M], w2, b2, M2, W2)
        slab3[...] = jnp.zeros((CPAD, NSLABP), jnp.float32)
        slab3[:, P0:P0 + M2] = o2

        # ---- conv3 + relu, computed directly at the lane-padded tail width ----
        o3, valid3 = conv44(lambda off, M: slab3[:, off:off + M], w3, b3,
                            M3P, W3, m_limit=M3)                      # (8, 128)

        # ---- conv4: 1x1, no relu; mask so bias does not leak into junk columns ----
        v7 = jnp.where(valid3,
                       jnp.dot(w4, o3, preferred_element_type=jnp.float32) + b4,
                       0.0)                                           # (8, 128) flat

        # ---- tail: v8 = ||v7||_w ; v9 = transpose ; v10 = v9 @ v7 ; sigmoid ----
        # L[p, k] = 1 iff p // WC == k   (128 x 8 block-row selector, iota-built)
        pp = iota((M3P, CPAD), 0)
        kk = iota((M3P, CPAD), 1) * WC
        L = jnp.where((pp >= kk) & (pp < kk + WC), 1.0, 0.0)
        # R[h, q] = 1 iff q // WC == h   (8 x 128) == L^T
        qq = iota((CPAD, M3P), 1)
        hh = iota((CPAD, M3P), 0) * WC
        R = jnp.where((qq >= hh) & (qq < hh + WC), 1.0, 0.0)

        # v8 on the MXU:  nrm[c, h] = ||v7[c, h, :]||
        nrm = jnp.sqrt(jnp.dot(v7 * v7, L, preferred_element_type=jnp.float32))  # (8, 8)

        # B[p, q] = nrm[p // WC, q // WC] * (p % WC == q % WC);  v10 = v7 @ B
        B2 = jnp.dot(jnp.dot(L, nrm, preferred_element_type=jnp.float32), R,
                     preferred_element_type=jnp.float32)              # (128, 128)
        dpq = iota((M3P, M3P), 0) - iota((M3P, M3P), 1)
        same_w = dpq == 0
        for m in range(WC, M3P, WC):
            same_w = same_w | (dpq == m) | (dpq == -m)
        v10 = jnp.dot(v7, jnp.where(same_w, B2, 0.0),
                      preferred_element_type=jnp.float32)             # (8, 128) flat

        # lane-dense flat output slab: single unmasked full-width store
        o_ref[...] = pl.reciprocal(1.0 + jnp.exp(-v10), approx=True)

    vmem = pl.BlockSpec(memory_space=pltpu.MemorySpace.VMEM)
    call = pl.pallas_call(
        kernel,
        out_shape=jax.ShapeDtypeStruct((CPAD, M3P), jnp.float32),
        in_specs=[vmem, vmem],                 # only 2 input DMAs
        out_specs=vmem,
        scratch_shapes=[
            pltpu.VMEM((CPAD, NSLABP), jnp.float32),   # zero-padded slab holding v2
            pltpu.VMEM((CPAD, NSLABP), jnp.float32),   # zero-padded slab holding v4
        ],
    )

    # ------------------- host-side packing (fused into the jit) -------------------
    def prep_w(w):
        # (Cout, Cin, kh, kw) -> (8, 128); K ordered (kh, kw, ci) -> tap t at cols [8t, 8t+8)
        co, ci, kh, kw = w.shape
        wt = jnp.transpose(w, (0, 2, 3, 1))
        wt = jnp.pad(wt, ((0, CPAD - co), (0, 0), (0, 0), (0, CPAD - ci)))
        return wt.reshape(CPAD, kh * kw * CPAD)

    def prep_b(b):
        return jnp.pad(b, (0, CPAD - b.shape[0])).reshape(CPAD, 1)

    @jax.jit
    def forward(x, params):
        assert x.shape == (1, Cin, H, W)
        # zero-padded, channel-padded flat input slab (one DMA)
        slab = jnp.zeros((CPAD, HMAX, WC), jnp.float32)
        slab = slab.at[:Cin, 1:1 + H, 1:1 + W].set(x[0])
        slab = jnp.pad(slab.reshape(CPAD, NSLAB), ((0, 0), (0, NSLABP - NSLAB)))

        # all conv weights + biases packed into one (8, 512) slab (one DMA)
        w4m = jnp.pad(params['w4'][:, :, 0, 0],
                      ((0, CPAD - Cout), (0, CPAD - Cout)))
        bias = jnp.concatenate([prep_b(params['b1']), prep_b(params['b2']),
                                prep_b(params['b3']), prep_b(params['b4'])], axis=1)
        pslab = jnp.concatenate([prep_w(params['w1']), prep_w(params['w2']),
                                 prep_w(params['w3']), w4m, bias], axis=1)
        pslab = jnp.pad(pslab, ((0, 0), (0, PW - pslab.shape[1])))

        flat = call(slab, pslab)                                  # (8, 128) lane-dense
        y = flat[:Cout, :M3].reshape(Cout, H3, WC)[:, :, :W3]     # drop pad/junk cols
        return y[None]                                            # (1, Cout, H3, W3)

    return forward


# ---------------------------- pure-JAX reference ----------------------------
@jax.jit
def ref_forward(x, params):
    def conv(x, w, b, pad):
        y = jax.lax.conv_general_dilated(
            x, w, window_strides=(1, 1), padding=[(pad, pad), (pad, pad)],
            dimension_numbers=('NCHW', 'OIHW', 'NCHW'),
            precision=jax.lax.Precision.HIGHEST)
        return y + b[None, :, None, None]
    v2 = jnp.maximum(conv(x,  params['w1'], params['b1'], 1), 0.0)
    v4 = jnp.maximum(conv(v2, params['w2'], params['b2'], 1), 0.0)
    v6 = jnp.maximum(conv(v4, params['w3'], params['b3'], 1), 0.0)
    v7 = conv(v6, params['w4'], params['b4'], 0)
    v8 = jnp.sqrt(jnp.sum(v7 * v7, axis=-1))          # torch.norm(v7, dim=-1)
    v9 = jnp.swapaxes(v8, -1, 1)                      # torch.transpose(v8, -1, 1)
    v10 = jnp.matmul(v9, v7, precision=jax.lax.Precision.HIGHEST)
    return jax.nn.sigmoid(v10)


# ---------------------------- main ----------------------------
if __name__ == "__main__":
    key = jax.random.PRNGKey(0)
    ks = jax.random.split(key, 9)
    H, W = 9, 19          # see NOTE at top about why H=9
    x = jax.random.normal(ks[0], (1, 4, H, W), dtype=jnp.float32)
    params = {
        'w1': 0.1 * jax.random.normal(ks[1], (6, 4, 4, 4), jnp.float32),
        'b1': 0.1 * jax.random.normal(ks[2], (6,), jnp.float32),
        'w2': 0.1 * jax.random.normal(ks[3], (6, 6, 4, 4), jnp.float32),
        'b2': 0.1 * jax.random.normal(ks[4], (6,), jnp.float32),
        'w3': 0.1 * jax.random.normal(ks[5], (6, 6, 4, 4), jnp.float32),
        'b3': 0.1 * jax.random.normal(ks[6], (6,), jnp.float32),
        'w4': 0.1 * jax.random.normal(ks[7], (6, 6, 1, 1), jnp.float32),
        'b4': 0.1 * jax.random.normal(ks[8], (6,), jnp.float32),
    }

    forward = build_forward(H, W, Cin=4, Cout=6)
    out = jax.block_until_ready(forward(x, params))
    ref = jax.block_until_ready(ref_forward(x, params))

    assert out.shape == (1, 6, H - 3, W - 3), out.shape
    max_err = float(np.max(np.abs(np.asarray(out) - np.asarray(ref))))
    assert max_err < 1e-2, f"max abs err {max_err}"
    print("KERNEL_OK")
</pallas_src>

<mosaic_0001>
module attributes {stable_mosaic.version = 11 : i64} {
  func.func @kernel(%arg0: memref<8x256xf32, #tpu.memory_space<vmem>>, %arg1: memref<8x512xf32, #tpu.memory_space<vmem>>, %arg2: memref<8x128xf32, #tpu.memory_space<vmem>>, %arg3: memref<8x256xf32, #tpu.memory_space<vmem>>, %arg4: memref<8x256xf32, #tpu.memory_space<vmem>>) attributes {dimension_semantics = [], scalar_prefetch = 0 : i64, scratch_operands = 2 : i64, tpu.core_type = #tpu.core_type<tc>} {
    %c0 = arith.constant 0 : index
    %c0_0 = arith.constant 0 : index
    %0 = vector.load %arg1[%c0, %c0_0] : memref<8x512xf32, #tpu.memory_space<vmem>>, vector<8x128xf32>
    %c0_1 = arith.constant 0 : index
    %c128 = arith.constant 128 : index
    %1 = vector.load %arg1[%c0_1, %c128] : memref<8x512xf32, #tpu.memory_space<vmem>>, vector<8x128xf32>
    %c0_2 = arith.constant 0 : index
    %c256 = arith.constant 256 : index
    %2 = vector.load %arg1[%c0_2, %c256] : memref<8x512xf32, #tpu.memory_space<vmem>>, vector<8x128xf32>
    %c0_3 = arith.constant 0 : index
    %c384 = arith.constant 384 : index
    %3 = vector.load %arg1[%c0_3, %c384] : memref<8x512xf32, #tpu.memory_space<vmem>>, vector<8x8xf32>
    %c0_4 = arith.constant 0 : index
    %c392 = arith.constant 392 : index
    %4 = vector.load %arg1[%c0_4, %c392] : memref<8x512xf32, #tpu.memory_space<vmem>>, vector<8x1xf32>
    %c0_5 = arith.constant 0 : index
    %c393 = arith.constant 393 : index
    %5 = vector.load %arg1[%c0_5, %c393] : memref<8x512xf32, #tpu.memory_space<vmem>>, vector<8x1xf32>
    %c0_6 = arith.constant 0 : index
    %c394 = arith.constant 394 : index
    %6 = vector.load %arg1[%c0_6, %c394] : memref<8x512xf32, #tpu.memory_space<vmem>>, vector<8x1xf32>
    %c0_7 = arith.constant 0 : index
    %c395 = arith.constant 395 : index
    %7 = vector.load %arg1[%c0_7, %c395] : memref<8x512xf32, #tpu.memory_space<vmem>>, vector<8x1xf32>
    %8 = vector.extract_strided_slice %0 {offsets = [0, 0], sizes = [8, 8], strides = [1, 1]} : vector<8x128xf32> to vector<8x8xf32>
    %c0_8 = arith.constant 0 : index
    %c0_9 = arith.constant 0 : index
    %9 = vector.load %arg0[%c0_8, %c0_9] : memref<8x256xf32, #tpu.memory_space<vmem>>, vector<8x168xf32>
    %cst = arith.constant dense<0.000000e+00> : vector<8x168xf32>
    %10 = tpu.matmul %8, %9, %cst {dimension_numbers = #tpu.dot_dimension_numbers<[1], [0], [0], [1], [0, 0, 1, 1], [], []>} : vector<8x8xf32>, vector<8x168xf32>, vector<8x168xf32> -> vector<8x168xf32>
    %11 = vector.extract_strided_slice %0 {offsets = [0, 8], sizes = [8, 8], strides = [1, 1]} : vector<8x128xf32> to vector<8x8xf32>
    %c0_10 = arith.constant 0 : index
    %c1 = arith.constant 1 : index
    %12 = vector.load %arg0[%c0_10, %c1] : memref<8x256xf32, #tpu.memory_space<vmem>>, vector<8x168xf32>
    %cst_11 = arith.constant dense<0.000000e+00> : vector<8x168xf32>
    %13 = tpu.matmul %11, %12, %cst_11 {dimension_numbers = #tpu.dot_dimension_numbers<[1], [0], [0], [1], [0, 0, 1, 1], [], []>} : vector<8x8xf32>, vector<8x168xf32>, vector<8x168xf32> -> vector<8x168xf32>
    %14 = arith.addf %10, %13 : vector<8x168xf32>
    %15 = vector.extract_strided_slice %0 {offsets = [0, 16], sizes = [8, 8], strides = [1, 1]} : vector<8x128xf32> to vector<8x8xf32>
    %c0_12 = arith.constant 0 : index
    %c2 = arith.constant 2 : index
    %16 = vector.load %arg0[%c0_12, %c2] : memref<8x256xf32, #tpu.memory_space<vmem>>, vector<8x168xf32>
    %cst_13 = arith.constant dense<0.000000e+00> : vector<8x168xf32>
    %17 = tpu.matmul %15, %16, %cst_13 {dimension_numbers = #tpu.dot_dimension_numbers<[1], [0], [0], [1], [0, 0, 1, 1], [], []>} : vector<8x8xf32>, vector<8x168xf32>, vector<8x168xf32> -> vector<8x168xf32>
    %18 = arith.addf %14, %17 : vector<8x168xf32>
    %19 = vector.extract_strided_slice %0 {offsets = [0, 24], sizes = [8, 8], strides = [1, 1]} : vector<8x128xf32> to vector<8x8xf32>
    %c0_14 = arith.constant 0 : index
    %c3 = arith.constant 3 : index
    %20 = vector.load %arg0[%c0_14, %c3] : memref<8x256xf32, #tpu.memory_space<vmem>>, vector<8x168xf32>
    %cst_15 = arith.constant dense<0.000000e+00> : vector<8x168xf32>
    %21 = tpu.matmul %19, %20, %cst_15 {dimension_numbers = #tpu.dot_dimension_numbers<[1], [0], [0], [1], [0, 0, 1, 1], [], []>} : vector<8x8xf32>, vector<8x168xf32>, vector<8x168xf32> -> vector<8x168xf32>
    %22 = arith.addf %18, %21 : vector<8x168xf32>
    %23 = vector.extract_strided_slice %0 {offsets = [0, 32], sizes = [8, 8], strides = [1, 1]} : vector<8x128xf32> to vector<8x8xf32>
    %c0_16 = arith.constant 0 : index
    %c21 = arith.constant 21 : index
    %24 = vector.load %arg0[%c0_16, %c21] : memref<8x256xf32, #tpu.memory_space<vmem>>, vector<8x168xf32>
    %cst_17 = arith.constant dense<0.000000e+00> : vector<8x168xf32>
    %25 = tpu.matmul %23, %24, %cst_17 {dimension_numbers = #tpu.dot_dimension_numbers<[1], [0], [0], [1], [0, 0, 1, 1], [], []>} : vector<8x8xf32>, vector<8x168xf32>, vector<8x168xf32> -> vector<8x168xf32>
    %26 = arith.addf %22, %25 : vector<8x168xf32>
    %27 = vector.extract_strided_slice %0 {offsets = [0, 40], sizes = [8, 8], strides = [1, 1]} : vector<8x128xf32> to vector<8x8xf32>
    %c0_18 = arith.constant 0 : index
    %c22 = arith.constant 22 : index
    %28 = vector.load %arg0[%c0_18, %c22] : memref<8x256xf32, #tpu.memory_space<vmem>>, vector<8x168xf32>
    %cst_19 = arith.constant dense<0.000000e+00> : vector<8x168xf32>
    %29 = tpu.matmul %27, %28, %cst_19 {dimension_numbers = #tpu.dot_dimension_numbers<[1], [0], [0], [1], [0, 0, 1, 1], [], []>} : vector<8x8xf32>, vector<8x168xf32>, vector<8x168xf32> -> vector<8x168xf32>
    %30 = arith.addf %26, %29 : vector<8x168xf32>
    %31 = vector.extract_strided_slice %0 {offsets = [0, 48], sizes = [8, 8], strides = [1, 1]} : vector<8x128xf32> to vector<8x8xf32>
    %c0_20 = arith.constant 0 : index
    %c23 = arith.constant 23 : index
    %32 = vector.load %arg0[%c0_20, %c23] : memref<8x256xf32, #tpu.memory_space<vmem>>, vector<8x168xf32>
    %cst_21 = arith.constant dense<0.000000e+00> : vector<8x168xf32>
    %33 = tpu.matmul %31, %32, %cst_21 {dimension_numbers = #tpu.dot_dimension_numbers<[1], [0], [0], [1], [0, 0, 1, 1], [], []>} : vector<8x8xf32>, vector<8x168xf32>, vector<8x168xf32> -> vector<8x168xf32>
    %34 = arith.addf %30, %33 : vector<8x168xf32>
    %35 = vector.extract_strided_slice %0 {offsets = [0, 56], sizes = [8, 8], strides = [1, 1]} : vector<8x128xf32> to vector<8x8xf32>
    %c0_22 = arith.constant 0 : index
    %c24 = arith.constant 24 : index
    %36 = vector.load %arg0[%c0_22, %c24] : memref<8x256xf32, #tpu.memory_space<vmem>>, vector<8x168xf32>
    %cst_23 = arith.constant dense<0.000000e+00> : vector<8x168xf32>
    %37 = tpu.matmul %35, %36, %cst_23 {dimension_numbers = #tpu.dot_dimension_numbers<[1], [0], [0], [1], [0, 0, 1, 1], [], []>} : vector<8x8xf32>, vector<8x168xf32>, vector<8x168xf32> -> vector<8x168xf32>
    %38 = arith.addf %34, %37 : vector<8x168xf32>
    %39 = vector.extract_strided_slice %0 {offsets = [0, 64], sizes = [8, 8], strides = [1, 1]} : vector<8x128xf32> to vector<8x8xf32>
    %c0_24 = arith.constant 0 : index
    %c42 = arith.constant 42 : index
    %40 = vector.load %arg0[%c0_24, %c42] : memref<8x256xf32, #tpu.memory_space<vmem>>, vector<8x168xf32>
    %cst_25 = arith.constant dense<0.000000e+00> : vector<8x168xf32>
    %41 = tpu.matmul %39, %40, %cst_25 {dimension_numbers = #tpu.dot_dimension_numbers<[1], [0], [0], [1], [0, 0, 1, 1], [], []>} : vector<8x8xf32>, vector<8x168xf32>, vector<8x168xf32> -> vector<8x168xf32>
    %42 = arith.addf %38, %41 : vector<8x168xf32>
    %43 = vector.extract_strided_slice %0 {offsets = [0, 72], sizes = [8, 8], strides = [1, 1]} : vector<8x128xf32> to vector<8x8xf32>
    %c0_26 = arith.constant 0 : index
    %c43 = arith.constant 43 : index
    %44 = vector.load %arg0[%c0_26, %c43] : memref<8x256xf32, #tpu.memory_space<vmem>>, vector<8x168xf32>
    %cst_27 = arith.constant dense<0.000000e+00> : vector<8x168xf32>
    %45 = tpu.matmul %43, %44, %cst_27 {dimension_numbers = #tpu.dot_dimension_numbers<[1], [0], [0], [1], [0, 0, 1, 1], [], []>} : vector<8x8xf32>, vector<8x168xf32>, vector<8x168xf32> -> vector<8x168xf32>
    %46 = arith.addf %42, %45 : vector<8x168xf32>
    %47 = vector.extract_strided_slice %0 {offsets = [0, 80], sizes = [8, 8], strides = [1, 1]} : vector<8x128xf32> to vector<8x8xf32>
    %c0_28 = arith.constant 0 : index
    %c44 = arith.constant 44 : index
    %48 = vector.load %arg0[%c0_28, %c44] : memref<8x256xf32, #tpu.memory_space<vmem>>, vector<8x168xf32>
    %cst_29 = arith.constant dense<0.000000e+00> : vector<8x168xf32>
    %49 = tpu.matmul %47, %48, %cst_29 {dimension_numbers = #tpu.dot_dimension_numbers<[1], [0], [0], [1], [0, 0, 1, 1], [], []>} : vector<8x8xf32>, vector<8x168xf32>, vector<8x168xf32> -> vector<8x168xf32>
    %50 = arith.addf %46, %49 : vector<8x168xf32>
    %51 = vector.extract_strided_slice %0 {offsets = [0, 88], sizes = [8, 8], strides = [1, 1]} : vector<8x128xf32> to vector<8x8xf32>
    %c0_30 = arith.constant 0 : index
    %c45 = arith.constant 45 : index
    %52 = vector.load %arg0[%c0_30, %c45] : memref<8x256xf32, #tpu.memory_space<vmem>>, vector<8x168xf32>
    %cst_31 = arith.constant dense<0.000000e+00> : vector<8x168xf32>
    %53 = tpu.matmul %51, %52, %cst_31 {dimension_numbers = #tpu.dot_dimension_numbers<[1], [0], [0], [1], [0, 0, 1, 1], [], []>} : vector<8x8xf32>, vector<8x168xf32>, vector<8x168xf32> -> vector<8x168xf32>
    %54 = arith.addf %50, %53 : vector<8x168xf32>
    %55 = vector.extract_strided_slice %0 {offsets = [0, 96], sizes = [8, 8], strides = [1, 1]} : vector<8x128xf32> to vector<8x8xf32>
    %c0_32 = arith.constant 0 : index
    %c63 = arith.constant 63 : index
    %56 = vector.load %arg0[%c0_32, %c63] : memref<8x256xf32, #tpu.memory_space<vmem>>, vector<8x168xf32>
    %cst_33 = arith.constant dense<0.000000e+00> : vector<8x168xf32>
    %57 = tpu.matmul %55, %56, %cst_33 {dimension_numbers = #tpu.dot_dimension_numbers<[1], [0], [0], [1], [0, 0, 1, 1], [], []>} : vector<8x8xf32>, vector<8x168xf32>, vector<8x168xf32> -> vector<8x168xf32>
    %58 = arith.addf %54, %57 : vector<8x168xf32>
    %59 = vector.extract_strided_slice %0 {offsets = [0, 104], sizes = [8, 8], strides = [1, 1]} : vector<8x128xf32> to vector<8x8xf32>
    %c0_34 = arith.constant 0 : index
    %c64 = arith.constant 64 : index
    %60 = vector.load %arg0[%c0_34, %c64] : memref<8x256xf32, #tpu.memory_space<vmem>>, vector<8x168xf32>
    %cst_35 = arith.constant dense<0.000000e+00> : vector<8x168xf32>
    %61 = tpu.matmul %59, %60, %cst_35 {dimension_numbers = #tpu.dot_dimension_numbers<[1], [0], [0], [1], [0, 0, 1, 1], [], []>} : vector<8x8xf32>, vector<8x168xf32>, vector<8x168xf32> -> vector<8x168xf32>
    %62 = arith.addf %58, %61 : vector<8x168xf32>
    %63 = vector.extract_strided_slice %0 {offsets = [0, 112], sizes = [8, 8], strides = [1, 1]} : vector<8x128xf32> to vector<8x8xf32>
    %c0_36 = arith.constant 0 : index
    %c65 = arith.constant 65 : index
    %64 = vector.load %arg0[%c0_36, %c65] : memref<8x256xf32, #tpu.memory_space<vmem>>, vector<8x168xf32>
    %cst_37 = arith.constant dense<0.000000e+00> : vector<8x168xf32>
    %65 = tpu.matmul %63, %64, %cst_37 {dimension_numbers = #tpu.dot_dimension_numbers<[1], [0], [0], [1], [0, 0, 1, 1], [], []>} : vector<8x8xf32>, vector<8x168xf32>, vector<8x168xf32> -> vector<8x168xf32>
    %66 = arith.addf %62, %65 : vector<8x168xf32>
    %67 = vector.extract_strided_slice %0 {offsets = [0, 120], sizes = [8, 8], strides = [1, 1]} : vector<8x128xf32> to vector<8x8xf32>
    %c0_38 = arith.constant 0 : index
    %c66 = arith.constant 66 : index
    %68 = vector.load %arg0[%c0_38, %c66] : memref<8x256xf32, #tpu.memory_space<vmem>>, vector<8x168xf32>
    %cst_39 = arith.constant dense<0.000000e+00> : vector<8x168xf32>
    %69 = tpu.matmul %67, %68, %cst_39 {dimension_numbers = #tpu.dot_dimension_numbers<[1], [0], [0], [1], [0, 0, 1, 1], [], []>} : vector<8x8xf32>, vector<8x168xf32>, vector<8x168xf32> -> vector<8x168xf32>
    %70 = arith.addf %66, %69 : vector<8x168xf32>
    %71 = tpu.iota {dimensions = array<i32: 1>} : vector<1x168xi32>
    %c0_i32 = arith.constant 0 : i32
    %72 = vector.broadcast %c0_i32 : i32 to vector<1x168xi32>
    %73 = arith.cmpi sge, %71, %72 : vector<1x168xi32>
    %c18_i32 = arith.constant 18 : i32
    %74 = vector.broadcast %c18_i32 : i32 to vector<1x168xi32>
    %75 = arith.cmpi slt, %71, %74 : vector<1x168xi32>
    %76 = arith.andi %73, %75 : vector<1x168xi1>
    %c21_i32 = arith.constant 21 : i32
    %77 = vector.broadcast %c21_i32 : i32 to vector<1x168xi32>
    %78 = arith.cmpi sge, %71, %77 : vector<1x168xi32>
    %c39_i32 = arith.constant 39 : i32
    %79 = vector.broadcast %c39_i32 : i32 to vector<1x168xi32>
    %80 = arith.cmpi slt, %71, %79 : vector<1x168xi32>
    %81 = arith.andi %78, %80 : vector<1x168xi1>
    %82 = arith.ori %76, %81 : vector<1x168xi1>
    %c42_i32 = arith.constant 42 : i32
    %83 = vector.broadcast %c42_i32 : i32 to vector<1x168xi32>
    %84 = arith.cmpi sge, %71, %83 : vector<1x168xi32>
    %c60_i32 = arith.constant 60 : i32
    %85 = vector.broadcast %c60_i32 : i32 to vector<1x168xi32>
    %86 = arith.cmpi slt, %71, %85 : vector<1x168xi32>
    %87 = arith.andi %84, %86 : vector<1x168xi1>
    %88 = arith.ori %82, %87 : vector<1x168xi1>
    %c63_i32 = arith.constant 63 : i32
    %89 = vector.broadcast %c63_i32 : i32 to vector<1x168xi32>
    %90 = arith.cmpi sge, %71, %89 : vector<1x168xi32>
    %c81_i32 = arith.constant 81 : i32
    %91 = vector.broadcast %c81_i32 : i32 to vector<1x168xi32>
    %92 = arith.cmpi slt, %71, %91 : vector<1x168xi32>
    %93 = arith.andi %90, %92 : vector<1x168xi1>
    %94 = arith.ori %88, %93 : vector<1x168xi1>
    %c84_i32 = arith.constant 84 : i32
    %95 = vector.broadcast %c84_i32 : i32 to vector<1x168xi32>
    %96 = arith.cmpi sge, %71, %95 : vector<1x168xi32>
    %c102_i32 = arith.constant 102 : i32
    %97 = vector.broadcast %c102_i32 : i32 to vector<1x168xi32>
    %98 = arith.cmpi slt, %71, %97 : vector<1x168xi32>
    %99 = arith.andi %96, %98 : vector<1x168xi1>
    %100 = arith.ori %94, %99 : vector<1x168xi1>
    %c105_i32 = arith.constant 105 : i32
    %101 = vector.broadcast %c105_i32 : i32 to vector<1x168xi32>
    %102 = arith.cmpi sge, %71, %101 : vector<1x168xi32>
    %c123_i32 = arith.constant 123 : i32
    %103 = vector.broadcast %c123_i32 : i32 to vector<1x168xi32>
    %104 = arith.cmpi slt, %71, %103 : vector<1x168xi32>
    %105 = arith.andi %102, %104 : vector<1x168xi1>
    %106 = arith.ori %100, %105 : vector<1x168xi1>
    %c126_i32 = arith.constant 126 : i32
    %107 = vector.broadcast %c126_i32 : i32 to vector<1x168xi32>
    %108 = arith.cmpi sge, %71, %107 : vector<1x168xi32>
    %c144_i32 = arith.constant 144 : i32
    %109 = vector.broadcast %c144_i32 : i32 to vector<1x168xi32>
    %110 = arith.cmpi slt, %71, %109 : vector<1x168xi32>
    %111 = arith.andi %108, %110 : vector<1x168xi1>
    %112 = arith.ori %106, %111 : vector<1x168xi1>
    %c147_i32 = arith.constant 147 : i32
    %113 = vector.broadcast %c147_i32 : i32 to vector<1x168xi32>
    %114 = arith.cmpi sge, %71, %113 : vector<1x168xi32>
    %c165_i32 = arith.constant 165 : i32
    %115 = vector.broadcast %c165_i32 : i32 to vector<1x168xi32>
    %116 = arith.cmpi slt, %71, %115 : vector<1x168xi32>
    %117 = arith.andi %114, %116 : vector<1x168xi1>
    %118 = arith.ori %112, %117 : vector<1x168xi1>
    %119 = vector.broadcast %4 : vector<8x1xf32> to vector<8x168xf32>
    %120 = arith.addf %70, %119 : vector<8x168xf32>
    %cst_40 = arith.constant 0.000000e+00 : f32
    %121 = vector.broadcast %cst_40 : f32 to vector<8x168xf32>
    %122 = arith.maximumf %120, %121 : vector<8x168xf32>
    %cst_41 = arith.constant 0.000000e+00 : f32
    %123 = vector.shape_cast %118 : vector<1x168xi1> to vector<1x168xi1>
    %124 = vector.broadcast %123 : vector<1x168xi1> to vector<8x168xi1>
    %125 = vector.broadcast %cst_41 : f32 to vector<8x168xf32>
    %126 = arith.select %124, %122, %125 : vector<8x168xi1>, vector<8x168xf32>
    %cst_42 = arith.constant 0.000000e+00 : f32
    %127 = vector.broadcast %cst_42 : f32 to vector<8x256xf32>
    %c0_43 = arith.constant 0 : index
    %c0_44 = arith.constant 0 : index
    %128 = vector.load %arg3[%c0_43, %c0_44] : memref<8x256xf32, #tpu.memory_space<vmem>>, vector<8x256xf32>
    tpu.vector_store %arg3[%c0_43, %c0_44], %127 {strides = array<i32>} : memref<8x256xf32, #tpu.memory_space<vmem>>, vector<8x256xf32>,
    %c0_45 = arith.constant 0 : index
    %c22_46 = arith.constant 22 : index
    %129 = vector.load %arg3[%c0_45, %c22_46] : memref<8x256xf32, #tpu.memory_space<vmem>>, vector<8x168xf32>
    tpu.vector_store %arg3[%c0_45, %c22_46], %126 {strides = array<i32>} : memref<8x256xf32, #tpu.memory_space<vmem>>, vector<8x168xf32>,
    %130 = vector.extract_strided_slice %1 {offsets = [0, 0], sizes = [8, 8], strides = [1, 1]} : vector<8x128xf32> to vector<8x8xf32>
    %c0_47 = arith.constant 0 : index
    %c0_48 = arith.constant 0 : index
    %131 = vector.load %arg3[%c0_47, %c0_48] : memref<8x256xf32, #tpu.memory_space<vmem>>, vector<8x147xf32>
    %cst_49 = arith.constant dense<0.000000e+00> : vector<8x147xf32>
    %132 = tpu.matmul %130, %131, %cst_49 {dimension_numbers = #tpu.dot_dimension_numbers<[1], [0], [0], [1], [0, 0, 1, 1], [], []>} : vector<8x8xf32>, vector<8x147xf32>, vector<8x147xf32> -> vector<8x147xf32>
    %133 = vector.extract_strided_slice %1 {offsets = [0, 8], sizes = [8, 8], strides = [1, 1]} : vector<8x128xf32> to vector<8x8xf32>
    %c0_50 = arith.constant 0 : index
    %c1_51 = arith.constant 1 : index
    %134 = vector.load %arg3[%c0_50, %c1_51] : memref<8x256xf32, #tpu.memory_space<vmem>>, vector<8x147xf32>
    %cst_52 = arith.constant dense<0.000000e+00> : vector<8x147xf32>
    %135 = tpu.matmul %133, %134, %cst_52 {dimension_numbers = #tpu.dot_dimension_numbers<[1], [0], [0], [1], [0, 0, 1, 1], [], []>} : vector<8x8xf32>, vector<8x147xf32>, vector<8x147xf32> -> vector<8x147xf32>
    %136 = arith.addf %132, %135 : vector<8x147xf32>
    %137 = vector.extract_strided_slice %1 {offsets = [0, 16], sizes = [8, 8], strides = [1, 1]} : vector<8x128xf32> to vector<8x8xf32>
    %c0_53 = arith.constant 0 : index
    %c2_54 = arith.constant 2 : index
    %138 = vector.load %arg3[%c0_53, %c2_54] : memref<8x256xf32, #tpu.memory_space<vmem>>, vector<8x147xf32>
    %cst_55 = arith.constant dense<0.000000e+00> : vector<8x147xf32>
    %139 = tpu.matmul %137, %138, %cst_55 {dimension_numbers = #tpu.dot_dimension_numbers<[1], [0], [0], [1], [0, 0, 1, 1], [], []>} : vector<8x8xf32>, vector<8x147xf32>, vector<8x147xf32> -> vector<8x147xf32>
    %140 = arith.addf %136, %139 : vector<8x147xf32>
    %141 = vector.extract_strided_slice %1 {offsets = [0, 24], sizes = [8, 8], strides = [1, 1]} : vector<8x128xf32> to vector<8x8xf32>
    %c0_56 = arith.constant 0 : index
    %c3_57 = arith.constant 3 : index
    %142 = vector.load %arg3[%c0_56, %c3_57] : memref<8x256xf32, #tpu.memory_space<vmem>>, vector<8x147xf32>
    %cst_58 = arith.constant dense<0.000000e+00> : vector<8x147xf32>
    %143 = tpu.matmul %141, %142, %cst_58 {dimension_numbers = #tpu.dot_dimension_numbers<[1], [0], [0], [1], [0, 0, 1, 1], [], []>} : vector<8x8xf32>, vector<8x147xf32>, vector<8x147xf32> -> vector<8x147xf32>
    %144 = arith.addf %140, %143 : vector<8x147xf32>
    %145 = vector.extract_strided_slice %1 {offsets = [0, 32], sizes = [8, 8], strides = [1, 1]} : vector<8x128xf32> to vector<8x8xf32>
    %c0_59 = arith.constant 0 : index
    %c21_60 = arith.constant 21 : index
    %146 = vector.load %arg3[%c0_59, %c21_60] : memref<8x256xf32, #tpu.memory_space<vmem>>, vector<8x147xf32>
    %cst_61 = arith.constant dense<0.000000e+00> : vector<8x147xf32>
    %147 = tpu.matmul %145, %146, %cst_61 {dimension_numbers = #tpu.dot_dimension_numbers<[1], [0], [0], [1], [0, 0, 1, 1], [], []>} : vector<8x8xf32>, vector<8x147xf32>, vector<8x147xf32> -> vector<8x147xf32>
    %148 = arith.addf %144, %147 : vector<8x147xf32>
    %149 = vector.extract_strided_slice %1 {offsets = [0, 40], sizes = [8, 8], strides = [1, 1]} : vector<8x128xf32> to vector<8x8xf32>
    %c0_62 = arith.constant 0 : index
    %c22_63 = arith.constant 22 : index
    %150 = vector.load %arg3[%c0_62, %c22_63] : memref<8x256xf32, #tpu.memory_space<vmem>>, vector<8x147xf32>
    %cst_64 = arith.constant dense<0.000000e+00> : vector<8x147xf32>
    %151 = tpu.matmul %149, %150, %cst_64 {dimension_numbers = #tpu.dot_dimension_numbers<[1], [0], [0], [1], [0, 0, 1, 1], [], []>} : vector<8x8xf32>, vector<8x147xf32>, vector<8x147xf32> -> vector<8x147xf32>
    %152 = arith.addf %148, %151 : vector<8x147xf32>
    %153 = vector.extract_strided_slice %1 {offsets = [0, 48], sizes = [8, 8], strides = [1, 1]} : vector<8x128xf32> to vector<8x8xf32>
    %c0_65 = arith.constant 0 : index
    %c23_66 = arith.constant 23 : index
    %154 = vector.load %arg3[%c0_65, %c23_66] : memref<8x256xf32, #tpu.memory_space<vmem>>, vector<8x147xf32>
    %cst_67 = arith.constant dense<0.000000e+00> : vector<8x147xf32>
    %155 = tpu.matmul %153, %154, %cst_67 {dimension_numbers = #tpu.dot_dimension_numbers<[1], [0], [0], [1], [0, 0, 1, 1], [], []>} : vector<8x8xf32>, vector<8x147xf32>, vector<8x147xf32> -> vector<8x147xf32>
    %156 = arith.addf %152, %155 : vector<8x147xf32>
    %157 = vector.extract_strided_slice %1 {offsets = [0, 56], sizes = [8, 8], strides = [1, 1]} : vector<8x128xf32> to vector<8x8xf32>
    %c0_68 = arith.constant 0 : index
    %c24_69 = arith.constant 24 : index
    %158 = vector.load %arg3[%c0_68, %c24_69] : memref<8x256xf32, #tpu.memory_space<vmem>>, vector<8x147xf32>
    %cst_70 = arith.constant dense<0.000000e+00> : vector<8x147xf32>
    %159 = tpu.matmul %157, %158, %cst_70 {dimension_numbers = #tpu.dot_dimension_numbers<[1], [0], [0], [1], [0, 0, 1, 1], [], []>} : vector<8x8xf32>, vector<8x147xf32>, vector<8x147xf32> -> vector<8x147xf32>
    %160 = arith.addf %156, %159 : vector<8x147xf32>
    %161 = vector.extract_strided_slice %1 {offsets = [0, 64], sizes = [8, 8], strides = [1, 1]} : vector<8x128xf32> to vector<8x8xf32>
    %c0_71 = arith.constant 0 : index
    %c42_72 = arith.constant 42 : index
    %162 = vector.load %arg3[%c0_71, %c42_72] : memref<8x256xf32, #tpu.memory_space<vmem>>, vector<8x147xf32>
    %cst_73 = arith.constant dense<0.000000e+00> : vector<8x147xf32>
    %163 = tpu.matmul %161, %162, %cst_73 {dimension_numbers = #tpu.dot_dimension_numbers<[1], [0], [0], [1], [0, 0, 1, 1], [], []>} : vector<8x8xf32>, vector<8x147xf32>, vector<8x147xf32> -> vector<8x147xf32>
    %164 = arith.addf %160, %163 : vector<8x147xf32>
    %165 = vector.extract_strided_slice %1 {offsets = [0, 72], sizes = [8, 8], strides = [1, 1]} : vector<8x128xf32> to vector<8x8xf32>
    %c0_74 = arith.constant 0 : index
    %c43_75 = arith.constant 43 : index
    %166 = vector.load %arg3[%c0_74, %c43_75] : memref<8x256xf32, #tpu.memory_space<vmem>>, vector<8x147xf32>
    %cst_76 = arith.constant dense<0.000000e+00> : vector<8x147xf32>
    %167 = tpu.matmul %165, %166, %cst_76 {dimension_numbers = #tpu.dot_dimension_numbers<[1], [0], [0], [1], [0, 0, 1, 1], [], []>} : vector<8x8xf32>, vector<8x147xf32>, vector<8x147xf32> -> vector<8x147xf32>
    %168 = arith.addf %164, %167 : vector<8x147xf32>
    %169 = vector.extract_strided_slice %1 {offsets = [0, 80], sizes = [8, 8], strides = [1, 1]} : vector<8x128xf32> to vector<8x8xf32>
    %c0_77 = arith.constant 0 : index
    %c44_78 = arith.constant 44 : index
    %170 = vector.load %arg3[%c0_77, %c44_78] : memref<8x256xf32, #tpu.memory_space<vmem>>, vector<8x147xf32>
    %cst_79 = arith.constant dense<0.000000e+00> : vector<8x147xf32>
    %171 = tpu.matmul %169, %170, %cst_79 {dimension_numbers = #tpu.dot_dimension_numbers<[1], [0], [0], [1], [0, 0, 1, 1], [], []>} : vector<8x8xf32>, vector<8x147xf32>, vector<8x147xf32> -> vector<8x147xf32>
    %172 = arith.addf %168, %171 : vector<8x147xf32>
    %173 = vector.extract_strided_slice %1 {offsets = [0, 88], sizes = [8, 8], strides = [1, 1]} : vector<8x128xf32> to vector<8x8xf32>
    %c0_80 = arith.constant 0 : index
    %c45_81 = arith.constant 45 : index
    %174 = vector.load %arg3[%c0_80, %c45_81] : memref<8x256xf32, #tpu.memory_space<vmem>>, vector<8x147xf32>
    %cst_82 = arith.constant dense<0.000000e+00> : vector<8x147xf32>
    %175 = tpu.matmul %173, %174, %cst_82 {dimension_numbers = #tpu.dot_dimension_numbers<[1], [0], [0], [1], [0, 0, 1, 1], [], []>} : vector<8x8xf32>, vector<8x147xf32>, vector<8x147xf32> -> vector<8x147xf32>
    %176 = arith.addf %172, %175 : vector<8x147xf32>
    %177 = vector.extract_strided_slice %1 {offsets = [0, 96], sizes = [8, 8], strides = [1, 1]} : vector<8x128xf32> to vector<8x8xf32>
    %c0_83 = arith.constant 0 : index
    %c63_84 = arith.constant 63 : index
    %178 = vector.load %arg3[%c0_83, %c63_84] : memref<8x256xf32, #tpu.memory_space<vmem>>, vector<8x147xf32>
    %cst_85 = arith.constant dense<0.000000e+00> : vector<8x147xf32>
    %179 = tpu.matmul %177, %178, %cst_85 {dimension_numbers = #tpu.dot_dimension_numbers<[1], [0], [0], [1], [0, 0, 1, 1], [], []>} : vector<8x8xf32>, vector<8x147xf32>, vector<8x147xf32> -> vector<8x147xf32>
    %180 = arith.addf %176, %179 : vector<8x147xf32>
    %181 = vector.extract_strided_slice %1 {offsets = [0, 104], sizes = [8, 8], strides = [1, 1]} : vector<8x128xf32> to vector<8x8xf32>
    %c0_86 = arith.constant 0 : index
    %c64_87 = arith.constant 64 : index
    %182 = vector.load %arg3[%c0_86, %c64_87] : memref<8x256xf32, #tpu.memory_space<vmem>>, vector<8x147xf32>
    %cst_88 = arith.constant dense<0.000000e+00> : vector<8x147xf32>
    %183 = tpu.matmul %181, %182, %cst_88 {dimension_numbers = #tpu.dot_dimension_numbers<[1], [0], [0], [1], [0, 0, 1, 1], [], []>} : vector<8x8xf32>, vector<8x147xf32>, vector<8x147xf32> -> vector<8x147xf32>
    %184 = arith.addf %180, %183 : vector<8x147xf32>
    %185 = vector.extract_strided_slice %1 {offsets = [0, 112], sizes = [8, 8], strides = [1, 1]} : vector<8x128xf32> to vector<8x8xf32>
    %c0_89 = arith.constant 0 : index
    %c65_90 = arith.constant 65 : index
    %186 = vector.load %arg3[%c0_89, %c65_90] : memref<8x256xf32, #tpu.memory_space<vmem>>, vector<8x147xf32>
    %cst_91 = arith.constant dense<0.000000e+00> : vector<8x147xf32>
    %187 = tpu.matmul %185, %186, %cst_91 {dimension_numbers = #tpu.dot_dimension_numbers<[1], [0], [0], [1], [0, 0, 1, 1], [], []>} : vector<8x8xf32>, vector<8x147xf32>, vector<8x147xf32> -> vector<8x147xf32>
    %188 = arith.addf %184, %187 : vector<8x147xf32>
    %189 = vector.extract_strided_slice %1 {offsets = [0, 120], sizes = [8, 8], strides = [1, 1]} : vector<8x128xf32> to vector<8x8xf32>
    %c0_92 = arith.constant 0 : index
    %c66_93 = arith.constant 66 : index
    %190 = vector.load %arg3[%c0_92, %c66_93] : memref<8x256xf32, #tpu.memory_space<vmem>>, vector<8x147xf32>
    %cst_94 = arith.constant dense<0.000000e+00> : vector<8x147xf32>
    %191 = tpu.matmul %189, %190, %cst_94 {dimension_numbers = #tpu.dot_dimension_numbers<[1], [0], [0], [1], [0, 0, 1, 1], [], []>} : vector<8x8xf32>, vector<8x147xf32>, vector<8x147xf32> -> vector<8x147xf32>
    %192 = arith.addf %188, %191 : vector<8x147xf32>
    %193 = tpu.iota {dimensions = array<i32: 1>} : vector<1x147xi32>
    %c0_i32_95 = arith.constant 0 : i32
    %194 = vector.broadcast %c0_i32_95 : i32 to vector<1x147xi32>
    %195 = arith.cmpi sge, %193, %194 : vector<1x147xi32>
    %c17_i32 = arith.constant 17 : i32
    %196 = vector.broadcast %c17_i32 : i32 to vector<1x147xi32>
    %197 = arith.cmpi slt, %193, %196 : vector<1x147xi32>
    %198 = arith.andi %195, %197 : vector<1x147xi1>
    %c21_i32_96 = arith.constant 21 : i32
    %199 = vector.broadcast %c21_i32_96 : i32 to vector<1x147xi32>
    %200 = arith.cmpi sge, %193, %199 : vector<1x147xi32>
    %c38_i32 = arith.constant 38 : i32
    %201 = vector.broadcast %c38_i32 : i32 to vector<1x147xi32>
    %202 = arith.cmpi slt, %193, %201 : vector<1x147xi32>
    %203 = arith.andi %200, %202 : vector<1x147xi1>
    %204 = arith.ori %198, %203 : vector<1x147xi1>
    %c42_i32_97 = arith.constant 42 : i32
    %205 = vector.broadcast %c42_i32_97 : i32 to vector<1x147xi32>
    %206 = arith.cmpi sge, %193, %205 : vector<1x147xi32>
    %c59_i32 = arith.constant 59 : i32
    %207 = vector.broadcast %c59_i32 : i32 to vector<1x147xi32>
    %208 = arith.cmpi slt, %193, %207 : vector<1x147xi32>
    %209 = arith.andi %206, %208 : vector<1x147xi1>
    %210 = arith.ori %204, %209 : vector<1x147xi1>
    %c63_i32_98 = arith.constant 63 : i32
    %211 = vector.broadcast %c63_i32_98 : i32 to vector<1x147xi32>
    %212 = arith.cmpi sge, %193, %211 : vector<1x147xi32>
    %c80_i32 = arith.constant 80 : i32
    %213 = vector.broadcast %c80_i32 : i32 to vector<1x147xi32>
    %214 = arith.cmpi slt, %193, %213 : vector<1x147xi32>
    %215 = arith.andi %212, %214 : vector<1x147xi1>
    %216 = arith.ori %210, %215 : vector<1x147xi1>
    %c84_i32_99 = arith.constant 84 : i32
    %217 = vector.broadcast %c84_i32_99 : i32 to vector<1x147xi32>
    %218 = arith.cmpi sge, %193, %217 : vector<1x147xi32>
    %c101_i32 = arith.constant 101 : i32
    %219 = vector.broadcast %c101_i32 : i32 to vector<1x147xi32>
    %220 = arith.cmpi slt, %193, %219 : vector<1x147xi32>
    %221 = arith.andi %218, %220 : vector<1x147xi1>
    %222 = arith.ori %216, %221 : vector<1x147xi1>
    %c105_i32_100 = arith.constant 105 : i32
    %223 = vector.broadcast %c105_i32_100 : i32 to vector<1x147xi32>
    %224 = arith.cmpi sge, %193, %223 : vector<1x147xi32>
    %c122_i32 = arith.constant 122 : i32
    %225 = vector.broadcast %c122_i32 : i32 to vector<1x147xi32>
    %226 = arith.cmpi slt, %193, %225 : vector<1x147xi32>
    %227 = arith.andi %224, %226 : vector<1x147xi1>
    %228 = arith.ori %222, %227 : vector<1x147xi1>
    %c126_i32_101 = arith.constant 126 : i32
    %229 = vector.broadcast %c126_i32_101 : i32 to vector<1x147xi32>
    %230 = arith.cmpi sge, %193, %229 : vector<1x147xi32>
    %c143_i32 = arith.constant 143 : i32
    %231 = vector.broadcast %c143_i32 : i32 to vector<1x147xi32>
    %232 = arith.cmpi slt, %193, %231 : vector<1x147xi32>
    %233 = arith.andi %230, %232 : vector<1x147xi1>
    %234 = arith.ori %228, %233 : vector<1x147xi1>
    %235 = vector.broadcast %5 : vector<8x1xf32> to vector<8x147xf32>
    %236 = arith.addf %192, %235 : vector<8x147xf32>
    %cst_102 = arith.constant 0.000000e+00 : f32
    %237 = vector.broadcast %cst_102 : f32 to vector<8x147xf32>
    %238 = arith.maximumf %236, %237 : vector<8x147xf32>
    %cst_103 = arith.constant 0.000000e+00 : f32
    %239 = vector.shape_cast %234 : vector<1x147xi1> to vector<1x147xi1>
    %240 = vector.broadcast %239 : vector<1x147xi1> to vector<8x147xi1>
    %241 = vector.broadcast %cst_103 : f32 to vector<8x147xf32>
    %242 = arith.select %240, %238, %241 : vector<8x147xi1>, vector<8x147xf32>
    %cst_104 = arith.constant 0.000000e+00 : f32
    %243 = vector.broadcast %cst_104 : f32 to vector<8x256xf32>
    %c0_105 = arith.constant 0 : index
    %c0_106 = arith.constant 0 : index
    %244 = vector.load %arg4[%c0_105, %c0_106] : memref<8x256xf32, #tpu.memory_space<vmem>>, vector<8x256xf32>
    tpu.vector_store %arg4[%c0_105, %c0_106], %243 {strides = array<i32>} : memref<8x256xf32, #tpu.memory_space<vmem>>, vector<8x256xf32>,
    %c0_107 = arith.constant 0 : index
    %c22_108 = arith.constant 22 : index
    %245 = vector.load %arg4[%c0_107, %c22_108] : memref<8x256xf32, #tpu.memory_space<vmem>>, vector<8x147xf32>
    tpu.vector_store %arg4[%c0_107, %c22_108], %242 {strides = array<i32>} : memref<8x256xf32, #tpu.memory_space<vmem>>, vector<8x147xf32>,
    %246 = vector.extract_strided_slice %2 {offsets = [0, 0], sizes = [8, 8], strides = [1, 1]} : vector<8x128xf32> to vector<8x8xf32>
    %c0_109 = arith.constant 0 : index
    %c0_110 = arith.constant 0 : index
    %247 = vector.load %arg4[%c0_109, %c0_110] : memref<8x256xf32, #tpu.memory_space<vmem>>, vector<8x128xf32>
    %cst_111 = arith.constant dense<0.000000e+00> : vector<8x128xf32>
    %248 = tpu.matmul %246, %247, %cst_111 {dimension_numbers = #tpu.dot_dimension_numbers<[1], [0], [0], [1], [0, 0, 1, 1], [], []>} : vector<8x8xf32>, vector<8x128xf32>, vector<8x128xf32> -> vector<8x128xf32>
    %249 = vector.extract_strided_slice %2 {offsets = [0, 8], sizes = [8, 8], strides = [1, 1]} : vector<8x128xf32> to vector<8x8xf32>
    %c0_112 = arith.constant 0 : index
    %c1_113 = arith.constant 1 : index
    %250 = vector.load %arg4[%c0_112, %c1_113] : memref<8x256xf32, #tpu.memory_space<vmem>>, vector<8x128xf32>
    %cst_114 = arith.constant dense<0.000000e+00> : vector<8x128xf32>
    %251 = tpu.matmul %249, %250, %cst_114 {dimension_numbers = #tpu.dot_dimension_numbers<[1], [0], [0], [1], [0, 0, 1, 1], [], []>} : vector<8x8xf32>, vector<8x128xf32>, vector<8x128xf32> -> vector<8x128xf32>
    %252 = arith.addf %248, %251 : vector<8x128xf32>
    %253 = vector.extract_strided_slice %2 {offsets = [0, 16], sizes = [8, 8], strides = [1, 1]} : vector<8x128xf32> to vector<8x8xf32>
    %c0_115 = arith.constant 0 : index
    %c2_116 = arith.constant 2 : index
    %254 = vector.load %arg4[%c0_115, %c2_116] : memref<8x256xf32, #tpu.memory_space<vmem>>, vector<8x128xf32>
    %cst_117 = arith.constant dense<0.000000e+00> : vector<8x128xf32>
    %255 = tpu.matmul %253, %254, %cst_117 {dimension_numbers = #tpu.dot_dimension_numbers<[1], [0], [0], [1], [0, 0, 1, 1], [], []>} : vector<8x8xf32>, vector<8x128xf32>, vector<8x128xf32> -> vector<8x128xf32>
    %256 = arith.addf %252, %255 : vector<8x128xf32>
    %257 = vector.extract_strided_slice %2 {offsets = [0, 24], sizes = [8, 8], strides = [1, 1]} : vector<8x128xf32> to vector<8x8xf32>
    %c0_118 = arith.constant 0 : index
    %c3_119 = arith.constant 3 : index
    %258 = vector.load %arg4[%c0_118, %c3_119] : memref<8x256xf32, #tpu.memory_space<vmem>>, vector<8x128xf32>
    %cst_120 = arith.constant dense<0.000000e+00> : vector<8x128xf32>
    %259 = tpu.matmul %257, %258, %cst_120 {dimension_numbers = #tpu.dot_dimension_numbers<[1], [0], [0], [1], [0, 0, 1, 1], [], []>} : vector<8x8xf32>, vector<8x128xf32>, vector<8x128xf32> -> vector<8x128xf32>
    %260 = arith.addf %256, %259 : vector<8x128xf32>
    %261 = vector.extract_strided_slice %2 {offsets = [0, 32], sizes = [8, 8], strides = [1, 1]} : vector<8x128xf32> to vector<8x8xf32>
    %c0_121 = arith.constant 0 : index
    %c21_122 = arith.constant 21 : index
    %262 = vector.load %arg4[%c0_121, %c21_122] : memref<8x256xf32, #tpu.memory_space<vmem>>, vector<8x128xf32>
    %cst_123 = arith.constant dense<0.000000e+00> : vector<8x128xf32>
    %263 = tpu.matmul %261, %262, %cst_123 {dimension_numbers = #tpu.dot_dimension_numbers<[1], [0], [0], [1], [0, 0, 1, 1], [], []>} : vector<8x8xf32>, vector<8x128xf32>, vector<8x128xf32> -> vector<8x128xf32>
    %264 = arith.addf %260, %263 : vector<8x128xf32>
    %265 = vector.extract_strided_slice %2 {offsets = [0, 40], sizes = [8, 8], strides = [1, 1]} : vector<8x128xf32> to vector<8x8xf32>
    %c0_124 = arith.constant 0 : index
    %c22_125 = arith.constant 22 : index
    %266 = vector.load %arg4[%c0_124, %c22_125] : memref<8x256xf32, #tpu.memory_space<vmem>>, vector<8x128xf32>
    %cst_126 = arith.constant dense<0.000000e+00> : vector<8x128xf32>
    %267 = tpu.matmul %265, %266, %cst_126 {dimension_numbers = #tpu.dot_dimension_numbers<[1], [0], [0], [1], [0, 0, 1, 1], [], []>} : vector<8x8xf32>, vector<8x128xf32>, vector<8x128xf32> -> vector<8x128xf32>
    %268 = arith.addf %264, %267 : vector<8x128xf32>
    %269 = vector.extract_strided_slice %2 {offsets = [0, 48], sizes = [8, 8], strides = [1, 1]} : vector<8x128xf32> to vector<8x8xf32>
    %c0_127 = arith.constant 0 : index
    %c23_128 = arith.constant 23 : index
    %270 = vector.load %arg4[%c0_127, %c23_128] : memref<8x256xf32, #tpu.memory_space<vmem>>, vector<8x128xf32>
    %cst_129 = arith.constant dense<0.000000e+00> : vector<8x128xf32>
    %271 = tpu.matmul %269, %270, %cst_129 {dimension_numbers = #tpu.dot_dimension_numbers<[1], [0], [0], [1], [0, 0, 1, 1], [], []>} : vector<8x8xf32>, vector<8x128xf32>, vector<8x128xf32> -> vector<8x128xf32>
    %272 = arith.addf %268, %271 : vector<8x128xf32>
    %273 = vector.extract_strided_slice %2 {offsets = [0, 56], sizes = [8, 8], strides = [1, 1]} : vector<8x128xf32> to vector<8x8xf32>
    %c0_130 = arith.constant 0 : index
    %c24_131 = arith.constant 24 : index
    %274 = vector.load %arg4[%c0_130, %c24_131] : memref<8x256xf32, #tpu.memory_space<vmem>>, vector<8x128xf32>
    %cst_132 = arith.constant dense<0.000000e+00> : vector<8x128xf32>
    %275 = tpu.matmul %273, %274, %cst_132 {dimension_numbers = #tpu.dot_dimension_numbers<[1], [0], [0], [1], [0, 0, 1, 1], [], []>} : vector<8x8xf32>, vector<8x128xf32>, vector<8x128xf32> -> vector<8x128xf32>
    %276 = arith.addf %272, %275 : vector<8x128xf32>
    %277 = vector.extract_strided_slice %2 {offsets = [0, 64], sizes = [8, 8], strides = [1, 1]} : vector<8x128xf32> to vector<8x8xf32>
    %c0_133 = arith.constant 0 : index
    %c42_134 = arith.constant 42 : index
    %278 = vector.load %arg4[%c0_133, %c42_134] : memref<8x256xf32, #tpu.memory_space<vmem>>, vector<8x128xf32>
    %cst_135 = arith.constant dense<0.000000e+00> : vector<8x128xf32>
    %279 = tpu.matmul %277, %278, %cst_135 {dimension_numbers = #tpu.dot_dimension_numbers<[1], [0], [0], [1], [0, 0, 1, 1], [], []>} : vector<8x8xf32>, vector<8x128xf32>, vector<8x128xf32> -> vector<8x128xf32>
    %280 = arith.addf %276, %279 : vector<8x128xf32>
    %281 = vector.extract_strided_slice %2 {offsets = [0, 72], sizes = [8, 8], strides = [1, 1]} : vector<8x128xf32> to vector<8x8xf32>
    %c0_136 = arith.constant 0 : index
    %c43_137 = arith.constant 43 : index
    %282 = vector.load %arg4[%c0_136, %c43_137] : memref<8x256xf32, #tpu.memory_space<vmem>>, vector<8x128xf32>
    %cst_138 = arith.constant dense<0.000000e+00> : vector<8x128xf32>
    %283 = tpu.matmul %281, %282, %cst_138 {dimension_numbers = #tpu.dot_dimension_numbers<[1], [0], [0], [1], [0, 0, 1, 1], [], []>} : vector<8x8xf32>, vector<8x128xf32>, vector<8x128xf32> -> vector<8x128xf32>
    %284 = arith.addf %280, %283 : vector<8x128xf32>
    %285 = vector.extract_strided_slice %2 {offsets = [0, 80], sizes = [8, 8], strides = [1, 1]} : vector<8x128xf32> to vector<8x8xf32>
    %c0_139 = arith.constant 0 : index
    %c44_140 = arith.constant 44 : index
    %286 = vector.load %arg4[%c0_139, %c44_140] : memref<8x256xf32, #tpu.memory_space<vmem>>, vector<8x128xf32>
    %cst_141 = arith.constant dense<0.000000e+00> : vector<8x128xf32>
    %287 = tpu.matmul %285, %286, %cst_141 {dimension_numbers = #tpu.dot_dimension_numbers<[1], [0], [0], [1], [0, 0, 1, 1], [], []>} : vector<8x8xf32>, vector<8x128xf32>, vector<8x128xf32> -> vector<8x128xf32>
    %288 = arith.addf %284, %287 : vector<8x128xf32>
    %289 = vector.extract_strided_slice %2 {offsets = [0, 88], sizes = [8, 8], strides = [1, 1]} : vector<8x128xf32> to vector<8x8xf32>
    %c0_142 = arith.constant 0 : index
    %c45_143 = arith.constant 45 : index
    %290 = vector.load %arg4[%c0_142, %c45_143] : memref<8x256xf32, #tpu.memory_space<vmem>>, vector<8x128xf32>
    %cst_144 = arith.constant dense<0.000000e+00> : vector<8x128xf32>
    %291 = tpu.matmul %289, %290, %cst_144 {dimension_numbers = #tpu.dot_dimension_numbers<[1], [0], [0], [1], [0, 0, 1, 1], [], []>} : vector<8x8xf32>, vector<8x128xf32>, vector<8x128xf32> -> vector<8x128xf32>
    %292 = arith.addf %288, %291 : vector<8x128xf32>
    %293 = vector.extract_strided_slice %2 {offsets = [0, 96], sizes = [8, 8], strides = [1, 1]} : vector<8x128xf32> to vector<8x8xf32>
    %c0_145 = arith.constant 0 : index
    %c63_146 = arith.constant 63 : index
    %294 = vector.load %arg4[%c0_145, %c63_146] : memref<8x256xf32, #tpu.memory_space<vmem>>, vector<8x128xf32>
    %cst_147 = arith.constant dense<0.000000e+00> : vector<8x128xf32>
    %295 = tpu.matmul %293, %294, %cst_147 {dimension_numbers = #tpu.dot_dimension_numbers<[1], [0], [0], [1], [0, 0, 1, 1], [], []>} : vector<8x8xf32>, vector<8x128xf32>, vector<8x128xf32> -> vector<8x128xf32>
    %296 = arith.addf %292, %295 : vector<8x128xf32>
    %297 = vector.extract_strided_slice %2 {offsets = [0, 104], sizes = [8, 8], strides = [1, 1]} : vector<8x128xf32> to vector<8x8xf32>
    %c0_148 = arith.constant 0 : index
    %c64_149 = arith.constant 64 : index
    %298 = vector.load %arg4[%c0_148, %c64_149] : memref<8x256xf32, #tpu.memory_space<vmem>>, vector<8x128xf32>
    %cst_150 = arith.constant dense<0.000000e+00> : vector<8x128xf32>
    %299 = tpu.matmul %297, %298, %cst_150 {dimension_numbers = #tpu.dot_dimension_numbers<[1], [0], [0], [1], [0, 0, 1, 1], [], []>} : vector<8x8xf32>, vector<8x128xf32>, vector<8x128xf32> -> vector<8x128xf32>
    %300 = arith.addf %296, %299 : vector<8x128xf32>
    %301 = vector.extract_strided_slice %2 {offsets = [0, 112], sizes = [8, 8], strides = [1, 1]} : vector<8x128xf32> to vector<8x8xf32>
    %c0_151 = arith.constant 0 : index
    %c65_152 = arith.constant 65 : index
    %302 = vector.load %arg4[%c0_151, %c65_152] : memref<8x256xf32, #tpu.memory_space<vmem>>, vector<8x128xf32>
    %cst_153 = arith.constant dense<0.000000e+00> : vector<8x128xf32>
    %303 = tpu.matmul %301, %302, %cst_153 {dimension_numbers = #tpu.dot_dimension_numbers<[1], [0], [0], [1], [0, 0, 1, 1], [], []>} : vector<8x8xf32>, vector<8x128xf32>, vector<8x128xf32> -> vector<8x128xf32>
    %304 = arith.addf %300, %303 : vector<8x128xf32>
    %305 = vector.extract_strided_slice %2 {offsets = [0, 120], sizes = [8, 8], strides = [1, 1]} : vector<8x128xf32> to vector<8x8xf32>
    %c0_154 = arith.constant 0 : index
    %c66_155 = arith.constant 66 : index
    %306 = vector.load %arg4[%c0_154, %c66_155] : memref<8x256xf32, #tpu.memory_space<vmem>>, vector<8x128xf32>
    %cst_156 = arith.constant dense<0.000000e+00> : vector<8x128xf32>
    %307 = tpu.matmul %305, %306, %cst_156 {dimension_numbers = #tpu.dot_dimension_numbers<[1], [0], [0], [1], [0, 0, 1, 1], [], []>} : vector<8x8xf32>, vector<8x128xf32>, vector<8x128xf32> -> vector<8x128xf32>
    %308 = arith.addf %304, %307 : vector<8x128xf32>
    %309 = tpu.iota {dimensions = array<i32: 1>} : vector<1x128xi32>
    %c0_i32_157 = arith.constant 0 : i32
    %310 = vector.broadcast %c0_i32_157 : i32 to vector<1x128xi32>
    %311 = arith.cmpi sge, %309, %310 : vector<1x128xi32>
    %c16_i32 = arith.constant 16 : i32
    %312 = vector.broadcast %c16_i32 : i32 to vector<1x128xi32>
    %313 = arith.cmpi slt, %309, %312 : vector<1x128xi32>
    %314 = arith.andi %311, %313 : vector<1x128xi1>
    %c21_i32_158 = arith.constant 21 : i32
    %315 = vector.broadcast %c21_i32_158 : i32 to vector<1x128xi32>
    %316 = arith.cmpi sge, %309, %315 : vector<1x128xi32>
    %c37_i32 = arith.constant 37 : i32
    %317 = vector.broadcast %c37_i32 : i32 to vector<1x128xi32>
    %318 = arith.cmpi slt, %309, %317 : vector<1x128xi32>
    %319 = arith.andi %316, %318 : vector<1x128xi1>
    %320 = arith.ori %314, %319 : vector<1x128xi1>
    %c42_i32_159 = arith.constant 42 : i32
    %321 = vector.broadcast %c42_i32_159 : i32 to vector<1x128xi32>
    %322 = arith.cmpi sge, %309, %321 : vector<1x128xi32>
    %c58_i32 = arith.constant 58 : i32
    %323 = vector.broadcast %c58_i32 : i32 to vector<1x128xi32>
    %324 = arith.cmpi slt, %309, %323 : vector<1x128xi32>
    %325 = arith.andi %322, %324 : vector<1x128xi1>
    %326 = arith.ori %320, %325 : vector<1x128xi1>
    %c63_i32_160 = arith.constant 63 : i32
    %327 = vector.broadcast %c63_i32_160 : i32 to vector<1x128xi32>
    %328 = arith.cmpi sge, %309, %327 : vector<1x128xi32>
    %c79_i32 = arith.constant 79 : i32
    %329 = vector.broadcast %c79_i32 : i32 to vector<1x128xi32>
    %330 = arith.cmpi slt, %309, %329 : vector<1x128xi32>
    %331 = arith.andi %328, %330 : vector<1x128xi1>
    %332 = arith.ori %326, %331 : vector<1x128xi1>
    %c84_i32_161 = arith.constant 84 : i32
    %333 = vector.broadcast %c84_i32_161 : i32 to vector<1x128xi32>
    %334 = arith.cmpi sge, %309, %333 : vector<1x128xi32>
    %c100_i32 = arith.constant 100 : i32
    %335 = vector.broadcast %c100_i32 : i32 to vector<1x128xi32>
    %336 = arith.cmpi slt, %309, %335 : vector<1x128xi32>
    %337 = arith.andi %334, %336 : vector<1x128xi1>
    %338 = arith.ori %332, %337 : vector<1x128xi1>
    %c105_i32_162 = arith.constant 105 : i32
    %339 = vector.broadcast %c105_i32_162 : i32 to vector<1x128xi32>
    %340 = arith.cmpi sge, %309, %339 : vector<1x128xi32>
    %c121_i32 = arith.constant 121 : i32
    %341 = vector.broadcast %c121_i32 : i32 to vector<1x128xi32>
    %342 = arith.cmpi slt, %309, %341 : vector<1x128xi32>
    %343 = arith.andi %340, %342 : vector<1x128xi1>
    %344 = arith.ori %338, %343 : vector<1x128xi1>
    %c126_i32_163 = arith.constant 126 : i32
    %345 = vector.broadcast %c126_i32_163 : i32 to vector<1x128xi32>
    %346 = arith.cmpi sge, %309, %345 : vector<1x128xi32>
    %c142_i32 = arith.constant 142 : i32
    %347 = vector.broadcast %c142_i32 : i32 to vector<1x128xi32>
    %348 = arith.cmpi slt, %309, %347 : vector<1x128xi32>
    %349 = arith.andi %346, %348 : vector<1x128xi1>
    %350 = arith.ori %344, %349 : vector<1x128xi1>
    %c126_i32_164 = arith.constant 126 : i32
    %351 = vector.broadcast %c126_i32_164 : i32 to vector<1x128xi32>
    %352 = arith.cmpi slt, %309, %351 : vector<1x128xi32>
    %353 = arith.andi %350, %352 : vector<1x128xi1>
    %354 = vector.broadcast %6 : vector<8x1xf32> to vector<8x128xf32>
    %355 = arith.addf %308, %354 : vector<8x128xf32>
    %cst_165 = arith.constant 0.000000e+00 : f32
    %356 = vector.broadcast %cst_165 : f32 to vector<8x128xf32>
    %357 = arith.maximumf %355, %356 : vector<8x128xf32>
    %cst_166 = arith.constant 0.000000e+00 : f32
    %358 = vector.shape_cast %353 : vector<1x128xi1> to vector<1x128xi1>
    %359 = vector.broadcast %358 : vector<1x128xi1> to vector<8x128xi1>
    %360 = vector.broadcast %cst_166 : f32 to vector<8x128xf32>
    %361 = arith.select %359, %357, %360 : vector<8x128xi1>, vector<8x128xf32>
    %cst_167 = arith.constant dense<0.000000e+00> : vector<8x128xf32>
    %362 = tpu.matmul %3, %361, %cst_167 {dimension_numbers = #tpu.dot_dimension_numbers<[1], [0], [0], [1], [0, 0, 1, 1], [], []>} : vector<8x8xf32>, vector<8x128xf32>, vector<8x128xf32> -> vector<8x128xf32>
    %363 = vector.broadcast %7 : vector<8x1xf32> to vector<8x128xf32>
    %364 = arith.addf %362, %363 : vector<8x128xf32>
    %cst_168 = arith.constant 0.000000e+00 : f32
    %365 = vector.shape_cast %353 : vector<1x128xi1> to vector<1x128xi1>
    %366 = vector.broadcast %365 : vector<1x128xi1> to vector<8x128xi1>
    %367 = vector.broadcast %cst_168 : f32 to vector<8x128xf32>
    %368 = arith.select %366, %364, %367 : vector<8x128xi1>, vector<8x128xf32>
    %369 = tpu.iota {dimensions = array<i32: 0>} : vector<128x8xi32>
    %370 = tpu.iota {dimensions = array<i32: 1>} : vector<128x8xi32>
    %c21_i32_169 = arith.constant 21 : i32
    %371 = vector.broadcast %c21_i32_169 : i32 to vector<128x8xi32>
    %372 = arith.muli %370, %371 : vector<128x8xi32>
    %373 = arith.cmpi sge, %369, %372 : vector<128x8xi32>
    %c21_i32_170 = arith.constant 21 : i32
    %374 = vector.broadcast %c21_i32_170 : i32 to vector<128x8xi32>
    %375 = arith.addi %372, %374 : vector<128x8xi32>
    %376 = arith.cmpi slt, %369, %375 : vector<128x8xi32>
    %377 = arith.andi %373, %376 : vector<128x8xi1>
    %cst_171 = arith.constant 1.000000e+00 : f32
    %cst_172 = arith.constant 0.000000e+00 : f32
    %378 = vector.broadcast %cst_171 : f32 to vector<128x8xf32>
    %379 = vector.broadcast %cst_172 : f32 to vector<128x8xf32>
    %380 = arith.select %377, %378, %379 : vector<128x8xi1>, vector<128x8xf32>
    %381 = tpu.iota {dimensions = array<i32: 1>} : vector<8x128xi32>
    %382 = tpu.iota {dimensions = array<i32: 0>} : vector<8x128xi32>
    %c21_i32_173 = arith.constant 21 : i32
    %383 = vector.broadcast %c21_i32_173 : i32 to vector<8x128xi32>
    %384 = arith.muli %382, %383 : vector<8x128xi32>
    %385 = arith.cmpi sge, %381, %384 : vector<8x128xi32>
    %c21_i32_174 = arith.constant 21 : i32
    %386 = vector.broadcast %c21_i32_174 : i32 to vector<8x128xi32>
    %387 = arith.addi %384, %386 : vector<8x128xi32>
    %388 = arith.cmpi slt, %381, %387 : vector<8x128xi32>
    %389 = arith.andi %385, %388 : vector<8x128xi1>
    %cst_175 = arith.constant 1.000000e+00 : f32
    %cst_176 = arith.constant 0.000000e+00 : f32
    %390 = vector.broadcast %cst_175 : f32 to vector<8x128xf32>
    %391 = vector.broadcast %cst_176 : f32 to vector<8x128xf32>
    %392 = arith.select %389, %390, %391 : vector<8x128xi1>, vector<8x128xf32>
    %393 = arith.mulf %368, %368 : vector<8x128xf32>
    %cst_177 = arith.constant dense<0.000000e+00> : vector<8x8xf32>
    %394 = tpu.matmul %393, %380, %cst_177 {dimension_numbers = #tpu.dot_dimension_numbers<[1], [0], [0], [1], [0, 0, 1, 1], [], []>} : vector<8x128xf32>, vector<128x8xf32>, vector<8x8xf32> -> vector<8x8xf32>
    %395 = math.sqrt %394 : vector<8x8xf32>
    %cst_178 = arith.constant dense<0.000000e+00> : vector<128x8xf32>
    %396 = tpu.matmul %380, %395, %cst_178 {dimension_numbers = #tpu.dot_dimension_numbers<[1], [0], [0], [1], [0, 0, 1, 1], [], []>} : vector<128x8xf32>, vector<8x8xf32>, vector<128x8xf32> -> vector<128x8xf32>
    %cst_179 = arith.constant dense<0.000000e+00> : vector<128x128xf32>
    %397 = tpu.matmul %396, %392, %cst_179 {dimension_numbers = #tpu.dot_dimension_numbers<[1], [0], [0], [1], [0, 0, 1, 1], [], []>} : vector<128x8xf32>, vector<8x128xf32>, vector<128x128xf32> -> vector<128x128xf32>
    %398 = tpu.iota {dimensions = array<i32: 0>} : vector<128x128xi32>
    %399 = tpu.iota {dimensions = array<i32: 1>} : vector<128x128xi32>
    %400 = arith.subi %398, %399 : vector<128x128xi32>
    %c0_i32_180 = arith.constant 0 : i32
    %401 = vector.broadcast %c0_i32_180 : i32 to vector<128x128xi32>
    %402 = arith.cmpi eq, %400, %401 : vector<128x128xi32>
    %c21_i32_181 = arith.constant 21 : i32
    %403 = vector.broadcast %c21_i32_181 : i32 to vector<128x128xi32>
    %404 = arith.cmpi eq, %400, %403 : vector<128x128xi32>
    %405 = arith.ori %402, %404 : vector<128x128xi1>
    %c-21_i32 = arith.constant -21 : i32
    %406 = vector.broadcast %c-21_i32 : i32 to vector<128x128xi32>
    %407 = arith.cmpi eq, %400, %406 : vector<128x128xi32>
    %408 = arith.ori %405, %407 : vector<128x128xi1>
    %c42_i32_182 = arith.constant 42 : i32
    %409 = vector.broadcast %c42_i32_182 : i32 to vector<128x128xi32>
    %410 = arith.cmpi eq, %400, %409 : vector<128x128xi32>
    %411 = arith.ori %408, %410 : vector<128x128xi1>
    %c-42_i32 = arith.constant -42 : i32
    %412 = vector.broadcast %c-42_i32 : i32 to vector<128x128xi32>
    %413 = arith.cmpi eq, %400, %412 : vector<128x128xi32>
    %414 = arith.ori %411, %413 : vector<128x128xi1>
    %c63_i32_183 = arith.constant 63 : i32
    %415 = vector.broadcast %c63_i32_183 : i32 to vector<128x128xi32>
    %416 = arith.cmpi eq, %400, %415 : vector<128x128xi32>
    %417 = arith.ori %414, %416 : vector<128x128xi1>
    %c-63_i32 = arith.constant -63 : i32
    %418 = vector.broadcast %c-63_i32 : i32 to vector<128x128xi32>
    %419 = arith.cmpi eq, %400, %418 : vector<128x128xi32>
    %420 = arith.ori %417, %419 : vector<128x128xi1>
    %c84_i32_184 = arith.constant 84 : i32
    %421 = vector.broadcast %c84_i32_184 : i32 to vector<128x128xi32>
    %422 = arith.cmpi eq, %400, %421 : vector<128x128xi32>
    %423 = arith.ori %420, %422 : vector<128x128xi1>
    %c-84_i32 = arith.constant -84 : i32
    %424 = vector.broadcast %c-84_i32 : i32 to vector<128x128xi32>
    %425 = arith.cmpi eq, %400, %424 : vector<128x128xi32>
    %426 = arith.ori %423, %425 : vector<128x128xi1>
    %c105_i32_185 = arith.constant 105 : i32
    %427 = vector.broadcast %c105_i32_185 : i32 to vector<128x128xi32>
    %428 = arith.cmpi eq, %400, %427 : vector<128x128xi32>
    %429 = arith.ori %426, %428 : vector<128x128xi1>
    %c-105_i32 = arith.constant -105 : i32
    %430 = vector.broadcast %c-105_i32 : i32 to vector<128x128xi32>
    %431 = arith.cmpi eq, %400, %430 : vector<128x128xi32>
    %432 = arith.ori %429, %431 : vector<128x128xi1>
    %c126_i32_186 = arith.constant 126 : i32
    %433 = vector.broadcast %c126_i32_186 : i32 to vector<128x128xi32>
    %434 = arith.cmpi eq, %400, %433 : vector<128x128xi32>
    %435 = arith.ori %432, %434 : vector<128x128xi1>
    %c-126_i32 = arith.constant -126 : i32
    %436 = vector.broadcast %c-126_i32 : i32 to vector<128x128xi32>
    %437 = arith.cmpi eq, %400, %436 : vector<128x128xi32>
    %438 = arith.ori %435, %437 : vector<128x128xi1>
    %cst_187 = arith.constant 0.000000e+00 : f32
    %439 = vector.broadcast %cst_187 : f32 to vector<128x128xf32>
    %440 = arith.select %438, %397, %439 : vector<128x128xi1>, vector<128x128xf32>
    %cst_188 = arith.constant dense<0.000000e+00> : vector<8x128xf32>
    %441 = tpu.matmul %368, %440, %cst_188 {dimension_numbers = #tpu.dot_dimension_numbers<[1], [0], [0], [1], [0, 0, 1, 1], [], []>} : vector<8x128xf32>, vector<128x128xf32>, vector<8x128xf32> -> vector<8x128xf32>
    %cst_189 = arith.constant 0.000000e+00 : f32
    %442 = vector.broadcast %cst_189 : f32 to vector<8x128xf32>
    %443 = arith.subf %442, %441 : vector<8x128xf32>
    %444 = math.exp %443 : vector<8x128xf32>
    %cst_190 = arith.constant 1.000000e+00 : f32
    %445 = vector.broadcast %cst_190 : f32 to vector<8x128xf32>
    %446 = arith.addf %445, %444 : vector<8x128xf32>
    %447 = tpu.reciprocal %446 {approx = true} : vector<8x128xf32> -> vector<8x128xf32>
    %c0_191 = arith.constant 0 : index
    %c0_192 = arith.constant 0 : index
    %448 = vector.load %arg2[%c0_191, %c0_192] : memref<8x128xf32, #tpu.memory_space<vmem>>, vector<8x128xf32>
    tpu.vector_store %arg2[%c0_191, %c0_192], %447 {strides = array<i32>} : memref<8x128xf32, #tpu.memory_space<vmem>>, vector<8x128xf32>,
    return
  }
}

</mosaic_0001>

<bundles_post_ra>
// kernel: forward.1
= control target key start
LH: loop header
LB: loop body
LE: loop exit
PB: predicated region body
PF: predicated region fallthrough
CT: control target
= control target key end

     0   :  { %v5898_v2 = vmov 0.0   ;;  %s5899_s13 = smov 127   ;;  %s5900_s14 = smov 120   ;;  %v5927_v7 = vmov 8   ;;  %vm7305_vm0 = vcmask 1039360   ;;  %vm7315_vm1 = vcmask 64512   ;;  %s7296_s0 = inlined_call_operand.vmem [shape: f32[8,256], index: 0, kind: input, shape index: {}]   ;;  %s7297_s1 = inlined_call_operand.vmem [shape: f32[8,512], index: 1, kind: input, shape index: {}]   ;;  %s7298_s2 = inlined_call_operand.vmem [shape: f32[8,128], index: 2, kind: output, shape index: {}]  }
   0x1   :  { %v5955_v0 = vld [vmem:[%s7296_s0] sm:$0xff]  ;;  %97 = vmatprep.mubr.f32.mxu0 %v5898_v2  ;;  %1447 = vst [vmem:[#allocation2] sm:$0xff] %v5898_v2  ;;  %1448 = vst [vmem:[#allocation2 + $0x8] sm:$0xff] %v5898_v2  ;;  %1781 = vmatprep.mubr.f32.mxu1 %v5898_v2  ;;  %v5975_v3 = vld [vmem:[%s7296_s0 + $0x8] sm:$0xff]  ;;  %s5901_s17 = smov 126   ;;  %s7299_s18 = smov 112  }
   0x2   :  { %v5960_v1 = vld [vmem:[%s7297_s1] sm:$0xff]  ;;  %2852 = vst [vmem:[#allocation3] sm:$0xff] %v5898_v2  ;;  %2853 = vst [vmem:[#allocation3 + $0x8] sm:$0xff] %v5898_v2  ;;  %22 = vrot.lane.b32.xlu0 %v5955_v0, %s5899_s13  ;;  %s5903_s19 = smov 125   ;;  %s5904_s0 = smov 104   ;;  %v6066_v4 = vld [vmem:[%s7297_s1 + $0x18] sm:$0xff]  ;;  %5887 = vset.pattern.permute.xlu1 %v5927_v7 }
   0x3   :  { %18 = vrot.lane.b32.xlu1 %v5960_v1, %s5900_s14  ;;  %s5905_s20 = smov 107   ;;  %s5906_s21 = smov 96   ;;  %vm7302_vm2 = vcmask 1031168   ;;  %vm7320_vm3 = vcmask 1022976   ;;  %vm7313_vm4 = vcmask 875520   ;;  %vm7312_vm5 = vcmask 867328  }
   0x4   :  { %s5907_s22 = smov 106   ;;  %s5908_s23 = smov 88   ;;  %vm7311_vm6 = vcmask 859136   ;;  %vm7310_vm7 = vcmask 850944   ;;  %vm7309_vm8 = vcmask 703488   ;;  %vm7308_vm9 = vcmask 695296  }
   0x5   :  { %s5909_s24 = smov 105   ;;  %s5910_s25 = smov 80   ;;  %vm7307_vm10 = vcmask 687104   ;;  %vm7306_vm11 = vcmask 678912   ;;  %vm7304_vm12 = vcmask 531456   ;;  %vm7303_vm13 = vcmask 523264  }
   0x6   :  { %24 = vrot.lane.b32.xlu0 %v5975_v3, %s5899_s13  ;;  %s5911_s26 = smov 72   ;;  %s5912_s27 = smov 86   ;;  %vm7301_vm14 = vcmask 515072   ;;  %vm7319_vm15 = vcmask 506880  }
   0x7   :  { %179 = vrot.lane.b32.xlu1 %v5955_v0, %s5901_s17  ;;  %s5913_s28 = smov 64   ;;  %s5914_s29 = smov 85  }
   0x8   :  { %s5915_s30 = smov 56   ;;  %s5916_s3 = smov 84  }
   0x9   :  { %s5917_s4 = smov 48   ;;  %s5918_s5 = smov 83  }
   0xa   :  { %181 = vrot.lane.b32.xlu0 %v5975_v3, %s5901_s17  ;;  %s5919_s6 = smov 40   ;;  %s5920_s7 = smov 65  }
   0xb   :  { %177 = vrot.lane.b32.xlu1 %v5960_v1, %s7299_s18  ;;  %s5921_s8 = smov 32   ;;  %s5922_s9 = smov 24  }
   0xc   :  { %s5923_s10 = smov 63   ;;  %s7324_s11 = smov 16  }
   0xd   :  { %s7325_s12 = smov 62   ;;  %s7317_s15 = smov 8  }
   0xe   :  { %264 = vrot.lane.b32.xlu0 %v5955_v0, %s5903_s19  ;;  %s5929_s18 = smov 22   ;;  %s7341_s16 = smov 8  }
   0xf   :  { %266 = vrot.lane.b32.xlu1 %v5975_v3, %s5903_s19 }
  0x12   :  { %262 = vrot.lane.b32.xlu0 %v5960_v1, %s5904_s0 }
  0x13   :  { %349 = vrot.lane.b32.xlu1 %v5955_v0, %s5905_s20 }
  0x16   :  { %351 = vrot.lane.b32.xlu0 %v5975_v3, %s5905_s20 }
  0x17   :  { %347 = vrot.lane.b32.xlu1 %v5960_v1, %s5906_s21 }
  0x1a   :  { %434 = vrot.lane.b32.xlu0 %v5955_v0, %s5907_s22 }
  0x1b   :  { %436 = vrot.lane.b32.xlu1 %v5975_v3, %s5907_s22 }
  0x1e   :  { %432 = vrot.lane.b32.xlu0 %v5960_v1, %s5908_s23 }
  0x1f   :  { %519 = vrot.lane.b32.xlu1 %v5955_v0, %s5909_s24 }
  0x22   :  { %521 = vrot.lane.b32.xlu0 %v5975_v3, %s5909_s24 }
  0x23   :  { %517 = vrot.lane.b32.xlu1 %v5960_v1, %s5910_s25 }
  0x26   :  { %604 = vrot.lane.b32.xlu0 %v5955_v0, %s5904_s0 }
  0x27   :  { %606 = vrot.lane.b32.xlu1 %v5975_v3, %s5904_s0 }
  0x2a   :  { %602 = vrot.lane.b32.xlu0 %v5960_v1, %s5911_s26 }
  0x2b   :  { %689 = vrot.lane.b32.xlu1 %v5955_v0, %s5912_s27 }
  0x2e   :  { %691 = vrot.lane.b32.xlu0 %v5975_v3, %s5912_s27 }
  0x2f   :  { %687 = vrot.lane.b32.xlu1 %v5960_v1, %s5913_s28 }
  0x32   :  { %774 = vrot.lane.b32.xlu0 %v5955_v0, %s5914_s29 }
  0x33   :  { %776 = vrot.lane.b32.xlu1 %v5975_v3, %s5914_s29 }
  0x36   :  { %772 = vrot.lane.b32.xlu0 %v5960_v1, %s5915_s30 }
  0x37   :  { %859 = vrot.lane.b32.xlu1 %v5955_v0, %s5916_s3 }
  0x3a   :  { %861 = vrot.lane.b32.xlu0 %v5975_v3, %s5916_s3 }
  0x3b   :  { %857 = vrot.lane.b32.xlu1 %v5960_v1, %s5917_s4 }
  0x3e   :  { %944 = vrot.lane.b32.xlu0 %v5955_v0, %s5918_s5 }
  0x3f   :  { %946 = vrot.lane.b32.xlu1 %v5975_v3, %s5918_s5 }
  0x42   :  { %942 = vrot.lane.b32.xlu0 %v5960_v1, %s5919_s6 }
  0x43   :  { %1029 = vrot.lane.b32.xlu1 %v5955_v0, %s5920_s7 }
  0x46   :  { %1031 = vrot.lane.b32.xlu0 %v5975_v3, %s5920_s7 }
  0x47   :  { %1027 = vrot.lane.b32.xlu1 %v5960_v1, %s5921_s8 }
  0x4a   :  { %1114 = vrot.lane.b32.xlu0 %v5955_v0, %s5913_s28 }
  0x4b   :  { %1116 = vrot.lane.b32.xlu1 %v5975_v3, %s5913_s28 }
  0x4e   :  { %1112 = vrot.lane.b32.xlu0 %v5960_v1, %s5922_s9 }
  0x4f   :  { %1199 = vrot.lane.b32.xlu1 %v5955_v0, %s5923_s10 }
  0x52   :  { %1201 = vrot.lane.b32.xlu0 %v5975_v3, %s5923_s10 }
  0x53   :  { %1197 = vrot.lane.b32.xlu1 %v5960_v1, %s7324_s11 }
  0x56   :  { %1284 = vrot.lane.b32.xlu0 %v5955_v0, %s7325_s12 }
  0x57   :  { %1286 = vrot.lane.b32.xlu1 %v5975_v3, %s7325_s12 }
  0x5a   :  { %1282 = vrot.lane.b32.xlu0 %v5960_v1, %s7317_s15  ;;  %s7340_s15 = smov 112  }
  0x5b   :  { %1434 = vperm.xlu1 %5887, %v6066_v4  }
  0x74   :  { %v23_v5 = vpop.permute.xlu0 %22 }
  0x75   :  { %v19_v6 = vpop.permute.xlu1 %18 }
  0x78   :  { %v25_v8 = vpop.permute.xlu0 %24 }
  0x79   :  { %v180_v9 = vpop.permute.xlu1 %179  ;;  %33 = vmatprep.subr.mxu0 %v25_v8  ;;  %v27_v10 = vsel %vm7305_vm0, %v23_v5, %v25_v8  ;;  %v5928_v8 = vmov 0  }
  0x7a   :  { %34 = vmatpush1.msra.mxu0 %v27_v10 }
  0x7b   :  { %5331 = vmatmul.mubr.msk.f32.vlgmr.msra.gmra.mrb[0].mxu0 %vm7315_vm1, %v19_v6  ;;  %106 = vmatprep.subr.mxu0 %v5975_v3  ;;  %v1367_v3 = vlaneseq }
  0x7c   :  { %107 = vmatpush1.msra.mxu0 %v5955_v0  ;;  %170 = vmatprep.mubr.f32.mxu0 %v5898_v2  ;;  %v182_v11 = vpop.permute.xlu0 %181 }
  0x7d   :  { %v178_v12 = vpop.permute.xlu1 %177  ;;  %189 = vmatprep.subr.mxu0 %v182_v11  ;;  %v184_v14 = vsel %vm7302_vm2, %v180_v9, %v182_v11  ;;  %v6120_v5 = vand.u32 127, %v1367_v3 }
  0x7f   :  { %vm1378_vm2 = vcmp.lt.s32.totalorder %v6120_v5, 39  ;;  %vm7316_vm0 = vcmp.ge.s32.totalorder %v6120_v5, 42  ;;  %v6145_v6 = vadd.s32 128, %v6120_v5 }
  0x80   :  { %v265_v13 = vpop.permute.xlu0 %264 }
  0x81   :  { %v267_v15 = vpop.permute.xlu1 %266 }
  0x82   :  { %v269_v18 = vsel %vm7320_vm3, %v265_v13, %v267_v15 }
  0x83   :  { %5332 = vmatmul.mubr.msk.f32.vlgmr.msra.gmra.mrb[0].mxu0 %vm7315_vm1, %v5960_v1 }
  0x84   :  { %190 = vmatpush1.msra.mxu0 %v184_v14  ;;  %253 = vmatprep.mubr.f32.mxu0 %v5898_v2  ;;  %v263_v16 = vpop.permute.xlu0 %262 }
  0x85   :  { %274 = vmatprep.subr.mxu0 %v267_v15  ;;  %v350_v17 = vpop.permute.xlu1 %349 }
  0x88   :  { %v352_v19 = vpop.permute.xlu0 %351 }
  0x89   :  { %v348_v20 = vpop.permute.xlu1 %347  ;;  %v354_v22 = vsel %vm7313_vm4, %v350_v17, %v352_v19  ;;  %vm7329_vm4 = vcmp.ge.s32.totalorder %v6120_v5, 84 }
  0x8b   :  { %5333 = vmatmul.mubr.msk.f32.vlgmr.msra.gmra.mrb[0].mxu0 %vm7315_vm1, %v178_v12 }
  0x8c   :  { %275 = vmatpush1.msra.mxu0 %v269_v18  ;;  %338 = vmatprep.mubr.f32.mxu0 %v5898_v2  ;;  %v435_v21 = vpop.permute.xlu0 %434 }
  0x8d   :  { %359 = vmatprep.subr.mxu0 %v352_v19  ;;  %v437_v23 = vpop.permute.xlu1 %436 }
  0x8e   :  { %v439_v26 = vsel %vm7312_vm5, %v435_v21, %v437_v23 }
  0x90   :  { %v433_v24 = vpop.permute.xlu0 %432 }
  0x91   :  { %v520_v25 = vpop.permute.xlu1 %519 }
  0x93   :  { %5334 = vmatmul.mubr.msk.f32.vlgmr.msra.gmra.mrb[0].mxu0 %vm7315_vm1, %v263_v16 }
  0x94   :  { %360 = vmatpush1.msra.mxu0 %v354_v22  ;;  %423 = vmatprep.mubr.f32.mxu0 %v5898_v2  ;;  %v522_v27 = vpop.permute.xlu0 %521 }
  0x95   :  { %444 = vmatprep.subr.mxu0 %v437_v23  ;;  %v518_v28 = vpop.permute.xlu1 %517  ;;  %v524_v30 = vsel %vm7311_vm6, %v520_v25, %v522_v27  ;;  %v6167_v23 = vld [vmem:[%s7297_s1 + $0x8] sm:$0xff] }
  0x98   :  { %v605_v29 = vpop.permute.xlu0 %604 }
  0x99   :  { %v607_v31 = vpop.permute.xlu1 %606 }
  0x9a   :  { %v609_v34 = vsel %vm7310_vm7, %v605_v29, %v607_v31  ;;  %vm1394_vm7 = vcmp.lt.s32.totalorder %v6120_v5, 81 }
  0x9b   :  { %5335 = vmatmul.mubr.msk.f32.vlgmr.msra.gmra.mrb[0].mxu0 %vm7315_vm1, %v348_v20 }
  0x9c   :  { %445 = vmatpush1.msra.mxu0 %v439_v26  ;;  %508 = vmatprep.mubr.f32.mxu0 %v5898_v2  ;;  %v603_v32 = vpop.permute.xlu0 %602 }
  0x9d   :  { %529 = vmatprep.subr.mxu0 %v522_v27  ;;  %v690_v33 = vpop.permute.xlu1 %689 }
  0xa0   :  { %v692_v35 = vpop.permute.xlu0 %691 }
  0xa1   :  { %v688_v36 = vpop.permute.xlu1 %687  ;;  %v694_v38 = vsel %vm7309_vm8, %v690_v33, %v692_v35  ;;  %vm7330_vm8 = vcmp.ge.s32.totalorder %v6120_v5, 63 }
  0xa2   :  { %vm1396_vm5 = vmand %vm7330_vm8, %vm1394_vm7  ;;  %vm1427_vm7 = vcmp.lt.s32.totalorder %v6145_v6, 165 }
  0xa3   :  { %5336 = vmatmul.mubr.msk.f32.vlgmr.msra.gmra.mrb[0].mxu0 %vm7315_vm1, %v433_v24  ;;  %v5930_v24 = vmov 9  }
  0xa4   :  { %530 = vmatpush1.msra.mxu0 %v524_v30  ;;  %593 = vmatprep.mubr.f32.mxu0 %v5898_v2  ;;  %v775_v37 = vpop.permute.xlu0 %774 }
  0xa5   :  { %614 = vmatprep.subr.mxu0 %v607_v31  ;;  %v777_v39 = vpop.permute.xlu1 %776  ;;  %5888 = vset.pattern.permute.xlu1 %v5930_v24 }
  0xa6   :  { %v779_v42 = vsel %vm7308_vm9, %v775_v37, %v777_v39 }
  0xa8   :  { %v773_v40 = vpop.permute.xlu0 %772 }
  0xa9   :  { %v860_v41 = vpop.permute.xlu1 %859 }
  0xab   :  { %5337 = vmatmul.mubr.msk.f32.vlgmr.msra.gmra.mrb[0].mxu0 %vm7315_vm1, %v518_v28 }
  0xac   :  { %615 = vmatpush1.msra.mxu0 %v609_v34  ;;  %678 = vmatprep.mubr.f32.mxu0 %v5898_v2  ;;  %v862_v43 = vpop.permute.xlu0 %861 }
  0xad   :  { %699 = vmatprep.subr.mxu0 %v692_v35  ;;  %v858_v44 = vpop.permute.xlu1 %857  ;;  %v864_v46 = vsel %vm7307_vm10, %v860_v41, %v862_v43 }
  0xb0   :  { %v945_v45 = vpop.permute.xlu0 %944 }
  0xb1   :  { %v947_v47 = vpop.permute.xlu1 %946 }
  0xb2   :  { %v949_v50 = vsel %vm7306_vm11, %v945_v45, %v947_v47  ;;  %vm1386_vm11 = vcmp.lt.s32.totalorder %v6120_v5, 60 }
  0xb3   :  { %5338 = vmatmul.mubr.msk.f32.vlgmr.msra.gmra.mrb[0].mxu0 %vm7315_vm1, %v603_v32  ;;  %vm1388_vm9 = vmand %vm7316_vm0, %vm1386_vm11  ;;  %vm1410_vm11 = vcmp.lt.s32.totalorder %v6120_v5, 123 }
  0xb4   :  { %700 = vmatpush1.msra.mxu0 %v694_v38  ;;  %763 = vmatprep.mubr.f32.mxu0 %v5898_v2  ;;  %v943_v48 = vpop.permute.xlu0 %942 }
  0xb5   :  { %784 = vmatprep.subr.mxu0 %v777_v39  ;;  %v1030_v49 = vpop.permute.xlu1 %1029 }
  0xb8   :  { %v1032_v51 = vpop.permute.xlu0 %1031 }
  0xb9   :  { %v1028_v52 = vpop.permute.xlu1 %1027  ;;  %v1034_v54 = vsel %vm7304_vm12, %v1030_v49, %v1032_v51 }
  0xbb   :  { %5339 = vmatmul.mubr.msk.f32.vlgmr.msra.gmra.mrb[0].mxu0 %vm7315_vm1, %v688_v36 }
  0xbc   :  { %785 = vmatpush1.msra.mxu0 %v779_v42  ;;  %848 = vmatprep.mubr.f32.mxu0 %v5898_v2  ;;  %v1115_v53 = vpop.permute.xlu0 %1114 }
  0xbd   :  { %869 = vmatprep.subr.mxu0 %v862_v43  ;;  %v1117_v55 = vpop.permute.xlu1 %1116 }
  0xbe   :  { %v1119_v58 = vsel %vm7303_vm13, %v1115_v53, %v1117_v55  ;;  %vm1372_vm13 = vcmp.lt.s32.totalorder %v6120_v5, 18 }
  0xc0   :  { %v1113_v56 = vpop.permute.xlu0 %1112 }
  0xc1   :  { %v1200_v57 = vpop.permute.xlu1 %1199 }
  0xc3   :  { %5340 = vmatmul.mubr.msk.f32.vlgmr.msra.gmra.mrb[0].mxu0 %vm7315_vm1, %v773_v40 }
  0xc4   :  { %870 = vmatpush1.msra.mxu0 %v864_v46  ;;  %933 = vmatprep.mubr.f32.mxu0 %v5898_v2  ;;  %v1202_v59 = vpop.permute.xlu0 %1201 }
  0xc5   :  { %954 = vmatprep.subr.mxu0 %v947_v47  ;;  %v1198_v60 = vpop.permute.xlu1 %1197  ;;  %v1204_v61 = vsel %vm7301_vm14, %v1200_v57, %v1202_v59  ;;  %vm7314_vm14 = vcmp.ge.s32.totalorder %v6120_v5, 21 }
  0xc6   :  { %vm1380_vm12 = vmand %vm7314_vm14, %vm1378_vm2  ;;  %vm1402_vm2 = vcmp.lt.s32.totalorder %v6120_v5, 102 }
  0xc7   :  { %vm1382_vm10 = vmor %vm1372_vm13, %vm1380_vm12  ;;  %vm7328_vm12 = vcmp.ge.s32.totalorder %v6120_v5, 105 }
  0xc8   :  { %v1285_v63 = vpop.permute.xlu0 %1284  ;;  %vm1390_vm6 = vmor %vm1382_vm10, %vm1388_vm9  ;;  %vm7323_vm10 = vcmp.ge.s32.totalorder %v6120_v5, 126 }
  0xc9   :  { %v1287_v62 = vpop.permute.xlu1 %1286  ;;  %vm1398_vm14 = vmor %vm1390_vm6, %vm1396_vm5  ;;  %vm1425_vm6 = vcmp.ge.s32.totalorder %v6145_v6, 147 }
  0xca   :  { %v1289_v0 = vsel %vm7319_vm15, %v1285_v63, %v1287_v62  ;;  %vm1412_vm0 = vmand %vm7328_vm12, %vm1410_vm11  ;;  %vm7322_vm11 = vcmask 1047728  }
  0xcb   :  { %5341 = vmatmul.mubr.msk.f32.vlgmr.msra.gmra.mrb[0].mxu0 %vm7315_vm1, %v858_v44 }
  0xcc   :  { %955 = vmatpush1.msra.mxu0 %v949_v50  ;;  %1018 = vmatprep.mubr.f32.mxu0 %v5898_v2  ;;  %v1283_v1 = vpop.permute.xlu0 %1282 }
  0xcd   :  { %1039 = vmatprep.subr.mxu0 %v1032_v51 }
  0xd3   :  { %5342 = vmatmul.mubr.msk.f32.vlgmr.msra.gmra.mrb[0].mxu0 %vm7315_vm1, %v943_v48 }
  0xd4   :  { %1040 = vmatpush1.msra.mxu0 %v1034_v54  ;;  %1103 = vmatprep.mubr.f32.mxu0 %v5898_v2 }
  0xd5   :  { %1124 = vmatprep.subr.mxu0 %v1117_v55 }
  0xda   :  { %v1435_v7 = vpop.permute.xlu1 %1434 }
  0xdb   :  { %5343 = vmatmul.mubr.msk.f32.vlgmr.msra.gmra.mrb[0].mxu0 %vm7315_vm1, %v1028_v52 }
  0xdc   :  { %1125 = vmatpush1.msra.mxu0 %v1119_v58  ;;  %1188 = vmatprep.mubr.f32.mxu0 %v5898_v2 }
  0xdd   :  { %1209 = vmatprep.subr.mxu0 %v1202_v59 }
  0xe3   :  { %5344 = vmatmul.mubr.msk.f32.vlgmr.msra.gmra.mrb[0].mxu0 %vm7315_vm1, %v1113_v56 }
  0xe4   :  { %1210 = vmatpush1.msra.mxu0 %v1204_v61  ;;  %1273 = vmatprep.mubr.f32.mxu0 %v5898_v2 }
  0xe5   :  { %1294 = vmatprep.subr.mxu0 %v1287_v62 }
  0xeb   :  { %5345 = vmatmul.mubr.msk.f32.vlgmr.msra.gmra.mrb[0].mxu0 %vm7315_vm1, %v1198_v60 }
  0xec   :  { %1295 = vmatpush1.msra.mxu0 %v1289_v0  ;;  %1358 = vmatprep.mubr.f32.mxu0 %v5898_v2 }
  0xf3   :  { %5346 = vmatmul.mubr.msk.f32.vlgmr.msra.gmra.mrb[0].mxu0 %vm7315_vm1, %v1283_v1  ;;  %vm1404_vm1 = vmand %vm7329_vm4, %vm1402_vm2 }
  0xf4   :  { %1542 = vmatprep.mubr.f32.mxu0 %v5898_v2  ;;  %vm1406_vm13 = vmor %vm1398_vm14, %vm1404_vm1  ;;  %vm1419_vm1 = vcmp.lt.s32.totalorder %v6145_v6, 144 }
  0xf5   :  { %vm1414_vm9 = vmor %vm1406_vm13, %vm1412_vm0  ;;  %vm7321_vm13 = vcmask 179200  }
  0xf6   :  { %vm1422_vm5 = vmor %vm1414_vm9, %vm7323_vm10  ;;  %vm7342_vm9 = vcmask 64512  }
  0xf7   :  { %v1441_v9 = vsel %vm1422_vm5, 1, %v5928_v8  ;;  %vm1429_vm0 = vmand %vm1425_vm6, %vm1427_vm7  ;;  %vm7343_vm5 = vcmask 875520   ;;  %vm7345_vm7 = vcmask 867328  }
  0xf8   :  { %vm1443_vm14 = vcmp.eq.s32.totalorder %v1441_v9, 1  ;;  %vm1431_vm2 = vmor %vm1419_vm1, %vm1429_vm0  ;;  %vm7346_vm1 = vcmask 859136  }
  0xf9   :  { %vm7344_vm6 = vmmov %vm7342_vm9 }
  0xfa   :  { %vm7347_vm0 = vmmov %vm7344_vm6 }
 0x1c6   :  { %v1360_v10 = vpop.f32.mrb[0].mxu0 }
 0x1c7   :  { %v1437_v11 = vadd.f32 %v1435_v7, %v1360_v10  ;;  %v1362_v12 = vpop.f32.mrb[1].mxu0 }
 0x1c8   :  { %v1438_v13 = vadd.f32 %v1435_v7, %v1362_v12 }
 0x1c9   :  { %v1439_v14 = vmax.f32 %v1437_v11, 0.0 }
 0x1ca   :  { %v1440_v15 = vmax.f32 %v1438_v13, 0.0 }
 0x1cb   :  { %v1445_v16 = vsel %vm1443_vm14, %v1439_v14, 0.0  ;;  %vm7348_vm14 = vcmask 850944  }
 0x1cc   :  { %1451 = vrot.lane.b32.xlu0 %v1445_v16, %s5929_s18  ;;  %v1446_v17 = vsel %vm1431_vm2, %v1440_v15, 0.0  ;;  %vm7349_vm2 = vmmov %vm7347_vm0 }
 0x1cd   :  { %1453 = vrot.lane.b32.xlu1 %v1446_v17, %s5929_s18 }
 0x23e   :  { %v1452_v18 = vpop.permute.xlu0 %1451 }
 0x23f   :  { %1460 = vst.msk [vmem:[#allocation2] sm:$0xff] %vm7322_vm11, %v1452_v18  ;;  %v1454_v19 = vpop.permute.xlu1 %1453 }
 0x240   :  { %v1456_v20 = vsel %vm7321_vm13, %v1452_v18, %v1454_v19 }
 0x241   :  { %1461 = vst.msk [vmem:[#allocation2 + $0x8] sm:$0xff] %vm7319_vm15, %v1456_v20 }
 0x246   :  { %v6158_v21 = vld [vmem:[#allocation2] sm:$0xff] }
 0x247   :  { %1708 = vrot.lane.b32.xlu0 %v6158_v21, %s5903_s19 }
 0x248   :  { %v6162_v22 = vld [vmem:[#allocation2 + $0x8] sm:$0xff] }
 0x249   :  { %1710 = vrot.lane.b32.xlu1 %v6162_v22, %s5903_s19 }
 0x24b   :  { %1706 = vrot.lane.b32.xlu0 %v6167_v23, %s5904_s0 }
 0x24d   :  { %1792 = vrot.lane.b32.xlu1 %v6158_v21, %s5905_s20 }
 0x24f   :  { %1794 = vrot.lane.b32.xlu0 %v6162_v22, %s5905_s20 }
 0x251   :  { %1790 = vrot.lane.b32.xlu1 %v6167_v23, %s5906_s21 }
 0x253   :  { %1876 = vrot.lane.b32.xlu0 %v6158_v21, %s5907_s22 }
 0x255   :  { %1878 = vrot.lane.b32.xlu1 %v6162_v22, %s5907_s22 }
 0x257   :  { %1874 = vrot.lane.b32.xlu0 %v6167_v23, %s5908_s23 }
 0x259   :  { %1960 = vrot.lane.b32.xlu1 %v6158_v21, %s5909_s24 }
 0x25b   :  { %1962 = vrot.lane.b32.xlu0 %v6162_v22, %s5909_s24 }
 0x25d   :  { %1958 = vrot.lane.b32.xlu1 %v6167_v23, %s5910_s25 }
 0x25f   :  { %2044 = vrot.lane.b32.xlu0 %v6158_v21, %s5904_s0 }
 0x261   :  { %2046 = vrot.lane.b32.xlu1 %v6162_v22, %s5904_s0 }
 0x263   :  { %2042 = vrot.lane.b32.xlu0 %v6167_v23, %s5911_s26 }
 0x265   :  { %2128 = vrot.lane.b32.xlu1 %v6158_v21, %s5912_s27 }
 0x267   :  { %2130 = vrot.lane.b32.xlu0 %v6162_v22, %s5912_s27 }
 0x269   :  { %2126 = vrot.lane.b32.xlu1 %v6167_v23, %s5913_s28 }
 0x26b   :  { %2212 = vrot.lane.b32.xlu0 %v6158_v21, %s5914_s29 }
 0x26d   :  { %2214 = vrot.lane.b32.xlu1 %v6162_v22, %s5914_s29 }
 0x26f   :  { %2210 = vrot.lane.b32.xlu0 %v6167_v23, %s5915_s30 }
 0x271   :  { %2296 = vrot.lane.b32.xlu1 %v6158_v21, %s5916_s3 }
 0x273   :  { %2298 = vrot.lane.b32.xlu0 %v6162_v22, %s5916_s3 }
 0x275   :  { %2294 = vrot.lane.b32.xlu1 %v6167_v23, %s5917_s4 }
 0x277   :  { %2380 = vrot.lane.b32.xlu0 %v6158_v21, %s5918_s5 }
 0x279   :  { %2382 = vrot.lane.b32.xlu1 %v6162_v22, %s5918_s5 }
 0x27b   :  { %2378 = vrot.lane.b32.xlu0 %v6167_v23, %s5919_s6 }
 0x27d   :  { %2464 = vrot.lane.b32.xlu1 %v6158_v21, %s5920_s7 }
 0x27f   :  { %1469 = vrot.lane.b32.xlu0 %v6158_v21, %s5899_s13 }
 0x281   :  { %2462 = vrot.lane.b32.xlu1 %v6167_v23, %s5921_s8 }
 0x283   :  { %2466 = vrot.lane.b32.xlu0 %v6162_v22, %s5920_s7 }
 0x285   :  { %1471 = vrot.lane.b32.xlu1 %v6162_v22, %s5899_s13 }
 0x287   :  { %2548 = vrot.lane.b32.xlu0 %v6158_v21, %s5913_s28 }
 0x289   :  { %2550 = vrot.lane.b32.xlu1 %v6162_v22, %s5913_s28 }
 0x28b   :  { %1465 = vrot.lane.b32.xlu0 %v6167_v23, %s5900_s14 }
 0x28d   :  { %2546 = vrot.lane.b32.xlu1 %v6167_v23, %s5922_s9 }
 0x28f   :  { %2632 = vrot.lane.b32.xlu0 %v6158_v21, %s5923_s10 }
 0x291   :  { %2634 = vrot.lane.b32.xlu1 %v6162_v22, %s5923_s10 }
 0x293   :  { %2630 = vrot.lane.b32.xlu0 %v6167_v23, %s7324_s11 }
 0x295   :  { %1624 = vrot.lane.b32.xlu1 %v6158_v21, %s5901_s17 }
 0x297   :  { %1626 = vrot.lane.b32.xlu0 %v6162_v22, %s5901_s17 }
 0x299   :  { %2716 = vrot.lane.b32.xlu1 %v6158_v21, %s7325_s12 }
 0x29b   :  { %2718 = vrot.lane.b32.xlu0 %v6162_v22, %s7325_s12 }
 0x29d   :  { %1622 = vrot.lane.b32.xlu1 %v6167_v23, %s7340_s15 }
 0x29f   :  { %2714 = vrot.lane.b32.xlu0 %v6167_v23, %s7341_s16 }
 0x2a1   :  { %2839 = vperm.xlu1 %5888, %v6066_v4  }
 0x2b9   :  { %v1709_v25 = vpop.permute.xlu0 %1708 }
 0x2bb   :  { %v1711_v26 = vpop.permute.xlu1 %1710 }
 0x2bc   :  { %1717 = vmatprep.subr.mxu1 %v1711_v26  ;;  %v1712_v27 = vsel %vm7320_vm3, %v1709_v25, %v1711_v26  ;;  %vm2814_vm3 = vcmp.lt.s32.totalorder %v6120_v5, 80 }
 0x2bd   :  { %v1707_v28 = vpop.permute.xlu0 %1706  ;;  %1718 = vmatpush1.msra.mxu1 %v1712_v27  ;;  %vm2816_vm11 = vmand %vm7330_vm8, %vm2814_vm3 }
 0x2be   :  { %5350 = vmatmul.mubr.msk.f32.vlgmr.msra.gmra.mrb[0].mxu1 %vm7342_vm9, %v1707_v28  ;;  %vm7350_vm9 = vcmask 703488  }
 0x2bf   :  { %v1793_v29 = vpop.permute.xlu1 %1792  ;;  %1865 = vmatprep.mubr.f32.mxu1 %v5898_v2 }
 0x2c1   :  { %v1795_v30 = vpop.permute.xlu0 %1794 }
 0x2c2   :  { %v1796_v31 = vsel %vm7343_vm5, %v1793_v29, %v1795_v30  ;;  %1801 = vmatprep.subr.mxu1 %v1795_v30  ;;  %vm7351_vm5 = vmmov %vm7347_vm0 }
 0x2c3   :  { %1802 = vmatpush1.msra.mxu1 %v1796_v31  ;;  %v1791_v32 = vpop.permute.xlu1 %1790 }
 0x2c5   :  { %v1877_v33 = vpop.permute.xlu0 %1876 }
 0x2c6   :  { %5351 = vmatmul.mubr.msk.f32.vlgmr.msra.gmra.mrb[0].mxu1 %vm7344_vm6, %v1791_v32  ;;  %vm7352_vm6 = vcmask 695296  }
 0x2c7   :  { %v1879_v34 = vpop.permute.xlu1 %1878  ;;  %1949 = vmatprep.mubr.f32.mxu1 %v5898_v2 }
 0x2c8   :  { %v1880_v35 = vsel %vm7345_vm7, %v1877_v33, %v1879_v34  ;;  %1885 = vmatprep.subr.mxu1 %v1879_v34  ;;  %vm7353_vm7 = vmmov %vm7347_vm0 }
 0x2c9   :  { %v1875_v36 = vpop.permute.xlu0 %1874  ;;  %1886 = vmatpush1.msra.mxu1 %v1880_v35 }
 0x2cb   :  { %v1961_v37 = vpop.permute.xlu1 %1960 }
 0x2cd   :  { %v1963_v38 = vpop.permute.xlu0 %1962 }
 0x2ce   :  { %v1964_v39 = vsel %vm7346_vm1, %v1961_v37, %v1963_v38  ;;  %5352 = vmatmul.mubr.msk.f32.vlgmr.msra.gmra.mrb[0].mxu1 %vm7347_vm0, %v1875_v36  ;;  %1969 = vmatprep.subr.mxu1 %v1963_v38  ;;  %vm7354_vm1 = vcmask 687104  }
 0x2cf   :  { %1970 = vmatpush1.msra.mxu1 %v1964_v39  ;;  %v1959_v40 = vpop.permute.xlu1 %1958  ;;  %2033 = vmatprep.mubr.f32.mxu1 %v5898_v2 }
 0x2d1   :  { %v2045_v41 = vpop.permute.xlu0 %2044 }
 0x2d3   :  { %v2047_v42 = vpop.permute.xlu1 %2046 }
 0x2d4   :  { %v2048_v43 = vsel %vm7348_vm14, %v2045_v41, %v2047_v42  ;;  %2053 = vmatprep.subr.mxu1 %v2047_v42  ;;  %vm7355_vm14 = vcmask 678912   ;;  %v13_v41 = vld [vmem:[%s7297_s1 + $0x10] sm:$0xff] }
 0x2d5   :  { %v2043_v44 = vpop.permute.xlu0 %2042 }
 0x2d6   :  { %5353 = vmatmul.mubr.msk.f32.vlgmr.msra.gmra.mrb[0].mxu1 %vm7349_vm2, %v1959_v40  ;;  %vm7356_vm2 = vmmov %vm7347_vm0 }
 0x2d7   :  { %2054 = vmatpush1.msra.mxu1 %v2048_v43  ;;  %v2129_v45 = vpop.permute.xlu1 %2128  ;;  %2117 = vmatprep.mubr.f32.mxu1 %v5898_v2 }
 0x2d9   :  { %v2131_v46 = vpop.permute.xlu0 %2130 }
 0x2da   :  { %2137 = vmatprep.subr.mxu1 %v2131_v46  ;;  %v2132_v49 = vsel %vm7350_vm9, %v2129_v45, %v2131_v46  ;;  %vm7357_vm9 = vcmask 1039360   ;;  %v5932_v46 = vmov 10  }
 0x2db   :  { %v2127_v47 = vpop.permute.xlu1 %2126  ;;  %5889 = vset.pattern.permute.xlu1 %v5932_v46 }
 0x2dd   :  { %v2213_v48 = vpop.permute.xlu0 %2212 }
 0x2de   :  { %5354 = vmatmul.mubr.msk.f32.vlgmr.msra.gmra.mrb[0].mxu1 %vm7351_vm5, %v2043_v44  ;;  %vm7358_vm5 = vcmask 531456  }
 0x2df   :  { %2138 = vmatpush1.msra.mxu1 %v2132_v49  ;;  %v2215_v50 = vpop.permute.xlu1 %2214  ;;  %2201 = vmatprep.mubr.f32.mxu1 %v5898_v2 }
 0x2e0   :  { %2221 = vmatprep.subr.mxu1 %v2215_v50  ;;  %v2216_v54 = vsel %vm7352_vm6, %v2213_v48, %v2215_v50  ;;  %vm7359_vm6 = vmmov %vm7347_vm0 }
 0x2e1   :  { %v2211_v51 = vpop.permute.xlu0 %2210 }
 0x2e3   :  { %v2297_v52 = vpop.permute.xlu1 %2296 }
 0x2e5   :  { %v2299_v53 = vpop.permute.xlu0 %2298 }
 0x2e6   :  { %5355 = vmatmul.mubr.msk.f32.vlgmr.msra.gmra.mrb[0].mxu1 %vm7353_vm7, %v2127_v47  ;;  %v2300_v59 = vsel %vm7354_vm1, %v2297_v52, %v2299_v53  ;;  %vm7360_vm7 = vmmov %vm7347_vm0  ;;  %vm7361_vm1 = vcmask 523264  }
 0x2e7   :  { %2222 = vmatpush1.msra.mxu1 %v2216_v54  ;;  %v2295_v55 = vpop.permute.xlu1 %2294  ;;  %2285 = vmatprep.mubr.f32.mxu1 %v5898_v2 }
 0x2e8   :  { %2305 = vmatprep.subr.mxu1 %v2299_v53 }
 0x2e9   :  { %v2381_v56 = vpop.permute.xlu0 %2380 }
 0x2eb   :  { %v2383_v57 = vpop.permute.xlu1 %2382 }
 0x2ec   :  { %v2384_v0 = vsel %vm7355_vm14, %v2381_v56, %v2383_v57  ;;  %vm7362_vm14 = vmmov %vm7347_vm0 }
 0x2ed   :  { %v2379_v58 = vpop.permute.xlu0 %2378 }
 0x2ee   :  { %5356 = vmatmul.mubr.msk.f32.vlgmr.msra.gmra.mrb[0].mxu1 %vm7347_vm0, %v2211_v51 }
 0x2ef   :  { %2306 = vmatpush1.msra.mxu1 %v2300_v59  ;;  %v2465_v60 = vpop.permute.xlu1 %2464  ;;  %2369 = vmatprep.mubr.f32.mxu1 %v5898_v2 }
 0x2f0   :  { %2389 = vmatprep.subr.mxu1 %v2383_v57 }
 0x2f1   :  { %v1470_v61 = vpop.permute.xlu0 %1469 }
 0x2f3   :  { %v2463_v62 = vpop.permute.xlu1 %2462 }
 0x2f5   :  { %v2467_v63 = vpop.permute.xlu0 %2466 }
 0x2f6   :  { %5357 = vmatmul.mubr.msk.f32.vlgmr.msra.gmra.mrb[0].mxu1 %vm7356_vm2, %v2295_v55  ;;  %v2468_v12 = vsel %vm7358_vm5, %v2465_v60, %v2467_v63  ;;  %vm7363_vm2 = vcmask 1031168   ;;  %vm7365_vm5 = vmmov %vm7347_vm0 }
 0x2f7   :  { %2390 = vmatpush1.msra.mxu1 %v2384_v0  ;;  %v1472_v1 = vpop.permute.xlu1 %1471  ;;  %2453 = vmatprep.mubr.f32.mxu1 %v5898_v2 }
 0x2f8   :  { %2473 = vmatprep.subr.mxu1 %v2467_v63  ;;  %v1473_v7 = vsel %vm7357_vm9, %v1470_v61, %v1472_v1  ;;  %1478 = vmatprep.subr.mxu0 %v1472_v1  ;;  %vm7364_vm9 = vcmask 515072  }
 0x2f9   :  { %v2549_v9 = vpop.permute.xlu0 %2548  ;;  %1479 = vmatpush1.msra.mxu0 %v1473_v7 }
 0x2fa   :  { %1551 = vmatprep.subr.mxu0 %v6162_v22 }
 0x2fb   :  { %v2551_v10 = vpop.permute.xlu1 %2550 }
 0x2fc   :  { %v2552_v17 = vsel %vm7361_vm1, %v2549_v9, %v2551_v10  ;;  %vm7368_vm1 = vmmov %vm7347_vm0 }
 0x2fd   :  { %v1466_v11 = vpop.permute.xlu0 %1465 }
 0x2fe   :  { %5347 = vmatmul.mubr.msk.f32.vlgmr.msra.gmra.mrb[2].mxu0 %vm7359_vm6, %v1466_v11  ;;  %5358 = vmatmul.mubr.msk.f32.vlgmr.msra.gmra.mrb[0].mxu1 %vm7360_vm7, %v2379_v58  ;;  %vm7366_vm6 = vmmov %vm7347_vm0 }
 0x2ff   :  { %1552 = vmatpush1.msra.mxu0 %v6158_v21  ;;  %2474 = vmatpush1.msra.mxu1 %v2468_v12  ;;  %v2547_v13 = vpop.permute.xlu1 %2546  ;;  %vm7367_vm7 = vmmov %vm7347_vm0 }
 0x300   :  { %2557 = vmatprep.subr.mxu1 %v2551_v10  ;;  %2537 = vmatprep.mubr.f32.mxu1 %v5898_v2 }
 0x301   :  { %v2633_v14 = vpop.permute.xlu0 %2632  ;;  %1615 = vmatprep.mubr.f32.mxu0 %v5898_v2 }
 0x303   :  { %v2635_v15 = vpop.permute.xlu1 %2634 }
 0x304   :  { %v2636_v24 = vsel %vm7364_vm9, %v2633_v14, %v2635_v15 }
 0x305   :  { %v2631_v16 = vpop.permute.xlu0 %2630 }
 0x306   :  { %5359 = vmatmul.mubr.msk.f32.vlgmr.msra.gmra.mrb[0].mxu1 %vm7347_vm0, %v2463_v62  ;;  %5348 = vmatmul.mubr.msk.f32.vlgmr.msra.gmra.mrb[2].mxu0 %vm7362_vm14, %v6167_v23  ;;  %vm2802_vm0 = vcmp.lt.s32.totalorder %v6120_v5, 38  ;;  %vm2798_vm14 = vcmp.lt.s32.totalorder %v6120_v5, 17 }
 0x307   :  { %2558 = vmatpush1.msra.mxu1 %v2552_v17  ;;  %v1625_v18 = vpop.permute.xlu1 %1624  ;;  %2621 = vmatprep.mubr.f32.mxu1 %v5898_v2 }
 0x308   :  { %2641 = vmatprep.subr.mxu1 %v2635_v15  ;;  %1697 = vmatprep.mubr.f32.mxu0 %v5898_v2 }
 0x309   :  { %v1627_v19 = vpop.permute.xlu0 %1626 }
 0x30a   :  { %v1628_v20 = vsel %vm7363_vm2, %v1625_v18, %v1627_v19  ;;  %1633 = vmatprep.subr.mxu0 %v1627_v19  ;;  %vm7369_vm2 = vcmp.ge.s32.totalorder %v6120_v5, 21 }
 0x30b   :  { %1634 = vmatpush1.msra.mxu0 %v1628_v20  ;;  %v2717_v21 = vpop.permute.xlu1 %2716  ;;  %vm2804_vm9 = vmand %vm7369_vm2, %vm2802_vm0  ;;  %vm2826_vm2 = vcmp.lt.s32.totalorder %v6120_v5, 122 }
 0x30c   :  { %5533 = vmatprep.subr.mxu0 %v5898_v2 }
 0x30d   :  { %v2719_v22 = vpop.permute.xlu0 %2718 }
 0x30e   :  { %5360 = vmatmul.mubr.msk.f32.vlgmr.msra.gmra.mrb[0].mxu1 %vm7365_vm5, %v2547_v13  ;;  %v2720_v25 = vsel %vm7319_vm15, %v2717_v21, %v2719_v22  ;;  %vm2808_vm5 = vcmp.lt.s32.totalorder %v6120_v5, 59 }
 0x30f   :  { %2642 = vmatpush1.msra.mxu1 %v2636_v24  ;;  %v1623_v23 = vpop.permute.xlu1 %1622  ;;  %2705 = vmatprep.mubr.f32.mxu1 %v5898_v2 }
 0x310   :  { %2725 = vmatprep.subr.mxu1 %v2719_v22  ;;  %5349 = vmatmul.mubr.msk.f32.vlgmr.msra.gmra.mrb[2].mxu0 %vm7366_vm6, %v1623_v23  ;;  %vm2806_vm6 = vmor %vm2798_vm14, %vm2804_vm9 }
 0x311   :  { %v2715_v26 = vpop.permute.xlu0 %2714  ;;  %vm2828_vm9 = vmand %vm7328_vm12, %vm2826_vm2  ;;  %vm7377_vm2 = vcmask 1039360  }
 0x316   :  { %5361 = vmatmul.mubr.msk.f32.vlgmr.msra.gmra.mrb[0].mxu1 %vm7367_vm7, %v2631_v16  ;;  %vm7370_vm7 = vcmp.ge.s32.totalorder %v6120_v5, 42 }
 0x317   :  { %2726 = vmatpush1.msra.mxu1 %v2720_v25  ;;  %2789 = vmatprep.mubr.f32.mxu1 %v5898_v2  ;;  %vm2810_vm15 = vmand %vm7370_vm7, %vm2808_vm5  ;;  %vm7373_vm7 = vcmask 179200  }
 0x318   :  { %5538 = vmatprep.subr.mxu1 %v5898_v2  ;;  %vm2812_vm13 = vmor %vm2806_vm6, %vm2810_vm15  ;;  %vm7371_vm15 = vcmp.ge.s32.totalorder %v6120_v5, 126 }
 0x319   :  { %vm2818_vm10 = vmor %vm2812_vm13, %vm2816_vm11  ;;  %vm2864_vm11 = vcmask 334848   ;;  %vm7372_vm13 = vcmask 1047728  }
 0x31e   :  { %5362 = vmatmul.mubr.msk.f32.vlgmr.msra.gmra.mrb[0].mxu1 %vm7368_vm1, %v2715_v26  ;;  %vm2820_vm1 = vcmp.lt.s32.totalorder %v6120_v5, 101 }
 0x31f   :  { %vm2822_vm0 = vmand %vm7329_vm4, %vm2820_vm1  ;;  %vm7327_vm1 = vmmov 0  }
 0x320   :  { %vm2824_vm14 = vmor %vm2818_vm10, %vm2822_vm0  ;;  %v2840_v30 = vpop.permute.xlu1 %2839  ;;  %vm2833_vm10 = vcmp.lt.s32.totalorder %v6145_v6, 143  ;;  %5535 = vmatprep.mubr.msk.f32.mxu0 %vm7327_vm1, %v5898_v2  ;;  %5540 = vmatprep.mubr.msk.f32.mxu1 %vm7327_vm1, %v5898_v2  ;;  %vm7374_vm0 = vcmask 64512  }
 0x321   :  { %vm2830_vm5 = vmor %vm2824_vm14, %vm2828_vm9  ;;  %vm7379_vm9 = vcmask 1031168  }
 0x322   :  { %vm2836_vm6 = vmor %vm2830_vm5, %vm7371_vm15  ;;  %vm7381_vm15 = vcmask 1022976  }
 0x323   :  { %v2846_v33 = vsel %vm2836_vm6, 1, %v5928_v8  ;;  %vm7378_vm14 = vmmov %vm7374_vm0  ;;  %vm7382_vm6 = vcmask 875520  }
 0x324   :  { %vm2848_vm3 = vcmp.eq.s32.totalorder %v2846_v33, 1  ;;  %vm7380_vm5 = vmmov %vm7374_vm0 }
 0x3e3   :  { %v1699_v27 = vpop.f32.mrb[2].mxu0 }
 0x3e4   :  { %v1701_v28 = vpop.f32.mrb[3].mxu0 }
 0x3f1   :  { %v2791_v29 = vpop.f32.mrb[0].mxu1 }
 0x3f2   :  { %v5788_v31 = vadd.f32 %v2791_v29, %v1699_v27  ;;  %v2793_v32 = vpop.f32.mrb[1].mxu1 }
 0x3f3   :  { %v5789_v34 = vadd.f32 %v2793_v32, %v1701_v28 }
 0x3f4   :  { %v2842_v35 = vadd.f32 %v5788_v31, %v2840_v30 }
 0x3f5   :  { %v2843_v36 = vadd.f32 %v5789_v34, %v2840_v30 }
 0x3f6   :  { %v2844_v37 = vmax.f32 %v2842_v35, 0.0 }
 0x3f7   :  { %v2845_v38 = vmax.f32 %v2843_v36, 0.0 }
 0x3f8   :  { %v2850_v39 = vsel %vm2848_vm3, %v2844_v37, 0.0  ;;  %vm7383_vm3 = vmmov %vm7374_vm0 }
 0x3f9   :  { %2856 = vrot.lane.b32.xlu0 %v2850_v39, %s5929_s18  ;;  %v2851_v40 = vsel %vm2833_vm10, %v2845_v38, 0.0  ;;  %vm7384_vm10 = vmmov %vm7374_vm0 }
 0x3fa   :  { %2858 = vrot.lane.b32.xlu1 %v2851_v40, %s5929_s18 }
 0x3fd   :  { %2870 = vrot.lane.b32.xlu0 %v13_v41, %s5900_s14  ;;  %s7375_s14 = smov 62  }
 0x3fe   :  { %3024 = vrot.lane.b32.xlu1 %v13_v41, %s7340_s15 }
 0x401   :  { %3105 = vrot.lane.b32.xlu0 %v13_v41, %s5904_s0 }
 0x402   :  { %3186 = vrot.lane.b32.xlu1 %v13_v41, %s5906_s21  ;;  %s7376_s21 = smov 16  }
 0x405   :  { %3267 = vrot.lane.b32.xlu0 %v13_v41, %s5908_s23 }
 0x406   :  { %3348 = vrot.lane.b32.xlu1 %v13_v41, %s5910_s25 }
 0x409   :  { %3429 = vrot.lane.b32.xlu0 %v13_v41, %s5911_s26 }
 0x40a   :  { %3510 = vrot.lane.b32.xlu1 %v13_v41, %s5913_s28 }
 0x40d   :  { %3591 = vrot.lane.b32.xlu0 %v13_v41, %s5915_s30 }
 0x40e   :  { %3672 = vrot.lane.b32.xlu1 %v13_v41, %s5917_s4 }
 0x411   :  { %3753 = vrot.lane.b32.xlu0 %v13_v41, %s5919_s6 }
 0x412   :  { %3834 = vrot.lane.b32.xlu1 %v13_v41, %s5921_s8 }
 0x415   :  { %3915 = vrot.lane.b32.xlu0 %v13_v41, %s5922_s9 }
 0x46b   :  { %v2857_v6 = vpop.permute.xlu0 %2856 }
 0x46c   :  { %2863 = vst.msk [vmem:[#allocation3] sm:$0xff] %vm7372_vm13, %v2857_v6  ;;  %v2859_v42 = vpop.permute.xlu1 %2858  ;;  %vm7386_vm13 = vcmask 859136  }
 0x46d   :  { %v2860_v43 = vsel %vm7373_vm7, %v2857_v6, %v2859_v42  ;;  %vm7387_vm7 = vmmov %vm7374_vm0 }
 0x46e   :  { %2865 = vst.msk [vmem:[#allocation3 + $0x8] sm:$0xff] %vm2864_vm11, %v2860_v43  ;;  %vm7385_vm11 = vcmask 867328  }
 0x46f   :  { %v2871_v47 = vpop.permute.xlu0 %2870 }
 0x470   :  { %v3025_v48 = vpop.permute.xlu1 %3024 }
 0x473   :  { %v2867_v44 = vld [vmem:[#allocation3] sm:$0xff]  ;;  %v3106_v49 = vpop.permute.xlu0 %3105 }
 0x474   :  { %3026 = vrot.lane.b32.xlu1 %v2867_v44, %s5901_s17  ;;  %2874 = vrot.lane.b32.xlu0 %v2867_v44, %s5899_s13  ;;  %v3187_v50 = vpop.permute.xlu1 %3186 }
 0x475   :  { %5539 = vmatpush3.msra.mxu1 %v2867_v44  ;;  %v2868_v45 = vld [vmem:[#allocation3 + $0x8] sm:$0xff] }
 0x476   :  { %5548 = vmatprep.subr.mxu1 %v5898_v2  ;;  %5541 = vmatmul.mubr.msk.f32.vlgmr.msra.gmra.mrb[2].mxu1 %vm7374_vm0, %v13_v41 }
 0x477   :  { %5550 = vmatprep.mubr.msk.f32.mxu1 %vm7327_vm1, %v5898_v2  ;;  %v3268_v51 = vpop.permute.xlu0 %3267 }
 0x478   :  { %3188 = vrot.lane.b32.xlu1 %v2867_v44, %s5905_s20  ;;  %3107 = vrot.lane.b32.xlu0 %v2867_v44, %s5903_s19  ;;  %v3349_v52 = vpop.permute.xlu1 %3348 }
 0x47b   :  { %v6389_v53 = vpop.permute.xlu0 %3429 }
 0x47c   :  { %3350 = vrot.lane.b32.xlu1 %v2867_v44, %s5909_s24  ;;  %3269 = vrot.lane.b32.xlu0 %v2867_v44, %s5907_s22  ;;  %v6391_v54 = vpop.permute.xlu1 %3510 }
 0x47f   :  { %v6393_v55 = vpop.permute.xlu0 %3591 }
 0x480   :  { %3512 = vrot.lane.b32.xlu1 %v2867_v44, %s5912_s27  ;;  %3431 = vrot.lane.b32.xlu0 %v2867_v44, %s5904_s0  ;;  %v6395_v56 = vpop.permute.xlu1 %3672 }
 0x483   :  { %v6397_v57 = vpop.permute.xlu0 %3753 }
 0x484   :  { %3674 = vrot.lane.b32.xlu1 %v2867_v44, %s5916_s3  ;;  %3593 = vrot.lane.b32.xlu0 %v2867_v44, %s5914_s29  ;;  %v6399_v58 = vpop.permute.xlu1 %3834 }
 0x487   :  { %v6401_v59 = vpop.permute.xlu0 %3915 }
 0x488   :  { %3836 = vrot.lane.b32.xlu1 %v2867_v44, %s5920_s7  ;;  %3755 = vrot.lane.b32.xlu0 %v2867_v44, %s5918_s5 }
 0x48c   :  { %3998 = vrot.lane.b32.xlu1 %v2867_v44, %s5923_s10  ;;  %3917 = vrot.lane.b32.xlu0 %v2867_v44, %s5913_s28 }
 0x490   :  { %4079 = vrot.lane.b32.xlu0 %v2867_v44, %s7375_s14  ;;  %2876 = vrot.lane.b32.xlu1 %v2868_v45, %s5899_s13 }
 0x494   :  { %3028 = vrot.lane.b32.xlu0 %v2868_v45, %s5901_s17  ;;  %3996 = vrot.lane.b32.xlu1 %v13_v41, %s7376_s21 }
 0x498   :  { %3190 = vrot.lane.b32.xlu0 %v2868_v45, %s5905_s20  ;;  %3109 = vrot.lane.b32.xlu1 %v2868_v45, %s5903_s19 }
 0x49c   :  { %3352 = vrot.lane.b32.xlu0 %v2868_v45, %s5909_s24  ;;  %3271 = vrot.lane.b32.xlu1 %v2868_v45, %s5907_s22 }
 0x4a0   :  { %3514 = vrot.lane.b32.xlu0 %v2868_v45, %s5912_s27  ;;  %3433 = vrot.lane.b32.xlu1 %v2868_v45, %s5904_s0 }
 0x4a4   :  { %3676 = vrot.lane.b32.xlu0 %v2868_v45, %s5916_s3  ;;  %3595 = vrot.lane.b32.xlu1 %v2868_v45, %s5914_s29 }
 0x4a8   :  { %3838 = vrot.lane.b32.xlu0 %v2868_v45, %s5920_s7  ;;  %3757 = vrot.lane.b32.xlu1 %v2868_v45, %s5918_s5 }
 0x4ac   :  { %4000 = vrot.lane.b32.xlu0 %v2868_v45, %s5923_s10  ;;  %3919 = vrot.lane.b32.xlu1 %v2868_v45, %s5913_s28 }
 0x4b0   :  { %4081 = vrot.lane.b32.xlu1 %v2868_v45, %s7375_s14  ;;  %4077 = vrot.lane.b32.xlu0 %v13_v41, %s7341_s16 }
 0x4b4   :  { %4181 = vperm.xlu1 %5889, %v6066_v4  }
 0x4e6   :  { %v3027_v4 = vpop.permute.xlu1 %3026  ;;  %v2875_v60 = vpop.permute.xlu0 %2874 }
 0x4ea   :  { %v3189_v61 = vpop.permute.xlu1 %3188  ;;  %v3108_v62 = vpop.permute.xlu0 %3107 }
 0x4ee   :  { %v3351_v63 = vpop.permute.xlu1 %3350  ;;  %v3270_v0 = vpop.permute.xlu0 %3269 }
 0x4f2   :  { %v3513_v1 = vpop.permute.xlu1 %3512  ;;  %v3432_v7 = vpop.permute.xlu0 %3431 }
 0x4f6   :  { %v3675_v9 = vpop.permute.xlu1 %3674  ;;  %v3594_v10 = vpop.permute.xlu0 %3593 }
 0x4fa   :  { %v6403_v11 = vpop.permute.xlu1 %3836  ;;  %v6405_v12 = vpop.permute.xlu0 %3755 }
 0x4fe   :  { %v6407_v13 = vpop.permute.xlu1 %3998  ;;  %v6409_v14 = vpop.permute.xlu0 %3917 }
 0x502   :  { %v2877_v15 = vpop.permute.xlu1 %2876  ;;  %v6411_v16 = vpop.permute.xlu0 %4079 }
 0x503   :  { %v2878_v17 = vsel %vm7377_vm2, %v2875_v60, %v2877_v15  ;;  %vm7388_vm2 = vcmask 850944   ;;  %v7421_v15 = vmov 0 }
 0x504   :  { %5534 = vmatpush3.msra.mxu0 %v2878_v17 }
 0x505   :  { %5536 = vmatmul.mubr.msk.f32.vlgmr.msra.gmra.mrb[4].mxu0 %vm7378_vm14, %v2871_v47  ;;  %5543 = vmatprep.subr.mxu0 %v5898_v2  ;;  %vm7389_vm14 = vcmask 703488  }
 0x506   :  { %v6416_v18 = vpop.permute.xlu1 %3996  ;;  %v3029_v19 = vpop.permute.xlu0 %3028  ;;  %5545 = vmatprep.mubr.msk.f32.mxu0 %vm7327_vm1, %v5898_v2 }
 0x507   :  { %v3030_v20 = vsel %vm7379_vm9, %v3027_v4, %v3029_v19  ;;  %vm7390_vm9 = vmmov %vm7374_vm0 }
 0x508   :  { %5544 = vmatpush3.msra.mxu0 %v3030_v20  ;;  %v7427_v20 = vmov 0 }
 0x509   :  { %5546 = vmatmul.mubr.msk.f32.vlgmr.msra.gmra.mrb[6].mxu0 %vm7380_vm5, %v3025_v48  ;;  %5553 = vmatprep.subr.mxu0 %v5898_v2  ;;  %vm7391_vm5 = vmmov %vm7374_vm0 }
 0x50a   :  { %v3110_v21 = vpop.permute.xlu1 %3109  ;;  %v3191_v22 = vpop.permute.xlu0 %3190  ;;  %5555 = vmatprep.mubr.msk.f32.mxu0 %vm7327_vm1, %v5898_v2 }
 0x50b   :  { %v3111_v24 = vsel %vm7381_vm15, %v3108_v62, %v3110_v21  ;;  %v3192_v23 = vsel %vm7382_vm6, %v3189_v61, %v3191_v22  ;;  %vm7392_vm15 = vcmask 695296   ;;  %vm7393_vm6 = vcmask 687104  }
 0x50c   :  { %5549 = vmatpush3.msra.mxu1 %v3111_v24  ;;  %5554 = vmatpush3.msra.mxu0 %v3192_v23  ;;  %v5935_v61 = vmov 1.0|1.0   ;;  %v7429_v21 = vmov 0  ;;  %v7431_v22 = vmov 0 }
 0x50d   :  { %5551 = vmatmul.mubr.msk.f32.vlgmr.msra.gmra.mrb[4].mxu1 %vm7383_vm3, %v3106_v49  ;;  %5556 = vmatmul.mubr.msk.f32.vlgmr.msra.gmra.mrb[8].mxu0 %vm7384_vm10, %v3187_v50  ;;  %vm7394_vm3 = vmmov %vm7374_vm0  ;;  %v6505_v49 = vshrl.u32 %v1367_v3, 7  ;;  %v6508_v50 = vmul.u32 21, %v6120_v5 }
 0x50e   :  { %v3272_v25 = vpop.permute.xlu1 %3271  ;;  %v3353_v26 = vpop.permute.xlu0 %3352  ;;  %5558 = vmatprep.subr.mxu1 %v5898_v2  ;;  %5563 = vmatprep.subr.mxu0 %v5898_v2  ;;  %vm7395_vm10 = vmmov %vm7374_vm0 }
 0x50f   :  { %v3273_v27 = vsel %vm7385_vm11, %v3270_v0, %v3272_v25  ;;  %v3354_v28 = vsel %vm7386_vm13, %v3351_v63, %v3353_v26  ;;  %5560 = vmatprep.mubr.msk.f32.mxu1 %vm7327_vm1, %v5898_v2  ;;  %5565 = vmatprep.mubr.msk.f32.mxu0 %vm7327_vm1, %v5898_v2  ;;  %vm7396_vm11 = vcmask 678912   ;;  %vm7397_vm13 = vcmask 531456  }
 0x510   :  { %5559 = vmatpush3.msra.mxu1 %v3273_v27  ;;  %5564 = vmatpush3.msra.mxu0 %v3354_v28  ;;  %v6523_v3 = vadd.s32 21, %v6508_v50  ;;  %v6557_v4 = vadd.s32 40, %v6505_v49  ;;  %v6564_v60 = vadd.s32 48, %v6505_v49  ;;  %v6576_v63 = vadd.s32 56, %v6505_v49 }
 0x511   :  { %5561 = vmatmul.mubr.msk.f32.vlgmr.msra.gmra.mrb[6].mxu1 %vm7387_vm7, %v3268_v51  ;;  %5566 = vmatmul.mubr.msk.f32.vlgmr.msra.gmra.mrb[10].mxu0 %vm7374_vm0, %v3349_v52  ;;  %vm7398_vm7 = vmmov %vm7374_vm0  ;;  %v5933_v51 = vmov 11   ;;  %v5934_v52 = vmov 0.0|0.0   ;;  %v6664_v17 = vadd.s32 96, %v6505_v49 }
 0x512   :  { %v3434_v29 = vpop.permute.xlu1 %3433  ;;  %v3515_v30 = vpop.permute.xlu0 %3514  ;;  %5568 = vmatprep.subr.mxu1 %v5898_v2  ;;  %5573 = vmatprep.subr.mxu0 %v5898_v2 }
 0x513   :  { %v3435_v31 = vsel %vm7388_vm2, %v3432_v7, %v3434_v29  ;;  %v3516_v32 = vsel %vm7389_vm14, %v3513_v1, %v3515_v30  ;;  %5570 = vmatprep.mubr.msk.f32.mxu1 %vm7327_vm1, %v5898_v2  ;;  %5575 = vmatprep.mubr.msk.f32.mxu0 %vm7327_vm1, %v5898_v2  ;;  %vm7399_vm2 = vcmask 523264   ;;  %vm7400_vm14 = vcmask 515072  }
 0x514   :  { %5569 = vmatpush3.msra.mxu1 %v3435_v31  ;;  %5574 = vmatpush3.msra.mxu0 %v3516_v32  ;;  %v6592_v1 = vadd.s32 64, %v6505_v49  ;;  %v7413_v7 = vmov 0 }
 0x515   :  { %5571 = vmatmul.mubr.msk.f32.vlgmr.msra.gmra.mrb[8].mxu1 %vm7390_vm9, %v6389_v53  ;;  %5576 = vmatmul.mubr.msk.f32.vlgmr.msra.gmra.mrb[12].mxu0 %vm7391_vm5, %v6391_v54  ;;  %vm7401_vm9 = vmmov %vm7374_vm0  ;;  %v6514_v53 = vld [vmem:[%s7297_s1 + $0x18] sm:$0xff]  ;;  %v6518_v54 = vadd.s32 8, %v6505_v49 }
 0x516   :  { %v3596_v33 = vpop.permute.xlu1 %3595  ;;  %v3677_v34 = vpop.permute.xlu0 %3676  ;;  %5578 = vmatprep.subr.mxu1 %v5898_v2  ;;  %5583 = vmatprep.subr.mxu0 %v5898_v2  ;;  %vm7402_vm5 = vmmov %vm7374_vm0 }
 0x517   :  { %v3597_v35 = vsel %vm7392_vm15, %v3594_v10, %v3596_v33  ;;  %v3678_v36 = vsel %vm7393_vm6, %v3675_v9, %v3677_v34  ;;  %5580 = vmatprep.mubr.msk.f32.mxu1 %vm7327_vm1, %v5898_v2  ;;  %5585 = vmatprep.mubr.msk.f32.mxu0 %vm7327_vm1, %v5898_v2  ;;  %vm7403_vm15 = vcmask 506880   ;;  %vm7404_vm6 = vmmov %vm7374_vm0  ;;  %v6603_v9 = vadd.s32 72, %v6505_v49 }
 0x518   :  { %5579 = vmatpush3.msra.mxu1 %v3597_v35  ;;  %5584 = vmatpush3.msra.mxu0 %v3678_v36  ;;  %v7415_v10 = vmov 0 }
 0x519   :  { %5581 = vmatmul.mubr.msk.f32.vlgmr.msra.gmra.mrb[10].mxu1 %vm7394_vm3, %v6393_v55  ;;  %5586 = vmatmul.mubr.msk.f32.vlgmr.msra.gmra.mrb[14].mxu0 %vm7395_vm10, %v6395_v56  ;;  %vm4284_vm3 = vcmp.ge.s32.totalorder %v6505_v49, %v6508_v50  ;;  %v6526_v55 = vadd.s32 16, %v6505_v49  ;;  %v6529_v56 = vadd.s32 24, %v6505_v49  ;;  %vm4285_vm10 = vcmp.ge.s32.totalorder %v6518_v54, %v6508_v50 }
 0x51a   :  { %v3758_v37 = vpop.permute.xlu1 %3757  ;;  %v3839_v38 = vpop.permute.xlu0 %3838  ;;  %5588 = vmatprep.subr.mxu1 %v5898_v2  ;;  %5593 = vmatprep.subr.mxu0 %v5898_v2  ;;  %vm4293_vm8 = vcmp.ge.s32.totalorder %v6603_v9, %v6508_v50 }
 0x51b   :  { %v3759_v39 = vsel %vm7396_vm11, %v6405_v12, %v3758_v37  ;;  %v3840_v40 = vsel %vm7397_vm13, %v6403_v11, %v3839_v38  ;;  %5590 = vmatprep.mubr.msk.f32.mxu1 %vm7327_vm1, %v5898_v2  ;;  %5595 = vmatprep.mubr.msk.f32.mxu0 %vm7327_vm1, %v5898_v2  ;;  %vm4301_vm11 = vcmp.lt.s32.totalorder %v6505_v49, %v6523_v3  ;;  %v6620_v11 = vadd.s32 80, %v6505_v49 }
 0x51c   :  { %5589 = vmatpush3.msra.mxu1 %v3759_v39  ;;  %5594 = vmatpush3.msra.mxu0 %v3840_v40  ;;  %vm4302_vm13 = vcmp.lt.s32.totalorder %v6518_v54, %v6523_v3 }
 0x51d   :  { %5591 = vmatmul.mubr.msk.f32.vlgmr.msra.gmra.mrb[12].mxu1 %vm7398_vm7, %v6397_v57  ;;  %5596 = vmatmul.mubr.msk.f32.vlgmr.msra.gmra.mrb[16].mxu0 %vm7374_vm0, %v6399_v58  ;;  %v6538_v57 = vadd.s32 32, %v6505_v49  ;;  %vm6540_vm7 = vmand %vm4284_vm3, %vm4301_vm11  ;;  %vm4286_vm0 = vcmp.ge.s32.totalorder %v6526_v55, %v6508_v50 }
 0x51e   :  { %v3920_v41 = vpop.permute.xlu1 %3919  ;;  %v4001_v6 = vpop.permute.xlu0 %4000  ;;  %5598 = vmatprep.subr.mxu1 %v5898_v2  ;;  %5603 = vmatprep.subr.mxu0 %v5898_v2 }
 0x51f   :  { %v3921_v42 = vsel %vm7399_vm2, %v6409_v14, %v3920_v41  ;;  %v4002_v43 = vsel %vm7400_vm14, %v6407_v13, %v4001_v6  ;;  %5600 = vmatprep.mubr.msk.f32.mxu1 %vm7327_vm1, %v5898_v2  ;;  %5605 = vmatprep.mubr.msk.f32.mxu0 %vm7327_vm1, %v5898_v2  ;;  %vm4303_vm2 = vcmp.lt.s32.totalorder %v6526_v55, %v6523_v3  ;;  %vm6548_vm14 = vmand %vm4285_vm10, %vm4302_vm13  ;;  %v6631_v13 = vadd.s32 88, %v6505_v49 }
 0x520   :  { %5599 = vmatpush3.msra.mxu1 %v3921_v42  ;;  %5604 = vmatpush3.msra.mxu0 %v4002_v43  ;;  %vm4288_vm3 = vcmp.ge.s32.totalorder %v6538_v57, %v6508_v50  ;;  %vm4305_vm10 = vcmp.lt.s32.totalorder %v6538_v57, %v6523_v3  ;;  %vm4289_vm13 = vcmp.ge.s32.totalorder %v6557_v4, %v6508_v50  ;;  %v7419_v14 = vmov 0 }
 0x521   :  { %5601 = vmatmul.mubr.msk.f32.vlgmr.msra.gmra.mrb[14].mxu1 %vm7401_vm9, %v6401_v59  ;;  %5606 = vmatmul.mubr.msk.f32.vlgmr.msra.gmra.mrb[18].mxu0 %vm7402_vm5, %v6416_v18  ;;  %vm4287_vm9 = vcmp.ge.s32.totalorder %v6529_v56, %v6508_v50  ;;  %vm4304_vm5 = vcmp.lt.s32.totalorder %v6529_v56, %v6523_v3  ;;  %v6671_v18 = vadd.s32 104, %v6505_v49 }
 0x522   :  { %v4082_v44 = vpop.permute.xlu1 %4081  ;;  %5608 = vmatprep.subr.mxu1 %v5898_v2  ;;  %5610 = vmatprep.mubr.msk.f32.mxu1 %vm7327_vm1, %v5898_v2  ;;  %v4078_v45 = vpop.permute.xlu0 %4077  ;;  %vm6579_vm11 = vmand %vm4287_vm9, %vm4304_vm5  ;;  %vm4290_vm9 = vcmp.ge.s32.totalorder %v6564_v60, %v6508_v50  ;;  %vm4307_vm5 = vcmp.lt.s32.totalorder %v6564_v60, %v6523_v3 }
 0x523   :  { %v4083_v46 = vsel %vm7403_vm15, %v6411_v16, %v4082_v44  ;;  %5613 = vmatprep.subr.mxu0 %v5898_v2  ;;  %5615 = vmatprep.mubr.msk.f32.mxu0 %vm7327_vm1, %v5898_v2  ;;  %vm5741_vm15 = vmpackc.low %vm6548_vm14, %vm6540_vm7  ;;  %v7423_v16 = vmov 0 }
 0x524   :  { %5609 = vmatpush3.msra.mxu1 %v4083_v46  ;;  %5890 = vset.pattern.permute.xlu0 %v5933_v51 }
 0x525   :  { %5611 = vmatmul.mubr.msk.f32.vlgmr.msra.gmra.mrb[16].mxu1 %vm7404_vm6, %v4078_v45  ;;  %5740 = vmatprep.subr.bf16.mxu1 %v5934_v52  ;;  %vm6567_vm6 = vmand %vm4286_vm0, %vm4303_vm2  ;;  %vm4306_vm0 = vcmp.lt.s32.totalorder %v6557_v4, %v6523_v3 }
 0x526   :  { %5650 = vmatprep.mubr.msk.f32.mxu1 %vm7327_vm1, %v5898_v2  ;;  %4190 = vperm.xlu0 %5890, %v6514_v53   ;;  %vm5744_vm2 = vmpackc.low %vm6579_vm11, %vm6567_vm6  ;;  %v4335_v58 = vsel %vm6567_vm6, 1.0, %v5898_v2 }
 0x527   :  { %5742 = vmatpush3.bf16.msk.msra.mxu1 %vm5741_vm15, %v5935_v61  ;;  %vm6594_vm15 = vmand %vm4288_vm3, %vm4305_vm10  ;;  %vm4291_vm3 = vcmp.ge.s32.totalorder %v6576_v63, %v6508_v50  ;;  %vm4308_vm10 = vcmp.lt.s32.totalorder %v6576_v63, %v6523_v3 }
 0x528   :  { %5743 = vmatprep.subr.bf16.mxu1 %v5934_v52  ;;  %v7414_v7 = vsel %vm6594_vm15, 4294967295, %v7413_v7  ;;  %vm6606_vm1 = vmand %vm4289_vm13, %vm4306_vm0  ;;  %vm4292_vm0 = vcmp.ge.s32.totalorder %v6592_v1, %v6508_v50 }
 0x529   :  { %v7416_v10 = vsel %vm6606_vm1, 4294967295, %v7415_v10  ;;  %vm5747_vm12 = vmpackc.low %vm6606_vm1, %vm6594_vm15 }
 0x52a   :  { %vm6622_vm13 = vmand %vm4290_vm9, %vm4307_vm5  ;;  %vm4310_vm9 = vcmp.lt.s32.totalorder %v6603_v9, %v6523_v3  ;;  %vm7456_vm6 = vnez %v7416_v10 }
 0x52b   :  { %5745 = vmatpush3.bf16.msk.msra.mxu1 %vm5744_vm2, %v5935_v61  ;;  %vm4309_vm2 = vcmp.lt.s32.totalorder %v6592_v1, %v6523_v3  ;;  %vm6633_vm4 = vmand %vm4291_vm3, %vm4308_vm10  ;;  %vm4294_vm3 = vcmp.ge.s32.totalorder %v6620_v11, %v6508_v50  ;;  %vm4311_vm10 = vcmp.lt.s32.totalorder %v6620_v11, %v6523_v3  ;;  %v4338_v62 = vsel %vm7456_vm6, 1.0, %v5898_v2 }
 0x52c   :  { %5746 = vmatprep.subr.bf16.mxu1 %v5934_v52  ;;  %v7420_v14 = vsel %vm6633_vm4, 4294967295, %v7419_v14  ;;  %vm5750_vm5 = vmpackc.low %vm6633_vm4, %vm6622_vm13  ;;  %vm4312_vm4 = vcmp.lt.s32.totalorder %v6631_v13, %v6523_v3 }
 0x52d   :  { %vm6647_vm1 = vmand %vm4292_vm0, %vm4309_vm2 }
 0x52e   :  { %v7422_v15 = vsel %vm6647_vm1, 4294967295, %v7421_v15  ;;  %vm6655_vm15 = vmand %vm4293_vm8, %vm4310_vm9  ;;  %vm4296_vm9 = vcmp.ge.s32.totalorder %v6664_v17, %v6508_v50 }
 0x52f   :  { %5748 = vmatpush3.bf16.msk.msra.mxu1 %vm5747_vm12, %v5935_v61  ;;  %v7424_v16 = vsel %vm6655_vm15, 4294967295, %v7423_v16  ;;  %vm4295_vm12 = vcmp.ge.s32.totalorder %v6631_v13, %v6508_v50  ;;  %vm5753_vm0 = vmpackc.low %vm6655_vm15, %vm6647_vm1  ;;  %vm4313_vm15 = vcmp.lt.s32.totalorder %v6664_v17, %v6523_v3  ;;  %vm4297_vm1 = vcmp.ge.s32.totalorder %v6671_v18, %v6508_v50 }
 0x530   :  { %5749 = vmatprep.subr.bf16.mxu1 %v5934_v52  ;;  %vm6674_vm8 = vmand %vm4294_vm3, %vm4311_vm10 }
 0x531   :  { %vm6679_vm2 = vmand %vm4295_vm12, %vm4312_vm4  ;;  %v4343_v12 = vsel %vm6674_vm8, 1.0, %v5898_v2 }
 0x532   :  { %v7428_v20 = vsel %vm6679_vm2, 4294967295, %v7427_v20  ;;  %vm5756_vm4 = vmpackc.low %vm6679_vm2, %vm6674_vm8  ;;  %vm4178_vm2 = vcmp.lt.s32.totalorder %v6120_v5, 126 }
 0x533   :  { %5751 = vmatpush3.bf16.msk.msra.mxu1 %vm5750_vm5, %v5935_v61  ;;  %vm4314_vm5 = vcmp.lt.s32.totalorder %v6671_v18, %v6523_v3  ;;  %vm6697_vm3 = vmand %vm4296_vm9, %vm4313_vm15  ;;  %vm4158_vm15 = vcmp.lt.s32.totalorder %v6120_v5, 16 }
 0x534   :  { %5752 = vmatprep.subr.bf16.mxu1 %v5934_v52  ;;  %v7430_v21 = vsel %vm6697_vm3, 4294967295, %v7429_v21  ;;  %vm6701_vm10 = vmand %vm4297_vm1, %vm4314_vm5  ;;  %vm4160_vm1 = vcmp.lt.s32.totalorder %v6120_v5, 37  ;;  %vm4163_vm5 = vcmp.lt.s32.totalorder %v6120_v5, 58 }
 0x535   :  { %v7432_v22 = vsel %vm6701_vm10, 4294967295, %v7431_v22  ;;  %vm5759_vm12 = vmpackc.low %vm6701_vm10, %vm6697_vm3  ;;  %vm4166_vm3 = vcmp.lt.s32.totalorder %v6120_v5, 79 }
 0x537   :  { %5754 = vmatpush3.bf16.msk.msra.mxu1 %vm5753_vm0, %v5935_v61  ;;  %vm7433_vm0 = vcmp.ge.s32.totalorder %v6120_v5, 21 }
 0x538   :  { %5755 = vmatprep.subr.bf16.mxu1 %v5934_v52  ;;  %vm4161_vm9 = vmand %vm7433_vm0, %vm4160_vm1 }
 0x53b   :  { %5757 = vmatpush3.bf16.msk.msra.mxu1 %vm5756_vm4, %v5935_v61  ;;  %vm6719_vm4 = vmor %vm4158_vm15, %vm4161_vm9  ;;  %vm7439_vm15 = vcmp.ge.s32.totalorder %v6120_v5, 63  ;;  %vm4169_vm9 = vcmp.lt.s32.totalorder %v6120_v5, 100 }
 0x53c   :  { %5758 = vmatprep.subr.bf16.mxu1 %v5934_v52  ;;  %vm4167_vm0 = vmand %vm7439_vm15, %vm4166_vm3 }
 0x53f   :  { %5760 = vmatpush3.bf16.msk.msra.mxu1 %vm5759_vm12, %v5935_v61  ;;  %vm7436_vm12 = vcmp.ge.s32.totalorder %v6120_v5, 42 }
 0x540   :  { %5761 = vmatprep.subr.bf16.mxu1 %v5934_v52  ;;  %vm6725_vm10 = vmand %vm7436_vm12, %vm4163_vm5  ;;  %vm4172_vm12 = vcmp.lt.s32.totalorder %v6120_v5, 121 }
 0x541   :  { %vm4165_vm1 = vmor %vm6719_vm4, %vm6725_vm10  ;;  %vm7442_vm10 = vcmp.ge.s32.totalorder %v6120_v5, 84 }
 0x542   :  { %vm6737_vm5 = vmor %vm4165_vm1, %vm4167_vm0  ;;  %vm7443_vm1 = vcmp.ge.s32.totalorder %v6120_v5, 105 }
 0x543   :  { %vm4170_vm4 = vmand %vm7442_vm10, %vm4169_vm9  ;;  %vm7444_vm9 = vcmp.ge.s32.totalorder %v6120_v5, 126 }
 0x544   :  { %vm4171_vm3 = vmor %vm6737_vm5, %vm4170_vm4 }
 0x545   :  { %vm4173_vm15 = vmand %vm7443_vm1, %vm4172_vm12  ;;  %vm7445_vm12 = vcmask 64512  }
 0x546   :  { %vm4174_vm0 = vmor %vm4171_vm3, %vm4173_vm15 }
 0x547   :  { %vm4177_vm10 = vmor %vm4174_vm0, %vm7444_vm9 }
 0x548   :  { %vm4179_vm5 = vmand %vm4177_vm10, %vm4178_vm2 }
 0x549   :  { %v6502_v47 = vpop.f32.mrb[2].mxu1 }
 0x54a   :  { %v5542_v48 = vpop.f32.mrb[3].mxu1 }
 0x5d8   :  { %v2948_v24 = vpop.f32.mrb[4].mxu0 }
 0x5d9   :  { %v3021_v23 = vadd.f32 %v6502_v47, %v2948_v24  ;;  %v5537_v25 = vpop.f32.mrb[5].mxu0 }
 0x5dc   :  { %v3100_v26 = vpop.f32.mrb[6].mxu0 }
 0x5dd   :  { %v3104_v27 = vadd.f32 %v3100_v26, %v3021_v23  ;;  %v5547_v28 = vpop.f32.mrb[7].mxu0 }
 0x5e0   :  { %v3181_v29 = vpop.f32.mrb[4].mxu1  ;;  %v3262_v30 = vpop.f32.mrb[8].mxu0 }
 0x5e1   :  { %v3185_v32 = vadd.f32 %v3181_v29, %v3104_v27  ;;  %v5552_v33 = vpop.f32.mrb[5].mxu1  ;;  %v5557_v34 = vpop.f32.mrb[9].mxu0 }
 0x5e3   :  { %v3266_v36 = vadd.f32 %v3262_v30, %v3185_v32 }
 0x5e4   :  { %v3343_v37 = vpop.f32.mrb[6].mxu1  ;;  %v3424_v38 = vpop.f32.mrb[10].mxu0 }
 0x5e5   :  { %v3347_v39 = vadd.f32 %v3343_v37, %v3266_v36  ;;  %v5562_v40 = vpop.f32.mrb[7].mxu1  ;;  %v5567_v41 = vpop.f32.mrb[11].mxu0 }
 0x5e6   :  { %v4182_v41 = vpop.permute.xlu1 %4181 }
 0x5e7   :  { %v3428_v6 = vadd.f32 %v3424_v38, %v3347_v39 }
 0x5e8   :  { %v3505_v42 = vpop.f32.mrb[8].mxu1  ;;  %v3586_v43 = vpop.f32.mrb[12].mxu0 }
 0x5e9   :  { %v3509_v45 = vadd.f32 %v3505_v42, %v3428_v6  ;;  %v5572_v46 = vpop.f32.mrb[9].mxu1  ;;  %v5577_v47 = vpop.f32.mrb[13].mxu0 }
 0x5ea   :  { %v6760_v46 = vadd.s32 112, %v6505_v49  ;;  %v6763_v47 = vadd.s32 120, %v6505_v49 }
 0x5eb   :  { %v3590_v48 = vadd.f32 %v3586_v43, %v3509_v45  ;;  %v6752_v43 = vsel %vm4179_vm5, 1, %v5928_v8  ;;  %vm7450_vm5 = vmmov %vm7445_vm12 }
 0x5ec   :  { %v3667_v51 = vpop.f32.mrb[10].mxu1  ;;  %v3748_v24 = vpop.f32.mrb[14].mxu0  ;;  %vm7339_vm4 = vcmp.eq.s32.totalorder %v6752_v43, 1  ;;  %vm4298_vm2 = vcmp.ge.s32.totalorder %v6760_v46, %v6508_v50  ;;  %vm4299_vm3 = vcmp.ge.s32.totalorder %v6763_v47, %v6508_v50  ;;  %vm4315_vm1 = vcmp.lt.s32.totalorder %v6760_v46, %v6523_v3 }
 0x5ed   :  { %v3671_v23 = vadd.f32 %v3667_v51, %v3590_v48  ;;  %v5582_v25 = vpop.f32.mrb[11].mxu1  ;;  %v5587_v26 = vpop.f32.mrb[15].mxu0  ;;  %vm4316_vm15 = vcmp.lt.s32.totalorder %v6763_v47, %v6523_v3  ;;  %vm6773_vm0 = vmand %vm4298_vm2, %vm4315_vm1  ;;  %vm7453_vm1 = vnez %v7414_v7 }
 0x5ee   :  { %vm6777_vm9 = vmand %vm4299_vm3, %vm4316_vm15  ;;  %v4191_v50 = vpop.permute.xlu0 %4190  ;;  %v4333_v25 = vsel %vm6540_vm7, 1.0, %v5898_v2  ;;  %v4337_v59 = vsel %vm7453_vm1, 1.0, %v5898_v2  ;;  %v4347_v19 = vsel %vm6773_vm0, 1.0, %v5898_v2 }
 0x5ef   :  { %v3752_v27 = vadd.f32 %v3748_v24, %v3671_v23  ;;  %vm5762_vm10 = vmpackc.low %vm6777_vm9, %vm6773_vm0 }
 0x5f0   :  { %v3829_v28 = vpop.f32.mrb[12].mxu1  ;;  %v3910_v29 = vpop.f32.mrb[16].mxu0  ;;  %5763 = vmatpush3.bf16.msk.msra.mxu1 %vm5762_vm10, %v5935_v61  ;;  %vm7451_vm7 = vmmov %vm7450_vm5 }
 0x5f1   :  { %v3833_v30 = vadd.f32 %v3829_v28, %v3752_v27  ;;  %v5592_v31 = vpop.f32.mrb[13].mxu1  ;;  %v5597_v32 = vpop.f32.mrb[17].mxu0  ;;  %vm7452_vm3 = vmmov %vm7450_vm5 }
 0x5f2   :  { %v4334_v32 = vsel %vm6548_vm14, 1.0, %v5898_v2  ;;  %vm7454_vm14 = vmmov %vm7452_vm3 }
 0x5f3   :  { %v3914_v33 = vadd.f32 %v3910_v29, %v3833_v30  ;;  %vm7455_vm15 = vmmov %vm7452_vm3 }
 0x5f4   :  { %v3991_v34 = vpop.f32.mrb[14].mxu1  ;;  %v4072_v35 = vpop.f32.mrb[18].mxu0  ;;  %vm7457_vm10 = vmmov %vm7452_vm3 }
 0x5f5   :  { %v3995_v36 = vadd.f32 %v3991_v34, %v3914_v33  ;;  %v5602_v37 = vpop.f32.mrb[15].mxu1  ;;  %v5607_v38 = vpop.f32.mrb[19].mxu0  ;;  %v4336_v33 = vsel %vm6579_vm11, 1.0, %v5898_v2  ;;  %v4339_v34 = vsel %vm6622_vm13, 1.0, %v5898_v2  ;;  %vm7459_vm11 = vnez %v7420_v14 }
 0x5f6   :  { %v4340_v0 = vsel %vm7459_vm11, 1.0, %v5898_v2 }
 0x5f7   :  { %v4076_v39 = vadd.f32 %v4072_v35, %v3995_v36  ;;  %v5936_v35 = vmov 1.0  }
 0x5f8   :  { %v4153_v40 = vpop.f32.mrb[16].mxu1 }
 0x5f9   :  { %v4157_v6 = vadd.f32 %v4153_v40, %v4076_v39  ;;  %v5612_v42 = vpop.f32.mrb[17].mxu1 }
 0x5fb   :  { %v4184_v44 = vadd.f32 %v4182_v41, %v4157_v6 }
 0x5fd   :  { %v4185_v45 = vmax.f32 %v4184_v44, 0.0 }
 0x5ff   :  { %5614 = vmatpush3.msk.msra.mxu0 %vm7339_vm4, %v4185_v45 }
 0x600   :  { %5616 = vmatmul.mubr.msk.f32.vlgmr.msra.gmra.mrb[20].mxu0 %vm7445_vm12, %v6514_v53 }
 0x601   :  { %5655 = vmatprep.mubr.msk.f32.mxu0 %vm7450_vm5, %v4333_v25  ;;  %vm7458_vm5 = vmmov %vm7452_vm3  ;;  %v6887_v25 = vsub.s32 %v6526_v55, %v6120_v5  ;;  %v7490_v55 = vmov 0 }
 0x6d3   :  { %v4261_v48 = vpop.f32.mrb[20].mxu0 }
 0x6d4   :  { %v6786_v51 = vadd.f32 %v4261_v48, %v4191_v50  ;;  %v5617_v3 = vpop.f32.mrb[21].mxu0 }
 0x6d6   :  { %v4265_v24 = vsel %vm7339_vm4, %v6786_v51, 0.0 }
 0x6d7   :  { %v4355_v23 = vmul.f32 %v4265_v24, %v4265_v24  ;;  %v6879_v24 = vsub.s32 %v6518_v54, %v6120_v5  ;;  %v6913_v54 = vsub.s32 %v6576_v63, %v6120_v5  ;;  %v7496_v63 = vmov 0 }
 0x6d9   :  { %5651 = vmatmul.mubr.f32.vlgmr.msra.gmra.mrb[18].mxu1 %v4355_v23  ;;  %v6883_v23 = vsub.s32 %v6505_v49, %v6120_v5 }
 0x6db   :  { %vm5011_vm4 = vcmp.eq.s32.totalorder %v6883_v23, 4294967233 }
 0x7ac   :  { %v4422_v26 = vpop.f32.mrb[18].mxu1 }
 0x7ad   :  { %5891 = vrsqrt.f32 %v4422_v26  ;;  %v5652_v61 = vpop.f32.mrb[19].mxu1  ;;  %vm4428_vm12 = vcmp.eq.f32.partialorder %v4422_v26, inf  ;;  %v4431_v29 = vand.u32 2147483648, %v4422_v26  ;;  %vm4430_vm2 = vcmp.eq.f32.partialorder %v4422_v26, 0.0 }
 0x7ae   :  { %v6952_v61 = vsub.s32 %v6592_v1, %v6120_v5  ;;  %v7499_v1 = vmov 0 }
 0x7b7   :  { %v5892_v27 = vpop.eup %5891 }
 0x7b8   :  { %v4427_v28 = vmul.f32 %v5892_v27, %v4422_v26  ;;  %v6958_v27 = vsub.s32 %v6564_v60, %v6120_v5  ;;  %v7502_v60 = vmov 0 }
 0x7ba   :  { %v4429_v30 = vsel %vm4428_vm12, %v4422_v26, %v4427_v28  ;;  %vm7460_vm12 = vnez %v7422_v15  ;;  %v6893_v26 = vsub.s32 %v6529_v56, %v6120_v5  ;;  %v6923_v56 = vsub.s32 %v6538_v57, %v6120_v5 }
 0x7bb   :  { %v4432_v31 = vsel %vm4430_vm2, %v4431_v29, %v4429_v30  ;;  %v4341_v7 = vsel %vm7460_vm12, 1.0, %v5898_v2  ;;  %vm7461_vm2 = vmmov %vm7452_vm3  ;;  %v7494_v57 = vmov 0  ;;  %v6963_v28 = vsub.s32 %v6603_v9, %v6120_v5 }
 0x7bc   :  { %5653 = vmatprep.subr.mxu0 %v4432_v31  ;;  %vm7464_vm13 = vmmov %vm7461_vm2  ;;  %v7504_v9 = vmov 0  ;;  %v7506_v29 = vmov 0  ;;  %v7509_v30 = vmov 0 }
 0x7bd   :  { %5654 = vmatpush3.msra.mxu0 %v4432_v31  ;;  %vm7465_vm1 = vmmov %vm7461_vm2  ;;  %v7511_v31 = vmov 0 }
 0x7be   :  { %5656 = vmatmul.mubr.msk.f32.vlgmr.msra.gmra.mrb[22].mxu0 %vm7451_vm7, %v4334_v32  ;;  %5764 = vmatprep.subr.bf16.mxu0 %v5934_v52  ;;  %vm7462_vm7 = vmmov %vm7461_vm2  ;;  %v7514_v32 = vmov 0 }
 0x7bf   :  { %5658 = vmatprep.mubr.msk.f32.mxu0 %vm7452_vm3, %v4335_v58  ;;  %vm7463_vm3 = vnez %v7424_v16  ;;  %vm7468_vm6 = vmmov %vm7465_vm1  ;;  %v7517_v58 = vmov 0 }
 0x7c0   :  { %v4342_v10 = vsel %vm7463_vm3, 1.0, %v5898_v2  ;;  %vm7471_vm8 = vmmov %vm7465_vm1 }
 0x7c1   :  { %vm7472_vm11 = vmmov %vm7465_vm1 }
 0x7c2   :  { %5659 = vmatmul.mubr.msk.f32.gmra.mrb[24].mxu0 %vm7454_vm14, %v4336_v33  ;;  %vm7466_vm14 = vnez %v7428_v20  ;;  %v4348_v20 = vsel %vm6777_vm9, 1.0, %v5898_v2  ;;  %vm7473_vm12 = vmmov %vm7465_vm1  ;;  %v7520_v33 = vmov 0 }
 0x7c3   :  { %5661 = vmatprep.mubr.msk.f32.mxu0 %vm7455_vm15, %v4337_v59  ;;  %v4344_v14 = vsel %vm7466_vm14, 1.0, %v5898_v2  ;;  %vm7467_vm15 = vnez %v7430_v21  ;;  %v4349_v21 = vmul.u32 21, %v6505_v49  ;;  %vm7476_vm9 = vmmov %vm7465_vm1  ;;  %v6906_v49 = vsub.s32 %v6557_v4, %v6120_v5 }
 0x7c4   :  { %v4345_v15 = vsel %vm7467_vm15, 1.0, %v5898_v2  ;;  %vm7477_vm14 = vmmov %vm7465_vm1  ;;  %v7492_v4 = vmov 0  ;;  %v7035_v59 = vsub.s32 %v6620_v11, %v6120_v5  ;;  %v7051_v11 = vsub.s32 %v6631_v13, %v6120_v5 }
 0x7c5   :  { %vm7478_vm15 = vmmov %vm7465_vm1  ;;  %v7532_v13 = vmov 0 }
 0x7c6   :  { %5662 = vmatmul.mubr.msk.f32.gmra.mrb[26].mxu0 %vm7457_vm10, %v4338_v62  ;;  %vm7469_vm10 = vmmov %vm7465_vm1  ;;  %v7040_v62 = vsub.s32 %v6671_v18, %v6120_v5  ;;  %v7529_v18 = vmov 0 }
 0x7c7   :  { %5664 = vmatprep.mubr.msk.f32.mxu0 %vm7458_vm5, %v4339_v34  ;;  %vm7470_vm5 = vnez %v7432_v22  ;;  %v4351_v22 = vadd.s32 21, %v4349_v21  ;;  %v7523_v34 = vmov 0 }
 0x7c8   :  { %v4346_v16 = vsel %vm7470_vm5, 1.0, %v5898_v2  ;;  %vm7481_vm5 = vmmov %vm7465_vm1 }
 0x7c9   :  { %vm4352_vm0 = vcmp.lt.s32.totalorder %v6120_v5, %v4351_v22 }
 0x7ca   :  { %5665 = vmatmul.mubr.msk.f32.gmra.mrb[28].mxu0 %vm7461_vm2, %v4340_v0  ;;  %vm7474_vm2 = vmmov 0   ;;  %v7526_v0 = vmov 0 }
 0x7cb   :  { %5667 = vmatprep.mubr.msk.f32.mxu0 %vm7462_vm7, %v4341_v7  ;;  %vm4350_vm7 = vcmp.ge.s32.totalorder %v6120_v5, %v4349_v21  ;;  %v7534_v7 = vmov 0 }
 0x7cc   :  { %vm4353_vm3 = vmand %vm4350_vm7, %vm4352_vm0 }
 0x7cd   :  { %5679 = vmatprep.subr.msk.mxu1 %vm4353_vm3, %v5936_v35  ;;  %vm7486_vm7 = vmmov %vm7465_vm1 }
 0x7ce   :  { %5668 = vmatmul.mubr.msk.f32.gmra.mrb[30].mxu0 %vm7464_vm13, %v4342_v10  ;;  %5680 = vmatpush3.msk.msra.mxu1 %vm4353_vm3, %v5936_v35  ;;  %vm7475_vm13 = vmmov %vm7465_vm1  ;;  %v7537_v10 = vmov 0 }
 0x7cf   :  { %5670 = vmatprep.mubr.msk.f32.mxu0 %vm7465_vm1, %v4343_v12  ;;  %vm7487_vm0 = vmmov %vm7465_vm1  ;;  %v7539_v12 = vmov 0 }
 0x7d0   :  { %vm7488_vm3 = vmmov %vm7487_vm0 }
 0x7d2   :  { %5671 = vmatmul.mubr.msk.f32.gmra.mrb[32].mxu0 %vm7468_vm6, %v4344_v14  ;;  %vm7479_vm6 = vmmov %vm7465_vm1  ;;  %v7541_v14 = vmov 0 }
 0x7d3   :  { %5673 = vmatprep.mubr.msk.f32.mxu0 %vm7469_vm10, %v4345_v15  ;;  %vm7480_vm10 = vmmov %vm7465_vm1  ;;  %v7544_v15 = vmov 0 }
 0x7d6   :  { %5674 = vmatmul.mubr.msk.f32.gmra.mrb[34].mxu0 %vm7471_vm8, %v4346_v16  ;;  %vm7482_vm8 = vmmov %vm7465_vm1  ;;  %v7547_v16 = vmov 0 }
 0x7d7   :  { %5676 = vmatprep.mubr.msk.f32.mxu0 %vm7472_vm11, %v4347_v19  ;;  %vm7483_vm11 = vmmov %vm7465_vm1 }
 0x7da   :  { %5677 = vmatmul.mubr.msk.f32.gmra.mrb[36].mxu0 %vm7473_vm12, %v4348_v20  ;;  %vm7484_vm12 = vmmov %vm7465_vm1 }
 0x7db   :  { %5737 = vmatprep.mubr.msk.f32.mxu0 %vm7474_vm2, %v5898_v2  ;;  %vm7485_vm2 = vmmov %vm7465_vm1 }
 0x891   :  { %v5657_v36 = vpop.f32.mrb[22].mxu0 }
 0x892   :  { %v4547_v37 = vpop.f32.mrb[23].mxu0 }
 0x893   :  { %5681 = vmatprep.mubr.msk.f32.mxu1 %vm7475_vm13, %v4547_v37  ;;  %vm7489_vm13 = vmmov %vm7487_vm0 }
 0x894   :  { %5682 = vmatmul.mubr.msk.f32.vlgmr.msra.gmra.mrb[20].mxu1 %vm7476_vm9, %v5657_v36  ;;  %vm4836_vm9 = vcmp.eq.s32.totalorder %v6879_v24, 0 }
 0x895   :  { %v5660_v38 = vpop.f32.mrb[24].mxu0 }
 0x896   :  { %v4557_v39 = vpop.f32.mrb[25].mxu0 }
 0x897   :  { %5684 = vmatprep.mubr.msk.f32.mxu1 %vm7465_vm1, %v4557_v39  ;;  %vm4884_vm1 = vcmp.eq.s32.totalorder %v6879_v24, 4294967275 }
 0x898   :  { %5685 = vmatmul.mubr.msk.f32.gmra.mrb[22].mxu1 %vm7477_vm14, %v5660_v38  ;;  %vm4835_vm14 = vcmp.eq.s32.totalorder %v6883_v23, 0  ;;  %v7143_v38 = vsub.s32 %v6664_v17, %v6120_v5 }
 0x899   :  { %v5663_v2 = vpop.f32.mrb[26].mxu0 }
 0x89a   :  { %v4567_v40 = vpop.f32.mrb[27].mxu0 }
 0x89b   :  { %5687 = vmatprep.mubr.msk.f32.mxu1 %vm7478_vm15, %v4567_v40  ;;  %vm4883_vm15 = vcmp.eq.s32.totalorder %v6883_v23, 4294967275 }
 0x89c   :  { %5688 = vmatmul.mubr.msk.f32.gmra.mrb[24].mxu1 %vm7479_vm6, %v5663_v2  ;;  %vm4900_vm6 = vmor %vm4836_vm9, %vm4884_vm1  ;;  %vm5012_vm9 = vcmp.eq.s32.totalorder %v6879_v24, 4294967233  ;;  %v7559_v2 = vmov 0 }
 0x89d   :  { %v5666_v41 = vpop.f32.mrb[28].mxu0 }
 0x89e   :  { %v4577_v6 = vpop.f32.mrb[29].mxu0 }
 0x89f   :  { %5690 = vmatprep.mubr.msk.f32.mxu1 %vm7480_vm10, %v4577_v6  ;;  %vm4948_vm10 = vcmp.eq.s32.totalorder %v6879_v24, 4294967254 }
 0x8a0   :  { %5691 = vmatmul.mubr.msk.f32.gmra.mrb[26].mxu1 %vm7481_vm5, %v5666_v41  ;;  %vm4837_vm5 = vcmp.eq.s32.totalorder %v6887_v25, 0  ;;  %v7159_v41 = vsub.s32 %v6763_v47, %v6120_v5 }
 0x8a1   :  { %v5669_v42 = vpop.f32.mrb[30].mxu0 }
 0x8a2   :  { %v4587_v44 = vpop.f32.mrb[31].mxu0 }
 0x8a3   :  { %5693 = vmatprep.mubr.msk.f32.mxu1 %vm7482_vm8, %v4587_v44  ;;  %vm4853_vm8 = vcmp.eq.s32.totalorder %v6887_v25, 21 }
 0x8a4   :  { %5694 = vmatmul.mubr.msk.f32.gmra.mrb[28].mxu1 %vm7483_vm11, %v5669_v42  ;;  %vm4899_vm11 = vmor %vm4835_vm14, %vm4883_vm15  ;;  %vm4886_vm15 = vcmp.eq.s32.totalorder %v6893_v26, 4294967275 }
 0x8a5   :  { %v5672_v45 = vpop.f32.mrb[32].mxu0 }
 0x8a6   :  { %v4597_v8 = vpop.f32.mrb[33].mxu0 }
 0x8a7   :  { %5696 = vmatprep.mubr.msk.f32.mxu1 %vm7484_vm12, %v4597_v8  ;;  %vm4947_vm12 = vcmp.eq.s32.totalorder %v6883_v23, 4294967254 }
 0x8a8   :  { %5697 = vmatmul.mubr.msk.f32.gmra.mrb[30].mxu1 %vm7485_vm2, %v5672_v45  ;;  %vm4964_vm2 = vmor %vm4900_vm6, %vm4948_vm10  ;;  %vm4949_vm10 = vcmp.eq.s32.totalorder %v6887_v25, 4294967254  ;;  %v7568_v45 = vmov 0 }
 0x8a9   :  { %v5675_v53 = vpop.f32.mrb[34].mxu0  ;;  %vm4963_vm1 = vmor %vm4899_vm11, %vm4947_vm12  ;;  %vm5075_vm11 = vcmp.eq.s32.totalorder %v6883_v23, 4294967212 }
 0x8aa   :  { %v4607_v50 = vpop.f32.mrb[35].mxu0 }
 0x8ab   :  { %5699 = vmatprep.mubr.msk.f32.mxu1 %vm7486_vm7, %v4607_v50  ;;  %vm4838_vm7 = vcmp.eq.s32.totalorder %v6893_v26, 0  ;;  %v7573_v50 = vmov 0 }
 0x8ac   :  { %5700 = vmatmul.mubr.msk.f32.gmra.mrb[32].mxu1 %vm7487_vm0, %v5675_v53  ;;  %vm4854_vm0 = vcmp.eq.s32.totalorder %v6893_v26, 21 }
 0x8ad   :  { %v5678_v48 = vpop.f32.mrb[36].mxu0  ;;  %vm4870_vm14 = vmor %vm4838_vm7, %vm4854_vm0  ;;  %vm4950_vm7 = vcmp.eq.s32.totalorder %v6893_v26, 4294967254  ;;  %vm4840_vm0 = vcmp.eq.s32.totalorder %v6906_v49, 0 }
 0x8ae   :  { %v4617_v3 = vpop.f32.mrb[37].mxu0  ;;  %vm4902_vm12 = vmor %vm4870_vm14, %vm4886_vm15  ;;  %vm4888_vm15 = vcmp.eq.s32.totalorder %v6906_v49, 4294967275 }
 0x8af   :  { %5702 = vmatprep.mubr.msk.f32.mxu1 %vm7488_vm3, %v4617_v3  ;;  %vm4869_vm3 = vmor %vm4837_vm5, %vm4853_vm8  ;;  %v7209_v3 = vsub.s32 %v6760_v46, %v6120_v5  ;;  %v7580_v5 = vmov 0 }
 0x8b0   :  { %5703 = vmatmul.mubr.msk.f32.gmra.mrb[34].mxu1 %vm7489_vm13, %v5678_v48  ;;  %vm4885_vm13 = vcmp.eq.s32.totalorder %v6887_v25, 4294967275  ;;  %vm6916_vm5 = vmor %vm4964_vm2, %vm5012_vm9  ;;  %vm5013_vm2 = vcmp.eq.s32.totalorder %v6887_v25, 4294967233 }
 0x8b1   :  { %vm4901_vm6 = vmor %vm4869_vm3, %vm4885_vm13  ;;  %v7491_v55 = vsel %vm6916_vm5, 4294967295, %v7490_v55  ;;  %vm4856_vm3 = vcmp.eq.s32.totalorder %v6906_v49, 21 }
 0x8b2   :  { %vm5027_vm8 = vmor %vm4963_vm1, %vm5011_vm4  ;;  %vm4842_vm4 = vcmp.eq.s32.totalorder %v6913_v54, 0  ;;  %vm4858_vm1 = vcmp.eq.s32.totalorder %v6913_v54, 21 }
 0x8b3   :  { %vm4965_vm13 = vmor %vm4901_vm6, %vm4949_vm10  ;;  %vm4839_vm10 = vcmp.eq.s32.totalorder %v6923_v56, 0 }
 0x8b4   :  { %vm6929_vm9 = vmor %vm5027_vm8, %vm5075_vm11  ;;  %vm4855_vm8 = vcmp.eq.s32.totalorder %v6923_v56, 21 }
 0x8b5   :  { %v7493_v4 = vsel %vm6929_vm9, 4294967295, %v7492_v4  ;;  %vm6935_vm5 = vmor %vm4902_vm12, %vm4950_vm7  ;;  %vm4890_vm9 = vcmp.eq.s32.totalorder %v6913_v54, 4294967275  ;;  %vm4920_vm12 = vcmp.eq.s32.totalorder %v6906_v49, 42 }
 0x8b6   :  { %v7495_v57 = vsel %vm6935_vm5, 4294967295, %v7494_v57  ;;  %vm4872_vm14 = vmor %vm4840_vm0, %vm4856_vm3  ;;  %vm5076_vm5 = vcmp.eq.s32.totalorder %v6879_v24, 4294967212  ;;  %vm4887_vm3 = vcmp.eq.s32.totalorder %v6923_v56, 4294967275 }
 0x8b7   :  { %vm6940_vm6 = vmor %vm4965_vm13, %vm5013_vm2  ;;  %vm5139_vm13 = vcmp.eq.s32.totalorder %v6883_v23, 4294967191 }
 0x8b8   :  { %v7497_v63 = vsel %vm6940_vm6, 4294967295, %v7496_v63  ;;  %vm4874_vm11 = vmor %vm4842_vm4, %vm4858_vm1  ;;  %vm4922_vm6 = vcmp.eq.s32.totalorder %v6913_v54, 42  ;;  %vm4952_vm1 = vcmp.eq.s32.totalorder %v6906_v49, 4294967254 }
 0x8b9   :  { %vm4904_vm7 = vmor %vm4872_vm14, %vm4888_vm15  ;;  %vm7498_vm14 = vnez %v7491_v55 }
 0x8ba   :  { %vm4871_vm0 = vmor %vm4839_vm10, %vm4855_vm8  ;;  %vm4951_vm10 = vcmp.eq.s32.totalorder %v6923_v56, 4294967254  ;;  %vm7501_vm8 = vnez %v7493_v4 }
 0x8bb   :  { %vm4906_vm2 = vmor %vm4874_vm11, %vm4890_vm9 }
 0x8bc   :  { %vm4936_vm4 = vmor %vm4904_vm7, %vm4920_vm12  ;;  %vm5014_vm7 = vcmp.eq.s32.totalorder %v6893_v26, 4294967233 }
 0x8bd   :  { %vm6967_vm15 = vmor %vm7498_vm14, %vm5076_vm5  ;;  %vm4954_vm5 = vcmp.eq.s32.totalorder %v6913_v54, 4294967254  ;;  %vm5077_vm14 = vcmp.eq.s32.totalorder %v6887_v25, 4294967212 }
 0x8be   :  { %v7500_v1 = vsel %vm6967_vm15, 4294967295, %v7499_v1  ;;  %vm4903_vm9 = vmor %vm4871_vm0, %vm4887_vm3  ;;  %vm4843_vm0 = vcmp.eq.s32.totalorder %v6952_v61, 0  ;;  %vm4859_vm3 = vcmp.eq.s32.totalorder %v6952_v61, 21 }
 0x8bf   :  { %vm6974_vm11 = vmor %vm7501_vm8, %vm5139_vm13  ;;  %vm4841_vm13 = vcmp.eq.s32.totalorder %v6958_v27, 0 }
 0x8c0   :  { %v7503_v60 = vsel %vm6974_vm11, 4294967295, %v7502_v60  ;;  %vm4938_vm12 = vmor %vm4906_vm2, %vm4922_vm6  ;;  %vm4857_vm6 = vcmp.eq.s32.totalorder %v6958_v27, 21  ;;  %vm7508_vm2 = vnez %v7495_v57 }
 0x8c1   :  { %vm6981_vm15 = vmor %vm4936_vm4, %vm4952_vm1  ;;  %vm4844_vm1 = vcmp.eq.s32.totalorder %v6963_v28, 0 }
 0x8c2   :  { %v7505_v9 = vsel %vm6981_vm15, 4294967295, %v7504_v9  ;;  %vm6987_vm8 = vmor %vm4903_vm9, %vm4951_vm10  ;;  %vm4860_vm9 = vcmp.eq.s32.totalorder %v6963_v28, 21  ;;  %vm7513_vm10 = vnez %v7497_v63  ;;  %vm5016_vm15 = vcmp.eq.s32.totalorder %v6906_v49, 4294967233 }
 0x8c3   :  { %v7507_v29 = vsel %vm6987_vm8, 4294967295, %v7506_v29  ;;  %vm6995_vm11 = vmor %vm7508_vm2, %vm5014_vm7  ;;  %vm4891_vm2 = vcmp.eq.s32.totalorder %v6952_v61, 4294967275 }
 0x8c4   :  { %v7510_v30 = vsel %vm6995_vm11, 4294967295, %v7509_v30  ;;  %vm6999_vm4 = vmor %vm4938_vm12, %vm4954_vm5  ;;  %vm5015_vm12 = vcmp.eq.s32.totalorder %v6923_v56, 4294967233  ;;  %vm4889_vm11 = vcmp.eq.s32.totalorder %v6958_v27, 4294967275 }
 0x8c5   :  { %v7512_v31 = vsel %vm6999_vm4, 4294967295, %v7511_v31  ;;  %vm7007_vm8 = vmor %vm7513_vm10, %vm5077_vm14  ;;  %vm4892_vm10 = vcmp.eq.s32.totalorder %v6963_v28, 4294967275  ;;  %vm5140_vm14 = vcmp.eq.s32.totalorder %v6879_v24, 4294967191 }
 0x8c6   :  { %v7515_v32 = vsel %vm7007_vm8, 4294967295, %v7514_v32  ;;  %vm4875_vm7 = vmor %vm4843_vm0, %vm4859_vm3  ;;  %vm7516_vm8 = vnez %v7505_v9 }
 0x8c7   :  { %vm4873_vm5 = vmor %vm4841_vm13, %vm4857_vm6  ;;  %vm4923_vm6 = vcmp.eq.s32.totalorder %v6952_v61, 42  ;;  %vm5203_vm13 = vcmp.eq.s32.totalorder %v6883_v23, 4294967170 }
 0x8c8   :  { %vm4876_vm4 = vmor %vm4844_vm1, %vm4860_vm9  ;;  %vm7519_vm1 = vnez %v7507_v29 }
 0x8c9   :  { %vm7019_vm0 = vmor %vm7516_vm8, %vm5016_vm15  ;;  %vm4986_vm8 = vcmp.eq.s32.totalorder %v6913_v54, 63 }
 0x8ca   :  { %v7518_v58 = vsel %vm7019_vm0, 4294967295, %v7517_v58  ;;  %vm4907_vm3 = vmor %vm4875_vm7, %vm4891_vm2  ;;  %vm4921_vm0 = vcmp.eq.s32.totalorder %v6958_v27, 42  ;;  %vm4924_vm2 = vcmp.eq.s32.totalorder %v6963_v28, 42 }
 0x8cb   :  { %vm7027_vm9 = vmor %vm7519_vm1, %vm5015_vm12  ;;  %vm7522_vm12 = vnez %v7500_v1 }
 0x8cc   :  { %v7521_v33 = vsel %vm7027_vm9, 4294967295, %v7520_v33  ;;  %vm4905_vm15 = vmor %vm4873_vm5, %vm4889_vm11  ;;  %vm4955_vm5 = vcmp.eq.s32.totalorder %v6952_v61, 4294967254  ;;  %vm5078_vm9 = vcmp.eq.s32.totalorder %v6893_v26, 4294967212 }
 0x8cd   :  { %vm4908_vm7 = vmor %vm4876_vm4, %vm4892_vm10  ;;  %vm7525_vm4 = vnez %v7503_v60 }
 0x8ce   :  { %vm7044_vm1 = vmor %vm7522_vm12, %vm5140_vm14  ;;  %vm7528_vm14 = vnez %v7512_v31 }
 0x8cf   :  { %v7524_v34 = vsel %vm7044_vm1, 4294967295, %v7523_v34  ;;  %vm4939_vm11 = vmor %vm4907_vm3, %vm4923_vm6  ;;  %vm4953_vm6 = vcmp.eq.s32.totalorder %v6958_v27, 4294967254  ;;  %vm5141_vm1 = vcmp.eq.s32.totalorder %v6887_v25, 4294967191 }
 0x8d0   :  { %vm7055_vm10 = vmor %vm7525_vm4, %vm5203_vm13  ;;  %vm4956_vm13 = vcmp.eq.s32.totalorder %v6963_v28, 4294967254 }
 0x8d1   :  { %v7527_v0 = vsel %vm7055_vm10, 4294967295, %v7526_v0  ;;  %vm7062_vm12 = vmor %vm7528_vm14, %vm4986_vm8  ;;  %vm4987_vm8 = vcmp.eq.s32.totalorder %v6952_v61, 63  ;;  %vm4845_vm14 = vcmp.eq.s32.totalorder %v7035_v59, 0 }
 0x8d2   :  { %v7530_v18 = vsel %vm7062_vm12, 4294967295, %v7529_v18  ;;  %vm4937_vm3 = vmor %vm4905_vm15, %vm4921_vm0  ;;  %vm4861_vm12 = vcmp.eq.s32.totalorder %v7035_v59, 21  ;;  %vm7531_vm0 = vnez %v7510_v30 }
 0x8d3   :  { %vm4940_vm4 = vmor %vm4908_vm7, %vm4924_vm2  ;;  %vm4848_vm7 = vcmp.eq.s32.totalorder %v7040_v62, 0 }
 0x8d4   :  { %vm4971_vm10 = vmor %vm4939_vm11, %vm4955_vm5  ;;  %vm4864_vm11 = vcmp.eq.s32.totalorder %v7040_v62, 21  ;;  %vm7536_vm5 = vnez %v7515_v32 }
 0x8d5   :  { %vm7074_vm15 = vmor %vm7531_vm0, %vm5078_vm9  ;;  %vm5080_vm9 = vcmp.eq.s32.totalorder %v6906_v49, 4294967212  ;;  %v7583_v49 = vmov 0 }
 0x8d6   :  { %v7533_v13 = vsel %vm7074_vm15, 4294967295, %v7532_v13  ;;  %vm7078_vm2 = vmor %vm4937_vm3, %vm4953_vm6  ;;  %vm4846_vm3 = vcmp.eq.s32.totalorder %v7051_v11, 0  ;;  %vm4862_vm6 = vcmp.eq.s32.totalorder %v7051_v11, 21 }
 0x8d7   :  { %v7535_v7 = vsel %vm7078_vm2, 4294967295, %v7534_v7  ;;  %vm7086_vm0 = vmor %vm7536_vm5, %vm5141_vm1  ;;  %vm5079_vm2 = vcmp.eq.s32.totalorder %v6923_v56, 4294967212  ;;  %v7586_v56 = vmov 0 }
 0x8d8   :  { %v7538_v10 = vsel %vm7086_vm0, 4294967295, %v7537_v10  ;;  %vm7091_vm15 = vmor %vm4940_vm4, %vm4956_vm13  ;;  %vm4893_vm0 = vcmp.eq.s32.totalorder %v7035_v59, 4294967275  ;;  %vm4896_vm13 = vcmp.eq.s32.totalorder %v7040_v62, 4294967275 }
 0x8d9   :  { %v7540_v12 = vsel %vm7091_vm15, 4294967295, %v7539_v12  ;;  %vm7098_vm1 = vmor %vm4971_vm10, %vm4987_vm8  ;;  %vm7543_vm15 = vnez %v7518_v58 }
 0x8da   :  { %v7542_v14 = vsel %vm7098_vm1, 4294967295, %v7541_v14  ;;  %vm4877_vm5 = vmor %vm4845_vm14, %vm4861_vm12  ;;  %vm4894_vm1 = vcmp.eq.s32.totalorder %v7051_v11, 4294967275  ;;  %vm7546_vm12 = vnez %v7521_v33 }
 0x8db   :  { %vm4880_vm4 = vmor %vm4848_vm7, %vm4864_vm11  ;;  %vm5018_vm7 = vcmp.eq.s32.totalorder %v6913_v54, 4294967233 }
 0x8dc   :  { %vm7106_vm8 = vmor %vm7543_vm15, %vm5080_vm9  ;;  %vm4925_vm9 = vcmp.eq.s32.totalorder %v7035_v59, 42  ;;  %vm5017_vm15 = vcmp.eq.s32.totalorder %v6958_v27, 4294967233 }
 0x8dd   :  { %v7545_v15 = vsel %vm7106_vm8, 4294967295, %v7544_v15  ;;  %vm4878_vm10 = vmor %vm4846_vm3, %vm4862_vm6  ;;  %vm4928_vm3 = vcmp.eq.s32.totalorder %v7040_v62, 42  ;;  %vm7549_vm6 = vnez %v7524_v34 }
 0x8de   :  { %vm7113_vm14 = vmor %vm7546_vm12, %vm5079_vm2  ;;  %vm4926_vm12 = vcmp.eq.s32.totalorder %v7051_v11, 42 }
 0x8df   :  { %v7548_v16 = vsel %vm7113_vm14, 4294967295, %v7547_v16  ;;  %vm4909_vm11 = vmor %vm4877_vm5, %vm4893_vm0  ;;  %vm7552_vm0 = vnez %v7527_v0  ;;  %vm7553_vm5 = vnez %v7530_v18 }
 0x8e0   :  { %vm4912_vm8 = vmor %vm4880_vm4, %vm4896_vm13  ;;  %vm7558_vm13 = vnez %v7535_v7 }
 0x8e1   :  { %vm7123_vm2 = vmor %vm4878_vm10, %vm4894_vm1  ;;  %vm4957_vm1 = vcmp.eq.s32.totalorder %v7035_v59, 4294967254 }
 0x8e2   :  { %vm7132_vm14 = vmor %vm7553_vm5, %vm5018_vm7  ;;  %vm4988_vm7 = vcmp.eq.s32.totalorder %v6963_v28, 63  ;;  %vm7563_vm5 = vnez %v7533_v13 }
 0x8e3   :  { %vm7136_vm4 = vmor %vm4909_vm11, %vm4925_vm9  ;;  %vm4992_vm11 = vcmp.eq.s32.totalorder %v7040_v62, 63  ;;  %vm5019_vm9 = vcmp.eq.s32.totalorder %v6952_v61, 4294967233 }
 0x8e4   :  { %vm7147_vm10 = vmor %vm7558_vm13, %vm5017_vm15  ;;  %vm7566_vm13 = vnez %v7538_v10 }
 0x8e5   :  { %v7560_v2 = vsel %vm7147_vm10, 4294967295, %v7559_v2  ;;  %vm4942_vm15 = vmor %vm7123_vm2, %vm4926_vm12  ;;  %vm7567_vm2 = vnez %v7540_v12 }
 0x8e6   :  { %vm7183_vm12 = vmor %vm7567_vm2, %vm4988_vm7  ;;  %vm5054_vm7 = vcmp.eq.s32.totalorder %v7051_v11, 84  ;;  %vm7579_vm2 = vnez %v7545_v15 }
 0x8e7   :  { %v7569_v45 = vsel %vm7183_vm12, 4294967295, %v7568_v45 }
 0x967   :  { %v5683_v19 = vpop.f32.mrb[20].mxu1 }
 0x968   :  { %v5236_v20 = vsel %vm7549_vm6, %v5683_v19, 0.0  ;;  %v4740_v21 = vpop.f32.mrb[21].mxu1  ;;  %vm7152_vm6 = vmor %vm4912_vm8, %vm4928_vm3  ;;  %vm4989_vm3 = vcmp.eq.s32.totalorder %v7035_v59, 63 }
 0x969   :  { %v5235_v35 = vsel %vm7552_vm0, %v4740_v21, 0.0  ;;  %vm4990_vm0 = vcmp.eq.s32.totalorder %v7051_v11, 63  ;;  %vm7171_vm8 = vmor %vm7136_vm4, %vm4957_vm1  ;;  %vm5056_vm1 = vcmp.eq.s32.totalorder %v7040_v62, 84 }
 0x96a   :  { %v5765_v39 = vpack.c.bf16 %v5236_v20, %v5235_v35  ;;  %vm7189_vm4 = vmor %vm7152_vm6, %vm4992_vm11  ;;  %vm4863_vm11 = vcmp.eq.s32.totalorder %v7143_v38, 21 }
 0x96b   :  { %v5686_v17 = vpop.f32.mrb[22].mxu1  ;;  %vm7200_vm10 = vmor %vm4942_vm15, %vm4990_vm0  ;;  %vm4850_vm15 = vcmp.eq.s32.totalorder %v7159_v41, 0  ;;  %vm4866_vm0 = vcmp.eq.s32.totalorder %v7159_v41, 21 }
 0x96c   :  { %v5238_v6 = vsel %vm7563_vm5, %v5686_v17, 0.0  ;;  %v4750_v42 = vpop.f32.mrb[23].mxu1  ;;  %5766 = vmatpush3.bf16.msra.mxu0 %v5765_v39  ;;  %vm7572_vm5 = vnez %v7542_v14  ;;  %vm7226_vm6 = vmor %vm7189_vm4, %vm5056_vm1  ;;  %vm4895_vm4 = vcmp.eq.s32.totalorder %v7143_v38, 4294967275  ;;  %vm5120_vm1 = vcmp.eq.s32.totalorder %v7040_v62, 105 }
 0x96d   :  { %v5237_v44 = vsel %vm7566_vm13, %v4750_v42, 0.0  ;;  %5767 = vmatprep.subr.bf16.mxu0 %v5934_v52  ;;  %vm7196_vm13 = vmor %vm7572_vm5, %vm5019_vm9  ;;  %vm5053_vm5 = vcmp.eq.s32.totalorder %v7035_v59, 84  ;;  %v7581_v5 = vsel %vm7226_vm6, 4294967295, %v7580_v5 }
 0x96e   :  { %v5768_v53 = vpack.c.bf16 %v5238_v6, %v5237_v44  ;;  %v7574_v50 = vsel %vm7196_vm13, 4294967295, %v7573_v50  ;;  %vm7213_vm9 = vmor %vm7171_vm8, %vm4989_vm3  ;;  %vm7582_vm8 = vnez %v7548_v16 }
 0x96f   :  { %v5689_v24 = vpop.f32.mrb[24].mxu1  ;;  %vm7237_vm3 = vmor %vm7200_vm10, %vm5054_vm7  ;;  %vm4849_vm10 = vcmp.eq.s32.totalorder %v7209_v3, 0  ;;  %vm4865_vm7 = vcmp.eq.s32.totalorder %v7209_v3, 21 }
 0x970   :  { %v5240_v25 = vsel %vm7579_vm2, %v5689_v24, 0.0  ;;  %v4760_v26 = vpop.f32.mrb[25].mxu1  ;;  %5769 = vmatpush3.bf16.msra.mxu0 %v5768_v53  ;;  %v7584_v49 = vsel %vm7237_vm3, 4294967295, %v7583_v49  ;;  %vm7585_vm2 = vcmp.eq.s32.totalorder %v7143_v38, 0  ;;  %vm4882_vm12 = vmor %vm4850_vm15, %vm4866_vm0  ;;  %vm4927_vm15 = vcmp.eq.s32.totalorder %v7143_v38, 42 }
 0x971   :  { %v5239_v46 = vsel %vm7582_vm8, %v4760_v26, 0.0  ;;  %5770 = vmatprep.subr.bf16.mxu0 %v5934_v52  ;;  %vm4879_vm13 = vmor %vm7585_vm2, %vm4863_vm11  ;;  %vm4930_vm8 = vcmp.eq.s32.totalorder %v7159_v41, 42  ;;  %vm7588_vm0 = vnez %v7560_v2  ;;  %vm4991_vm3 = vcmp.eq.s32.totalorder %v7143_v38, 63 }
 0x972   :  { %v5771_v54 = vpack.c.bf16 %v5240_v25, %v5239_v46  ;;  %vm7248_vm6 = vmor %vm7213_vm9, %vm5053_vm5  ;;  %vm7589_vm9 = vnez %v7581_v5 }
 0x973   :  { %v5692_v55 = vpop.f32.mrb[26].mxu1  ;;  %v7587_v56 = vsel %vm7248_vm6, 4294967295, %v7586_v56  ;;  %vm4911_vm11 = vmor %vm4879_vm13, %vm4895_vm4  ;;  %vm4994_vm6 = vcmp.eq.s32.totalorder %v7159_v41, 63  ;;  %vm4929_vm13 = vcmp.eq.s32.totalorder %v7209_v3, 42 }
 0x974   :  { %v5242_v4 = vsel %vm7132_vm14, %v5692_v55, 0.0  ;;  %v4770_v57 = vpop.f32.mrb[27].mxu1  ;;  %5772 = vmatpush3.bf16.msra.mxu0 %v5771_v54  ;;  %vm7262_vm5 = vmor %vm7589_vm9, %vm5120_vm1  ;;  %vm5058_vm9 = vcmp.eq.s32.totalorder %v7159_v41, 84 }
 0x975   :  { %v5241_v63 = vsel %vm7588_vm0, %v4770_v57, 0.0  ;;  %5773 = vmatprep.subr.bf16.mxu0 %v5934_v52  ;;  %vm4946_vm2 = vmor %vm4882_vm12, %vm4930_vm8  ;;  %vm7592_vm0 = vnez %v7569_v45  ;;  %vm7593_vm12 = vnez %v7574_v50 }
 0x976   :  { %v5774_v27 = vpack.c.bf16 %v5242_v4, %v5241_v63  ;;  %vm4881_vm14 = vmor %vm4849_vm10, %vm4865_vm7  ;;  %vm4993_vm10 = vcmp.eq.s32.totalorder %v7209_v3, 63 }
 0x977   :  { %v5695_v28 = vpop.f32.mrb[28].mxu1  ;;  %vm4943_vm4 = vmor %vm4911_vm11, %vm4927_vm15  ;;  %vm5055_vm11 = vcmp.eq.s32.totalorder %v7143_v38, 84 }
 0x978   :  { %v5244_v1 = vsel %vm7592_vm0, %v5695_v28, 0.0  ;;  %v4780_v60 = vpop.f32.mrb[29].mxu1  ;;  %5775 = vmatpush3.bf16.msra.mxu0 %v5774_v27  ;;  %vm5010_vm1 = vmor %vm4946_vm2, %vm4994_vm6  ;;  %vm5122_vm0 = vcmp.eq.s32.totalorder %v7159_v41, 105  ;;  %vm7594_vm6 = vnez %v7584_v49 }
 0x979   :  { %v5243_v9 = vsel %vm7593_vm12, %v4780_v60, 0.0  ;;  %5776 = vmatprep.subr.bf16.mxu0 %v5934_v52  ;;  %vm4945_vm8 = vmor %vm4881_vm14, %vm4929_vm13  ;;  %vm5057_vm12 = vcmp.eq.s32.totalorder %v7209_v3, 84  ;;  %vm7595_vm14 = vnez %v7587_v56 }
 0x97a   :  { %v5777_v29 = vpack.c.bf16 %v5244_v1, %v5243_v9  ;;  %vm5007_vm7 = vmor %vm4943_vm4, %vm4991_vm3  ;;  %vm5186_vm4 = vcmp.eq.s32.totalorder %v7159_v41, 126 }
 0x97b   :  { %v5698_v30 = vpop.f32.mrb[30].mxu1  ;;  %vm5074_vm15 = vmor %vm5010_vm1, %vm5058_vm9  ;;  %vm5121_vm9 = vcmp.eq.s32.totalorder %v7209_v3, 105 }
 0x97c   :  { %v5246_v31 = vsel %vm7594_vm6, %v5698_v30, 0.0  ;;  %v4790_v32 = vpop.f32.mrb[31].mxu1  ;;  %5778 = vmatpush3.bf16.msra.mxu0 %v5777_v29  ;;  %vm5009_vm2 = vmor %vm4945_vm8, %vm4993_vm10 }
 0x97d   :  { %v5245_v58 = vsel %vm7595_vm14, %v4790_v32, 0.0  ;;  %5779 = vmatprep.subr.bf16.mxu0 %v5934_v52  ;;  %vm5071_vm3 = vmor %vm5007_vm7, %vm5055_vm11 }
 0x97e   :  { %v5780_v33 = vpack.c.bf16 %v5246_v31, %v5245_v58  ;;  %vm5138_vm13 = vmor %vm5074_vm15, %vm5122_vm0 }
 0x97f   :  { %v5701_v59 = vpop.f32.mrb[32].mxu1  ;;  %vm5073_vm1 = vmor %vm5009_vm2, %vm5057_vm12 }
 0x980   :  { %v5248_v62 = vsel %vm7262_vm5, %v5701_v59, 0.0  ;;  %v4800_v34 = vpop.f32.mrb[33].mxu1  ;;  %5781 = vmatpush3.bf16.msra.mxu0 %v5780_v33  ;;  %vm5202_vm8 = vmor %vm5138_vm13, %vm5186_vm4  ;;  %vm7596_vm5 = vcmp.eq.s32.totalorder %v6752_v43, 1 }
 0x981   :  { %v5247_v11 = vsel %vm5071_vm3, %v4800_v34, 0.0  ;;  %5782 = vmatprep.subr.bf16.mxu0 %v5934_v52  ;;  %vm5137_vm10 = vmor %vm5073_vm1, %vm5121_vm9 }
 0x982   :  { %v5783_v0 = vpack.c.bf16 %v5248_v62, %v5247_v11 }
 0x983   :  { %v5704_v18 = vpop.f32.mrb[34].mxu1 }
 0x984   :  { %v5250_v13 = vsel %vm5202_vm8, %v5704_v18, 0.0  ;;  %v4810_v7 = vpop.f32.mrb[35].mxu1  ;;  %5784 = vmatpush3.bf16.msra.mxu0 %v5783_v0 }
 0x985   :  { %v5249_v10 = vsel %vm5137_vm10, %v4810_v7, 0.0  ;;  %5785 = vmatprep.subr.bf16.mxu0 %v5934_v52 }
 0x986   :  { %v5786_v12 = vpack.c.bf16 %v5250_v13, %v5249_v10 }
 0x988   :  { %5787 = vmatpush3.bf16.msra.mxu0 %v5786_v12 }
 0x98b   :  { %5738 = vmatmul.mubr.msk.f32.vlgmr.msra.gmra.mrb[38].mxu0 %vm7596_vm5, %v6786_v51 }
 0xa5e   :  { %v5317_v14 = vpop.f32.mrb[38].mxu0 }
 0xa5f   :  { %v5321_v15 = vsub.f32 0.0, %v5317_v14  ;;  %v5739_v16 = vpop.f32.mrb[39].mxu0 }
 0xa61   :  { %v5322_v19 = vmul.f32 1.442695, %v5321_v15 }
 0xa63   :  { %5893 = vpow2.f32 %v5322_v19 }
 0xa6d   :  { %v5894_v20 = vpop.eup %5893 }
 0xa6e   :  { %v5324_v21 = vadd.f32 1.0, %v5894_v20 }
 0xa70   :  { %5895 = vrcp.f32 %v5324_v21 }
 0xa7a   :  { %v5896_v22 = vpop.eup %5895 }
 0xa7b   :  { %5326 = vst [vmem:[%s7298_s2] sm:$0xff] %v5896_v22 }

</bundles_post_ra>
